<compile_context>
chip_gen: v7x
topology: tpu7x:2x2x1
jax: 0.10.0
libtpu: 0.0.40
codegen_flags: <defaults>
</compile_context>

<pallas_src>
import math
import numpy as np
import jax
import jax.numpy as jnp
from jax import lax
from jax.experimental import pallas as pl
from jax.experimental.pallas import tpu as pltpu

# ---- configuration matching STNBlock(in_ch=4, in_res=16) ----
IN_CH = 4
IN_RES = 16
K1, K2 = 5, 3                                 # kernel_sizes for in_res <= 16
H1 = IN_RES - K1 + 1                          # 12  conv1 output res
P1 = H1 // 2                                  # 6   pool1 output res
H2 = P1 - K2 + 1                              # 4   conv2 output res
P2 = H2 // 2                                  # 2   pool2 output res
FC_RES = (IN_RES - K1 - 2 * K2 + 3) // 4      # 2
FC_SIZE = 10 * FC_RES * FC_RES                # 40
FC_HID = int(math.sqrt(FC_SIZE))              # 6
HW = IN_RES * IN_RES                          # 256
C1, C2 = 8, 10
L1 = C1 * P1 * P1                             # 288  pooled conv1 features
L2 = C2 * P2 * P2                             # 40   pooled conv2 features
L1P = 384                                     # layer-1 slab width (lane aligned)
L2P = 128                                     # layer-2 slab width (lane aligned)


# ---------------- host-side folding of conv + maxpool ----------------
def _fold_conv_pool(w, in_res):
    """Fold Conv2d(k, valid) + MaxPool2d(2,2) into 4 dense matrices.

    w: (Cout, Cin, k, k) numpy float32.
    Returns Wd of shape (4, Cin*in_res*in_res, Cout*outp*outp) such that for a
    channel-major flattened image x_flat:
      conv(x)[c1, 2*pi+di, 2*pj+dj] == (x_flat @ Wd[d])[c1*outp*outp + pi*outp + pj]
    with d = 2*di + dj.  maxpool+bias+relu are applied on top in the kernel.
    """
    cout, cin, k, _ = w.shape
    out = in_res - k + 1
    outp = out // 2
    T = np.zeros((cin, in_res, in_res, cout, out, out), np.float32)
    for ki in range(k):
        for kj in range(k):
            for oi in range(out):
                for oj in range(out):
                    T[:, oi + ki, oj + kj, :, oi, oj] = w[:, :, ki, kj].T
    T2 = T.reshape(cin * in_res * in_res, cout * out * out)
    Wd = np.zeros((4, cin * in_res * in_res, cout * outp * outp), np.float32)
    for d, (di, dj) in enumerate(((0, 0), (0, 1), (1, 0), (1, 1))):
        cg, pig, pjg = np.meshgrid(np.arange(cout), np.arange(outp),
                                   np.arange(outp), indexing="ij")
        src = (cg * out * out + (2 * pig + di) * out + (2 * pjg + dj)).reshape(-1)
        Wd[d] = T2[:, src]
    return Wd


def _pad_wide(Wd, in_pad, out_pad):
    """Concatenate the 4 pool-tap slabs along N, zero-padded to out_pad lanes."""
    _, nin, nout = Wd.shape
    W = np.zeros((in_pad, 4 * out_pad), np.float32)
    for d in range(4):
        W[:nin, d * out_pad:d * out_pad + nout] = Wd[d]
    return W


def _grid_basis():
    """(6, 256) matrices mapping theta rows to affine_grid x / y coordinates."""
    p = np.arange(HW)
    i = p // IN_RES
    j = p % IN_RES
    xn = (2.0 * j + 1.0) / IN_RES - 1.0       # align_corners=False pixel centers
    yn = (2.0 * i + 1.0) / IN_RES - 1.0
    ones = np.ones(HW, np.float32)
    bx = np.zeros((6, HW), np.float32)
    by = np.zeros((6, HW), np.float32)
    bx[0], bx[1], bx[2] = xn, yn, ones        # gx = t00*xn + t01*yn + t02
    by[3], by[4], by[5] = xn, yn, ones        # gy = t10*xn + t11*yn + t12
    return bx, by


# ---------------- fused kernel ----------------
def stn_kernel(xrow_ref, xcyx_ref, w1_ref, b1_ref, w2_ref, b2_ref,
               fc1w_ref, fc1b_ref, gw_ref, gb_ref, o_ref):
    bt = xrow_ref.shape[0]

    # ---- localization layer 1: conv5x5 -> maxpool2 -> relu ----------------
    # One wide bf16 MXU matmul; the 4 pool taps live in lane-aligned 384-wide
    # slabs -> max over 4 static aligned slices, then +bias, relu.
    xr = xrow_ref[...].astype(jnp.bfloat16)                            # (Bt,1024)
    a1 = jnp.dot(xr, w1_ref[...], preferred_element_type=jnp.float32)  # (Bt,1536)
    m1 = jnp.maximum(jnp.maximum(a1[:, 0 * L1P:1 * L1P], a1[:, 1 * L1P:2 * L1P]),
                     jnp.maximum(a1[:, 2 * L1P:3 * L1P], a1[:, 3 * L1P:4 * L1P]))
    p1 = jnp.maximum(m1 + b1_ref[...], 0.0)                            # (Bt,384)

    # ---- localization layer 2: conv3x3 -> maxpool2 -> relu ----------------
    p1b = p1.astype(jnp.bfloat16)
    a2 = jnp.dot(p1b, w2_ref[...], preferred_element_type=jnp.float32)  # (Bt,512)
    m2 = jnp.maximum(jnp.maximum(a2[:, 0 * L2P:1 * L2P], a2[:, 1 * L2P:2 * L2P]),
                     jnp.maximum(a2[:, 2 * L2P:3 * L2P], a2[:, 3 * L2P:4 * L2P]))
    p2 = jnp.maximum(m2 + b2_ref[...], 0.0)                            # (Bt,128)

    # ---- fc_loc + affine_grid (fc2 weight & grid basis folded host-side) --
    h = jnp.maximum(jnp.dot(p2, fc1w_ref[...],
                            preferred_element_type=jnp.float32) + fc1b_ref[...],
                    0.0)                                               # (Bt,6)
    gxy = jnp.dot(h, gw_ref[...],
                  preferred_element_type=jnp.float32) + gb_ref[...]    # (Bt,512)
    ix = (gxy[:, :HW] + 1.0) * (0.5 * IN_RES) - 0.5                    # (Bt,256)
    iy = (gxy[:, HW:] + 1.0) * (0.5 * IN_RES) - 0.5

    # ---- grid_sample: bilinear, zeros padding, align_corners=False --------
    # Tent weights relu(1 - |idx - coord|) == bilinear weights (zeros padding
    # falls out naturally: OOB taps get weight 0).
    idx = lax.broadcasted_iota(jnp.int32, (1, IN_RES, HW), 1).astype(jnp.float32)
    cx = jnp.maximum(1.0 - jnp.abs(idx - ix[:, None, :]), 0.0)         # (Bt,16,256)
    ry = jnp.maximum(1.0 - jnp.abs(idx - iy[:, None, :]), 0.0)         # (Bt,16,256)

    # Horizontal interpolation for all (c, y) rows at once: batched MXU matmul.
    hx = jnp.einsum("bri,bip->brp", xcyx_ref[...], cx,
                    preferred_element_type=jnp.float32)                # (Bt,64,256)
    # Vertical interpolation + per-channel sum as a sublane-group reduction.
    hx4 = hx.reshape(bt, IN_CH, IN_RES, HW)                            # (Bt,4,16,256)
    o_ref[...] = jnp.sum(hx4 * ry[:, None, :, :], axis=2)              # (Bt,4,256)


# ---------------- parameters (deterministic, PyTorch-style init) ----------------
def init_raw_params(key, fc2_scale=0.0):
    """PyTorch-style init of STNBlock(4, 16).  fc2_scale=0 reproduces the module
    exactly (fc_loc[2].weight zeroed, bias = identity); fc2_scale>0 perturbs
    fc_loc[2].weight so the self-test exercises a non-trivial warp."""
    ks = jax.random.split(key, 7)
    bnd1 = 1.0 / math.sqrt(IN_CH * K1 * K1)
    w1 = jax.random.uniform(ks[0], (C1, IN_CH, K1, K1), jnp.float32, -bnd1, bnd1)
    b1 = jax.random.uniform(ks[1], (C1,), jnp.float32, -bnd1, bnd1)
    bnd2 = 1.0 / math.sqrt(C1 * K2 * K2)
    w2 = jax.random.uniform(ks[2], (C2, C1, K2, K2), jnp.float32, -bnd2, bnd2)
    b2 = jax.random.uniform(ks[3], (C2,), jnp.float32, -bnd2, bnd2)
    bndf = 1.0 / math.sqrt(FC_SIZE)
    fc1w = jax.random.uniform(ks[4], (FC_HID, FC_SIZE), jnp.float32, -bndf, bndf)
    fc1b = jax.random.uniform(ks[5], (FC_HID,), jnp.float32, -bndf, bndf)
    fc2w = fc2_scale * jax.random.uniform(ks[6], (6, FC_HID), jnp.float32, -1.0, 1.0)
    fc2b = jnp.array([1, 0, 0, 0, 1, 0], jnp.float32)
    return dict(w1=w1, b1=b1, w2=w2, b2=b2,
                fc1w=fc1w, fc1b=fc1b, fc2w=fc2w, fc2b=fc2b)


def pack_params(raw):
    """Host-side folding of the module parameters into kernel operands."""
    w1 = np.asarray(raw["w1"], np.float32)
    w2 = np.asarray(raw["w2"], np.float32)
    b1 = np.asarray(raw["b1"], np.float32)
    b2 = np.asarray(raw["b2"], np.float32)
    fc1w = np.asarray(raw["fc1w"], np.float32)
    fc1b = np.asarray(raw["fc1b"], np.float32)
    fc2w = np.asarray(raw["fc2w"], np.float32)
    fc2b = np.asarray(raw["fc2b"], np.float32)

    w1d = _pad_wide(_fold_conv_pool(w1, IN_RES), IN_CH * IN_RES * IN_RES, L1P)
    w2d = _pad_wide(_fold_conv_pool(w2, P1), L1P, L2P)
    b1w = np.zeros((1, L1P), np.float32)
    b1w[0, :L1] = np.repeat(b1, P1 * P1)
    b2w = np.zeros((1, L2P), np.float32)
    b2w[0, :L2] = np.repeat(b2, P2 * P2)
    fc1w_pad = np.zeros((L2P, FC_HID), np.float32)
    fc1w_pad[:FC_SIZE, :] = fc1w.T

    bx, by = _grid_basis()
    bxy = np.concatenate([bx, by], axis=1)                 # (6, 512)
    gw = fc2w.T @ bxy                                      # (FC_HID, 512)
    gb = fc2b[None, :] @ bxy                               # (1, 512)

    return dict(w1=jnp.asarray(w1d, jnp.bfloat16),
                b1=jnp.asarray(b1w),
                w2=jnp.asarray(w2d, jnp.bfloat16),
                b2=jnp.asarray(b2w),
                fc1w=jnp.asarray(fc1w_pad),
                fc1b=jnp.asarray(fc1b).reshape(1, FC_HID),
                gw=jnp.asarray(gw, jnp.float32),
                gb=jnp.asarray(gb, jnp.float32))


# ---------------- wrapper ----------------
def _const_spec(a):
    zeros = (0,) * a.ndim
    return pl.BlockSpec(a.shape, lambda i, _z=zeros: _z)


def stn_forward(x_nchw, params, block_batch=64):
    # block_batch=64 keeps all sampling intermediates comfortably inside v7x's
    # 64 MiB VMEM; on v5e/v6e (128 MiB) it can be raised to 128-256.
    B, C, H, W = x_nchw.shape
    assert (C, H, W) == (IN_CH, IN_RES, IN_RES)
    x = x_nchw.astype(jnp.float32)

    # Batch tile: multiple of 8, <= block_batch, and small enough to give the
    # grid >= 2 steps when possible so the "parallel" axis can use both
    # TensorCores on v7x.
    half = -(-B // 2)
    bt = min(block_batch, max(8, ((half + 7) // 8) * 8))
    bp = ((B + bt - 1) // bt) * bt
    if bp != B:
        x = jnp.concatenate([x, jnp.zeros((bp - B, C, H, W), x.dtype)], axis=0)

    # Free reshapes of NCHW (no transposes): channel-major flattens.
    x_row = x.reshape(bp, C * H * W)                 # (Bp, 1024)
    x_cyx = x.reshape(bp, C * H, W)                  # (Bp, 64, 16), rows = (c, y)

    p = params
    out = pl.pallas_call(
        stn_kernel,
        out_shape=jax.ShapeDtypeStruct((bp, C, H * W), jnp.float32),
        grid=(bp // bt,),
        in_specs=[pl.BlockSpec((bt, C * H * W), lambda i: (i, 0)),
                  pl.BlockSpec((bt, C * H, W), lambda i: (i, 0, 0)),
                  _const_spec(p["w1"]), _const_spec(p["b1"]),
                  _const_spec(p["w2"]), _const_spec(p["b2"]),
                  _const_spec(p["fc1w"]), _const_spec(p["fc1b"]),
                  _const_spec(p["gw"]), _const_spec(p["gb"])],
        out_specs=pl.BlockSpec((bt, C, H * W), lambda i: (i, 0, 0)),
        compiler_params=pltpu.CompilerParams(
            dimension_semantics=("parallel",),       # independent batch blocks
            vmem_limit_bytes=48 * 1024 * 1024),
    )(x_row, x_cyx, p["w1"], p["b1"], p["w2"], p["b2"],
      p["fc1w"], p["fc1b"], p["gw"], p["gb"])

    return out[:B].reshape(B, C, H, W)


# ---------------- independent pure-JAX reference (for the self-test) ----------------
def _bf16(a):
    return a.astype(jnp.bfloat16).astype(jnp.float32)


def stn_reference(x, raw):
    """STNBlock.forward written directly with lax conv / pool / gather (no folded
    matrices, no tent trick).  Conv inputs & weights are rounded to bf16 to
    match the kernel's MXU dtype; everything else runs in f32."""
    hi = lax.Precision.HIGHEST
    x = x.astype(jnp.float32)
    B = x.shape[0]

    def conv_pool_relu(a, w, b):
        c = lax.conv_general_dilated(
            _bf16(a), _bf16(w), window_strides=(1, 1), padding="VALID",
            dimension_numbers=("NCHW", "OIHW", "NCHW"), precision=hi)
        c = c + b[None, :, None, None]
        c = lax.reduce_window(c, -jnp.inf, lax.max,
                              (1, 1, 2, 2), (1, 1, 2, 2), "VALID")
        return jnp.maximum(c, 0.0)

    p1 = conv_pool_relu(x, raw["w1"], raw["b1"])               # (B, 8, 6, 6)
    p2 = conv_pool_relu(p1, raw["w2"], raw["b2"])              # (B, 10, 2, 2)
    xs = p2.reshape(B, FC_SIZE)
    h = jnp.maximum(jnp.dot(xs, raw["fc1w"].T, precision=hi) + raw["fc1b"], 0.0)
    theta = (jnp.dot(h, raw["fc2w"].T, precision=hi) + raw["fc2b"]).reshape(B, 2, 3)

    # affine_grid, align_corners=False (pixel-center normalized coordinates)
    t = (2.0 * jnp.arange(IN_RES, dtype=jnp.float32) + 1.0) / IN_RES - 1.0
    xn = jnp.broadcast_to(t[None, :], (IN_RES, IN_RES))
    yn = jnp.broadcast_to(t[:, None], (IN_RES, IN_RES))
    gx = (theta[:, 0, 0, None, None] * xn + theta[:, 0, 1, None, None] * yn
          + theta[:, 0, 2, None, None])
    gy = (theta[:, 1, 0, None, None] * xn + theta[:, 1, 1, None, None] * yn
          + theta[:, 1, 2, None, None])
    ix = ((gx + 1.0) * IN_RES - 1.0) * 0.5
    iy = ((gy + 1.0) * IN_RES - 1.0) * 0.5

    def sample_one(img, iyb, ixb):
        x0 = jnp.floor(ixb)
        y0 = jnp.floor(iyb)
        out = jnp.zeros((IN_CH, IN_RES, IN_RES), jnp.float32)
        for dy in (0.0, 1.0):
            for dx in (0.0, 1.0):
                xc = x0 + dx
                yc = y0 + dy
                w = (1.0 - jnp.abs(ixb - xc)) * (1.0 - jnp.abs(iyb - yc))
                xi = xc.astype(jnp.int32)
                yi = yc.astype(jnp.int32)
                valid = (xi >= 0) & (xi < IN_RES) & (yi >= 0) & (yi < IN_RES)
                xi = jnp.clip(xi, 0, IN_RES - 1)
                yi = jnp.clip(yi, 0, IN_RES - 1)
                out = out + jnp.where(valid, w, 0.0)[None] * img[:, yi, xi]
        return out

    return jax.vmap(sample_one)(x, iy, ix)


if __name__ == "__main__":
    key = jax.random.PRNGKey(0)
    pkey, xkey = jax.random.split(key)
    x = jax.random.normal(xkey, (2, IN_CH, IN_RES, IN_RES), jnp.float32)

    # 1) Module as specified: fc_loc[2].weight == 0 and bias == identity, so the
    #    STN must reproduce its input (identity warp) regardless of the conv path.
    raw_id = init_raw_params(pkey, fc2_scale=0.0)
    out_id = jax.block_until_ready(stn_forward(x, pack_params(raw_id)))
    assert out_id.shape == x.shape
    assert np.allclose(np.asarray(out_id), np.asarray(x), atol=2e-3, rtol=2e-3)

    # 2) Non-trivial warp: perturb fc_loc[2].weight and compare against the
    #    independent pure-JAX reference (exercises the folded convs, fc_loc,
    #    affine_grid and bilinear grid_sample end-to-end).
    raw_w = init_raw_params(pkey, fc2_scale=0.25)
    out_w = jax.block_until_ready(stn_forward(x, pack_params(raw_w)))
    ref_w = jax.block_until_ready(stn_reference(x, raw_w))
    assert np.allclose(np.asarray(out_w), np.asarray(ref_w), atol=2e-2, rtol=2e-2)

    print("KERNEL_OK")
</pallas_src>

<mosaic_0001>
module attributes {stable_mosaic.version = 11 : i64} {
  func.func @stn_kernel(%arg0: i32, %arg1: memref<8x1024xf32, #tpu.memory_space<vmem>>, %arg2: memref<8x64x16xf32, #tpu.memory_space<vmem>>, %arg3: memref<1024x1536xbf16, #tpu.memory_space<vmem>>, %arg4: memref<1x384xf32, #tpu.memory_space<vmem>>, %arg5: memref<384x512xbf16, #tpu.memory_space<vmem>>, %arg6: memref<1x128xf32, #tpu.memory_space<vmem>>, %arg7: memref<128x6xf32, #tpu.memory_space<vmem>>, %arg8: memref<1x6xf32, #tpu.memory_space<vmem>>, %arg9: memref<6x512xf32, #tpu.memory_space<vmem>>, %arg10: memref<1x512xf32, #tpu.memory_space<vmem>>, %arg11: memref<8x4x256xf32, #tpu.memory_space<vmem>>) attributes {dimension_semantics = [#tpu.dimension_semantics<parallel>], iteration_bounds = array<i64: 1>, scalar_prefetch = 0 : i64, scratch_operands = 0 : i64, tpu.core_type = #tpu.core_type<tc>, window_params = [{transform_indices = @transform_0, window_bounds = array<i64: 8, 1024>}, {transform_indices = @transform_1, window_bounds = array<i64: 8, 64, 16>}, {pipeline_mode = #tpu.pipeline_mode<synchronous>, transform_indices = @transform_2, window_bounds = array<i64: 1024, 1536>}, {pipeline_mode = #tpu.pipeline_mode<synchronous>, transform_indices = @transform_3, window_bounds = array<i64: 1, 384>}, {pipeline_mode = #tpu.pipeline_mode<synchronous>, transform_indices = @transform_4, window_bounds = array<i64: 384, 512>}, {pipeline_mode = #tpu.pipeline_mode<synchronous>, transform_indices = @transform_5, window_bounds = array<i64: 1, 128>}, {pipeline_mode = #tpu.pipeline_mode<synchronous>, transform_indices = @transform_6, window_bounds = array<i64: 128, 6>}, {pipeline_mode = #tpu.pipeline_mode<synchronous>, transform_indices = @transform_7, window_bounds = array<i64: 1, 6>}, {pipeline_mode = #tpu.pipeline_mode<synchronous>, transform_indices = @transform_8, window_bounds = array<i64: 6, 512>}, {pipeline_mode = #tpu.pipeline_mode<synchronous>, transform_indices = @transform_9, window_bounds = array<i64: 1, 512>}, {transform_indices = @transform_10, window_bounds = array<i64: 8, 4, 256>}]} {
    %c0 = arith.constant 0 : index
    %c0_0 = arith.constant 0 : index
    %0 = vector.load %arg1[%c0, %c0_0] : memref<8x1024xf32, #tpu.memory_space<vmem>>, vector<8x1024xf32>
    %1 = arith.truncf %0 : vector<8x1024xf32> to vector<8x1024xbf16>
    %c0_1 = arith.constant 0 : index
    %c0_2 = arith.constant 0 : index
    %2 = vector.load %arg3[%c0_1, %c0_2] : memref<1024x1536xbf16, #tpu.memory_space<vmem>>, vector<1024x1536xbf16>
    %cst = arith.constant dense<0.000000e+00> : vector<8x1536xf32>
    %3 = tpu.matmul %1, %2, %cst {dimension_numbers = #tpu.dot_dimension_numbers<[1], [0], [0], [1], [0, 0, 1, 1], [], []>} : vector<8x1024xbf16>, vector<1024x1536xbf16>, vector<8x1536xf32> -> vector<8x1536xf32>
    %4 = vector.extract_strided_slice %3 {offsets = [0, 0], sizes = [8, 384], strides = [1, 1]} : vector<8x1536xf32> to vector<8x384xf32>
    %5 = vector.extract_strided_slice %3 {offsets = [0, 384], sizes = [8, 384], strides = [1, 1]} : vector<8x1536xf32> to vector<8x384xf32>
    %6 = arith.maximumf %4, %5 : vector<8x384xf32>
    %7 = vector.extract_strided_slice %3 {offsets = [0, 768], sizes = [8, 384], strides = [1, 1]} : vector<8x1536xf32> to vector<8x384xf32>
    %8 = vector.extract_strided_slice %3 {offsets = [0, 1152], sizes = [8, 384], strides = [1, 1]} : vector<8x1536xf32> to vector<8x384xf32>
    %9 = arith.maximumf %7, %8 : vector<8x384xf32>
    %10 = arith.maximumf %6, %9 : vector<8x384xf32>
    %c0_3 = arith.constant 0 : index
    %c0_4 = arith.constant 0 : index
    %11 = vector.load %arg4[%c0_3, %c0_4] : memref<1x384xf32, #tpu.memory_space<vmem>>, vector<1x384xf32>
    %12 = vector.broadcast %11 : vector<1x384xf32> to vector<8x384xf32>
    %13 = arith.addf %10, %12 : vector<8x384xf32>
    %cst_5 = arith.constant 0.000000e+00 : f32
    %14 = vector.broadcast %cst_5 : f32 to vector<8x384xf32>
    %15 = arith.maximumf %13, %14 : vector<8x384xf32>
    %16 = arith.truncf %15 : vector<8x384xf32> to vector<8x384xbf16>
    %c0_6 = arith.constant 0 : index
    %c0_7 = arith.constant 0 : index
    %17 = vector.load %arg5[%c0_6, %c0_7] : memref<384x512xbf16, #tpu.memory_space<vmem>>, vector<384x512xbf16>
    %cst_8 = arith.constant dense<0.000000e+00> : vector<8x512xf32>
    %18 = tpu.matmul %16, %17, %cst_8 {dimension_numbers = #tpu.dot_dimension_numbers<[1], [0], [0], [1], [0, 0, 1, 1], [], []>} : vector<8x384xbf16>, vector<384x512xbf16>, vector<8x512xf32> -> vector<8x512xf32>
    %19 = vector.extract_strided_slice %18 {offsets = [0, 0], sizes = [8, 128], strides = [1, 1]} : vector<8x512xf32> to vector<8x128xf32>
    %20 = vector.extract_strided_slice %18 {offsets = [0, 128], sizes = [8, 128], strides = [1, 1]} : vector<8x512xf32> to vector<8x128xf32>
    %21 = arith.maximumf %19, %20 : vector<8x128xf32>
    %22 = vector.extract_strided_slice %18 {offsets = [0, 256], sizes = [8, 128], strides = [1, 1]} : vector<8x512xf32> to vector<8x128xf32>
    %23 = vector.extract_strided_slice %18 {offsets = [0, 384], sizes = [8, 128], strides = [1, 1]} : vector<8x512xf32> to vector<8x128xf32>
    %24 = arith.maximumf %22, %23 : vector<8x128xf32>
    %25 = arith.maximumf %21, %24 : vector<8x128xf32>
    %c0_9 = arith.constant 0 : index
    %c0_10 = arith.constant 0 : index
    %26 = vector.load %arg6[%c0_9, %c0_10] : memref<1x128xf32, #tpu.memory_space<vmem>>, vector<1x128xf32>
    %27 = vector.broadcast %26 : vector<1x128xf32> to vector<8x128xf32>
    %28 = arith.addf %25, %27 : vector<8x128xf32>
    %cst_11 = arith.constant 0.000000e+00 : f32
    %29 = vector.broadcast %cst_11 : f32 to vector<8x128xf32>
    %30 = arith.maximumf %28, %29 : vector<8x128xf32>
    %c0_12 = arith.constant 0 : index
    %c0_13 = arith.constant 0 : index
    %31 = vector.load %arg7[%c0_12, %c0_13] : memref<128x6xf32, #tpu.memory_space<vmem>>, vector<128x6xf32>
    %cst_14 = arith.constant dense<0.000000e+00> : vector<8x6xf32>
    %32 = tpu.matmul %30, %31, %cst_14 {dimension_numbers = #tpu.dot_dimension_numbers<[1], [0], [0], [1], [0, 0, 1, 1], [], []>} : vector<8x128xf32>, vector<128x6xf32>, vector<8x6xf32> -> vector<8x6xf32>
    %c0_15 = arith.constant 0 : index
    %c0_16 = arith.constant 0 : index
    %33 = vector.load %arg8[%c0_15, %c0_16] : memref<1x6xf32, #tpu.memory_space<vmem>>, vector<1x6xf32>
    %34 = vector.broadcast %33 : vector<1x6xf32> to vector<8x6xf32>
    %35 = arith.addf %32, %34 : vector<8x6xf32>
    %cst_17 = arith.constant 0.000000e+00 : f32
    %36 = vector.broadcast %cst_17 : f32 to vector<8x6xf32>
    %37 = arith.maximumf %35, %36 : vector<8x6xf32>
    %c0_18 = arith.constant 0 : index
    %c0_19 = arith.constant 0 : index
    %38 = vector.load %arg9[%c0_18, %c0_19] : memref<6x512xf32, #tpu.memory_space<vmem>>, vector<6x512xf32>
    %cst_20 = arith.constant dense<0.000000e+00> : vector<8x512xf32>
    %39 = tpu.matmul %37, %38, %cst_20 {dimension_numbers = #tpu.dot_dimension_numbers<[1], [0], [0], [1], [0, 0, 1, 1], [], []>} : vector<8x6xf32>, vector<6x512xf32>, vector<8x512xf32> -> vector<8x512xf32>
    %c0_21 = arith.constant 0 : index
    %c0_22 = arith.constant 0 : index
    %40 = vector.load %arg10[%c0_21, %c0_22] : memref<1x512xf32, #tpu.memory_space<vmem>>, vector<1x512xf32>
    %41 = vector.broadcast %40 : vector<1x512xf32> to vector<8x512xf32>
    %42 = arith.addf %39, %41 : vector<8x512xf32>
    %43 = vector.extract_strided_slice %42 {offsets = [0, 0], sizes = [8, 256], strides = [1, 1]} : vector<8x512xf32> to vector<8x256xf32>
    %cst_23 = arith.constant 1.000000e+00 : f32
    %44 = vector.broadcast %cst_23 : f32 to vector<8x256xf32>
    %45 = arith.addf %43, %44 : vector<8x256xf32>
    %cst_24 = arith.constant 8.000000e+00 : f32
    %46 = vector.broadcast %cst_24 : f32 to vector<8x256xf32>
    %47 = arith.mulf %45, %46 : vector<8x256xf32>
    %cst_25 = arith.constant 5.000000e-01 : f32
    %48 = vector.broadcast %cst_25 : f32 to vector<8x256xf32>
    %49 = arith.subf %47, %48 : vector<8x256xf32>
    %50 = vector.extract_strided_slice %42 {offsets = [0, 256], sizes = [8, 256], strides = [1, 1]} : vector<8x512xf32> to vector<8x256xf32>
    %cst_26 = arith.constant 1.000000e+00 : f32
    %51 = vector.broadcast %cst_26 : f32 to vector<8x256xf32>
    %52 = arith.addf %50, %51 : vector<8x256xf32>
    %cst_27 = arith.constant 8.000000e+00 : f32
    %53 = vector.broadcast %cst_27 : f32 to vector<8x256xf32>
    %54 = arith.mulf %52, %53 : vector<8x256xf32>
    %cst_28 = arith.constant 5.000000e-01 : f32
    %55 = vector.broadcast %cst_28 : f32 to vector<8x256xf32>
    %56 = arith.subf %54, %55 : vector<8x256xf32>
    %57 = tpu.iota {dimensions = array<i32: 1>} : vector<1x16x256xi32>
    %58 = arith.sitofp %57 : vector<1x16x256xi32> to vector<1x16x256xf32>
    %59 = vector.shape_cast %49 : vector<8x256xf32> to vector<8x1x256xf32>
    %60 = vector.broadcast %58 : vector<1x16x256xf32> to vector<8x16x256xf32>
    %61 = vector.broadcast %59 : vector<8x1x256xf32> to vector<8x16x256xf32>
    %62 = arith.subf %60, %61 : vector<8x16x256xf32>
    %63 = math.absf %62 : vector<8x16x256xf32>
    %cst_29 = arith.constant 1.000000e+00 : f32
    %64 = vector.broadcast %cst_29 : f32 to vector<8x16x256xf32>
    %65 = arith.subf %64, %63 : vector<8x16x256xf32>
    %cst_30 = arith.constant 0.000000e+00 : f32
    %66 = vector.broadcast %cst_30 : f32 to vector<8x16x256xf32>
    %67 = arith.maximumf %65, %66 : vector<8x16x256xf32>
    %68 = vector.shape_cast %56 : vector<8x256xf32> to vector<8x1x256xf32>
    %69 = vector.broadcast %58 : vector<1x16x256xf32> to vector<8x16x256xf32>
    %70 = vector.broadcast %68 : vector<8x1x256xf32> to vector<8x16x256xf32>
    %71 = arith.subf %69, %70 : vector<8x16x256xf32>
    %72 = math.absf %71 : vector<8x16x256xf32>
    %cst_31 = arith.constant 1.000000e+00 : f32
    %73 = vector.broadcast %cst_31 : f32 to vector<8x16x256xf32>
    %74 = arith.subf %73, %72 : vector<8x16x256xf32>
    %cst_32 = arith.constant 0.000000e+00 : f32
    %75 = vector.broadcast %cst_32 : f32 to vector<8x16x256xf32>
    %76 = arith.maximumf %74, %75 : vector<8x16x256xf32>
    %c0_33 = arith.constant 0 : index
    %c0_34 = arith.constant 0 : index
    %c0_35 = arith.constant 0 : index
    %77 = vector.load %arg2[%c0_33, %c0_34, %c0_35] : memref<8x64x16xf32, #tpu.memory_space<vmem>>, vector<8x64x16xf32>
    "tpu.trace_start"() <{level = 10 : i32, message = "bri,bip->brp"}> : () -> ()
    %cst_36 = arith.constant dense<0.000000e+00> : vector<8x64x256xf32>
    %78 = tpu.matmul %77, %67, %cst_36 {dimension_numbers = #tpu.dot_dimension_numbers<[2], [1], [1], [2], [0, 0, 0, 1, 1, 2], [0], [0]>} : vector<8x64x16xf32>, vector<8x16x256xf32>, vector<8x64x256xf32> -> vector<8x64x256xf32>
    "tpu.trace_stop"() : () -> ()
    %79 = vector.shape_cast %78 : vector<8x64x256xf32> to vector<8x4x16x256xf32>
    %80 = vector.shape_cast %76 : vector<8x16x256xf32> to vector<8x1x16x256xf32>
    %81 = vector.broadcast %80 : vector<8x1x16x256xf32> to vector<8x4x16x256xf32>
    %82 = arith.mulf %79, %81 : vector<8x4x16x256xf32>
    %cst_37 = arith.constant dense<0.000000e+00> : vector<8x4x256xf32>
    %83 = vector.multi_reduction <add>, %82, %cst_37 [2] : vector<8x4x16x256xf32> to vector<8x4x256xf32>
    %c0_38 = arith.constant 0 : index
    %c0_39 = arith.constant 0 : index
    %c0_40 = arith.constant 0 : index
    %84 = vector.load %arg11[%c0_38, %c0_39, %c0_40] : memref<8x4x256xf32, #tpu.memory_space<vmem>>, vector<8x4x256xf32>
    tpu.vector_store %arg11[%c0_38, %c0_39, %c0_40], %83 {strides = array<i32>} : memref<8x4x256xf32, #tpu.memory_space<vmem>>, vector<8x4x256xf32>,
    return
  }
  func.func @transform_0(%arg0: i32) -> (i32, i32) {
    %c0_i32 = arith.constant 0 : i32
    %c0_i32_0 = arith.constant 0 : i32
    return %arg0, %c0_i32 : i32, i32
  }
  func.func @transform_1(%arg0: i32) -> (i32, i32, i32) {
    %c0_i32 = arith.constant 0 : i32
    %c0_i32_0 = arith.constant 0 : i32
    %c0_i32_1 = arith.constant 0 : i32
    return %arg0, %c0_i32, %c0_i32_0 : i32, i32, i32
  }
  func.func @transform_2(%arg0: i32) -> (i32, i32) {
    %c0_i32 = arith.constant 0 : i32
    %c0_i32_0 = arith.constant 0 : i32
    %c0_i32_1 = arith.constant 0 : i32
    return %c0_i32, %c0_i32_0 : i32, i32
  }
  func.func @transform_3(%arg0: i32) -> (i32, i32) {
    %c0_i32 = arith.constant 0 : i32
    %c0_i32_0 = arith.constant 0 : i32
    %c0_i32_1 = arith.constant 0 : i32
    return %c0_i32, %c0_i32_0 : i32, i32
  }
  func.func @transform_4(%arg0: i32) -> (i32, i32) {
    %c0_i32 = arith.constant 0 : i32
    %c0_i32_0 = arith.constant 0 : i32
    %c0_i32_1 = arith.constant 0 : i32
    return %c0_i32, %c0_i32_0 : i32, i32
  }
  func.func @transform_5(%arg0: i32) -> (i32, i32) {
    %c0_i32 = arith.constant 0 : i32
    %c0_i32_0 = arith.constant 0 : i32
    %c0_i32_1 = arith.constant 0 : i32
    return %c0_i32, %c0_i32_0 : i32, i32
  }
  func.func @transform_6(%arg0: i32) -> (i32, i32) {
    %c0_i32 = arith.constant 0 : i32
    %c0_i32_0 = arith.constant 0 : i32
    %c0_i32_1 = arith.constant 0 : i32
    return %c0_i32, %c0_i32_0 : i32, i32
  }
  func.func @transform_7(%arg0: i32) -> (i32, i32) {
    %c0_i32 = arith.constant 0 : i32
    %c0_i32_0 = arith.constant 0 : i32
    %c0_i32_1 = arith.constant 0 : i32
    return %c0_i32, %c0_i32_0 : i32, i32
  }
  func.func @transform_8(%arg0: i32) -> (i32, i32) {
    %c0_i32 = arith.constant 0 : i32
    %c0_i32_0 = arith.constant 0 : i32
    %c0_i32_1 = arith.constant 0 : i32
    return %c0_i32, %c0_i32_0 : i32, i32
  }
  func.func @transform_9(%arg0: i32) -> (i32, i32) {
    %c0_i32 = arith.constant 0 : i32
    %c0_i32_0 = arith.constant 0 : i32
    %c0_i32_1 = arith.constant 0 : i32
    return %c0_i32, %c0_i32_0 : i32, i32
  }
  func.func @transform_10(%arg0: i32) -> (i32, i32, i32) {
    %c0_i32 = arith.constant 0 : i32
    %c0_i32_0 = arith.constant 0 : i32
    %c0_i32_1 = arith.constant 0 : i32
    return %arg0, %c0_i32, %c0_i32_0 : i32, i32, i32
  }
}

</mosaic_0001>

<bundles_post_ra>
// kernel: tpu_custom_call.1
= control target key start
LH: loop header
LB: loop body
LE: loop exit
PB: predicated region body
PF: predicated region fallthrough
CT: control target
= control target key end

     0   :  { %15 = vsyncpa [#allocation3], 0  ;;  %s13347_s0 = inlined_call_operand.hbm [shape: f32[8,1024], index: 0, kind: input, shape index: {}]   ;;  %s13348_s1 = inlined_call_operand.vmem [shape: f32[8,64,16], index: 1, kind: input, shape index: {}]   ;;  %s13349_s2 = inlined_call_operand.hbm [shape: bf16[1024,1536], index: 2, kind: input, shape index: {}]   ;;  %s13350_s3 = inlined_call_operand.hbm [shape: f32[1,384], index: 3, kind: input, shape index: {}]   ;;  %s13351_s4 = inlined_call_operand.hbm [shape: bf16[384,512], index: 4, kind: input, shape index: {}]   ;;  %s13352_s5 = inlined_call_operand.hbm [shape: f32[1,128], index: 5, kind: input, shape index: {}]   ;;  %s13353_s6 = inlined_call_operand.vmem [shape: f32[128,6], index: 6, kind: input, shape index: {}]   ;;  %s13354_s7 = inlined_call_operand.hbm [shape: f32[1,6], index: 7, kind: input, shape index: {}]   ;;  %s13355_s8 = inlined_call_operand.hbm [shape: f32[6,512], index: 8, kind: input, shape index: {}]   ;;  %s13356_s9 = inlined_call_operand.hbm [shape: f32[1,512], index: 9, kind: input, shape index: {}]   ;;  %s13357_s10 = inlined_call_operand.hbm [shape: f32[8,4,256], index: 10, kind: output, shape index: {}]  }
   0x1   :  { %16 = vsyncpa [#allocation6], 0 }
   0x2   :  { %17 = vsyncpa [#allocation9], 0 }
   0x3   :  { %18 = vsyncpa [#allocation12], 0 }
   0x4   :  { %19 = vsyncpa [#allocation15], 0 }
   0x5   :  { %20 = vsyncpa [#allocation4], 0  ;;  %s11949_s13 = smov [#allocation5]   ;;  %s11739_s17 = scalar_lea.hbm %s13349_s2, 98304 }
   0x6   :  { %s38_s14 = sshll.u32 %s11949_s13, 4  ;;  %p11740_p0 = scmp.ne.s32.totalorder %s13349_s2, %s11739_s17  ;;  %s39_s14 = int_to_ptr.vmem [resolvable:$true] %s38_s14 }
   0x7   :  { %p11743_p1 = scmp.lt.u32.totalorder %s11739_s17, %s13349_s2 }
   0x9   :  { %p11745_p2 = pnand %p11743_p1, %p11740_p0 }
   0xb   :  { %11748 = shalt.err (!%p11745_p2)
}
   0xc   :  { %s11749_s22 = scalar_lea.vmem %s39_s14, 98304  ;;  %p11754_p4 = scmp.lt.s32.totalorder %s39_s14, %s39_s14 }
   0xd   :  { %p11750_p3 = scmp.ne.s32.totalorder %s39_s14, %s11749_s22  ;;  %p11755_p5 = scmp.lt.s32.totalorder %s11749_s22, %s11749_s22 }
   0xf   :  { %p11756_p6 = por %p11755_p5, %p11754_p4 }
  0x11   :  { %p11757_p7 = pnand %p11756_p6, %p11750_p3 }
  0x13   :  { %11760 = shalt.err (!%p11757_p7)
}
  0x14   :  { %s11950_s23 = smov 768   ;;  %s11951_s24 = smov 48  }
  0x15   :  { %44 = dma.hbm_to_vmem [thread:$0]  %s13349_s2, 98304, %s39_s14, [#allocation6], %s11950_s23, %s11950_s23, %s11951_s24  }
  0x16   :  { %s11952_s27 = smov [#allocation8]   ;;  %s11761_s11 = scalar_lea.hbm %s13351_s4, 12288 }
  0x17   :  { %s60_s28 = sshll.u32 %s11952_s27, 4  ;;  %p11762_p8 = scmp.ne.s32.totalorder %s13351_s4, %s11761_s11  ;;  %s61_s28 = int_to_ptr.vmem [resolvable:$true] %s60_s28 }
  0x18   :  { %p11765_p9 = scmp.lt.u32.totalorder %s11761_s11, %s13351_s4 }
  0x1a   :  { %p11767_p10 = pnand %p11765_p9, %p11762_p8 }
  0x1c   :  { %11770 = shalt.err (!%p11767_p10)
}
  0x1d   :  { %s11771_s17 = scalar_lea.vmem %s61_s28, 12288  ;;  %p11776_p12 = scmp.lt.s32.totalorder %s61_s28, %s61_s28 }
  0x1e   :  { %p11772_p11 = scmp.ne.s32.totalorder %s61_s28, %s11771_s17  ;;  %p11777_p13 = scmp.lt.s32.totalorder %s11771_s17, %s11771_s17 }
  0x20   :  { %p11778_p0 = por %p11777_p13, %p11776_p12 }
  0x22   :  { %p11779_p1 = pnand %p11778_p0, %p11772_p11 }
  0x24   :  { %11782 = shalt.err (!%p11779_p1)
}
  0x25   :  { %s11953_s2 = smov 256   ;;  %s11954_s14 = smov 16  }
  0x26   :  { %66 = dma.hbm_to_vmem [thread:$0]  %s13351_s4, 12288, %s61_s28, [#allocation9], %s11953_s2, %s11953_s2, %s11954_s14  }
  0x27   :  { %s11955_s20 = smov [#allocation11]   ;;  %s11956_s22 = smov [#allocation2]  }
  0x28   :  { %s85_s21 = sshll.u32 %s11955_s20, 4  ;;  %s27_s23 = sshll.u32 %s11956_s22, 4  ;;  %s86_s21 = int_to_ptr.vmem [resolvable:$true] %s85_s21  ;;  %s28_s23 = int_to_ptr.vmem [resolvable:$true] %s27_s23 }
  0x29   :  { %s11783_s26 = scalar_lea.hbm %s13354_s7, 16 }
  0x2a   :  { %p11784_p2 = scmp.ne.s32.totalorder %s13354_s7, %s11783_s26  ;;  %p11787_p3 = scmp.lt.u32.totalorder %s11783_s26, %s13354_s7 }
  0x2c   :  { %p11789_p4 = pnand %p11787_p3, %p11784_p2 }
  0x2e   :  { %11792 = shalt.err (!%p11789_p4)
}
  0x2f   :  { %s11793_s4 = scalar_lea.vmem %s86_s21, 16  ;;  %s11797_s28 = scalar_lea.vmem %s86_s21, 32 }
  0x30   :  { %p11794_p5 = scmp.ne.s32.totalorder %s86_s21, %s11793_s4  ;;  %p11798_p6 = scmp.lt.s32.totalorder %s86_s21, %s86_s21 }
  0x31   :  { %p11799_p7 = scmp.lt.s32.totalorder %s11797_s28, %s11793_s4 }
  0x33   :  { %p11800_p8 = por %p11799_p7, %p11798_p6 }
  0x35   :  { %p11801_p9 = pnand %p11800_p8, %p11794_p5 }
  0x37   :  { %11804 = shalt.err (!%p11801_p9)
}
  0x38   :  { %88 = dma.hbm_to_vmem [thread:$0]  %s13354_s7, 16, %s86_s21, [#allocation12]  }
  0x39   :  { %s11805_s17 = scalar_lea.hbm %s13347_s0, 1024 }
  0x3a   :  { %p11806_p10 = scmp.ne.s32.totalorder %s13347_s0, %s11805_s17  ;;  %p11809_p11 = scmp.lt.u32.totalorder %s11805_s17, %s13347_s0 }
  0x3c   :  { %p11811_p12 = pnand %p11809_p11, %p11806_p10 }
  0x3e   :  { %11814 = shalt.err (!%p11811_p12)
}
  0x3f   :  { %s11815_s20 = scalar_lea.vmem %s28_s23, 1024  ;;  %p11820_p0 = scmp.lt.s32.totalorder %s28_s23, %s28_s23 }
  0x40   :  { %p11816_p13 = scmp.ne.s32.totalorder %s28_s23, %s11815_s20  ;;  %p11821_p1 = scmp.lt.s32.totalorder %s11815_s20, %s11815_s20 }
  0x42   :  { %p11822_p2 = por %p11821_p1, %p11820_p0 }
  0x44   :  { %p11823_p3 = pnand %p11822_p2, %p11816_p13 }
  0x46   :  { %11826 = shalt.err (!%p11823_p3)
}
  0x47   :  { %30 = dma.hbm_to_vmem [thread:$0]  %s13347_s0, 1024, %s28_s23, [#allocation3]  }
  0x48   :  { %s11957_s22 = smov [#allocation7]   ;;  %s11958_s25 = smov [#allocation10]  }
  0x49   :  { %s51_s24 = sshll.u32 %s11957_s22, 4  ;;  %s73_s26 = sshll.u32 %s11958_s25, 4  ;;  %s52_s24 = int_to_ptr.vmem [resolvable:$true] %s51_s24  ;;  %s74_s26 = int_to_ptr.vmem [resolvable:$true] %s73_s26 }
  0x4a   :  { %s11827_s30 = scalar_lea.hbm %s13350_s3, 48 }
  0x4b   :  { %p11828_p4 = scmp.ne.s32.totalorder %s13350_s3, %s11827_s30  ;;  %p11831_p5 = scmp.lt.u32.totalorder %s11827_s30, %s13350_s3 }
  0x4d   :  { %p11833_p6 = pnand %p11831_p5, %p11828_p4 }
  0x4f   :  { %11836 = shalt.err (!%p11833_p6)
}
  0x50   :  { %s11837_s0 = scalar_lea.vmem %s52_s24, 48  ;;  %s11841_s23 = scalar_lea.vmem %s52_s24, 64 }
  0x51   :  { %p11838_p7 = scmp.ne.s32.totalorder %s52_s24, %s11837_s0  ;;  %p11842_p8 = scmp.lt.s32.totalorder %s52_s24, %s52_s24 }
  0x52   :  { %p11843_p9 = scmp.lt.s32.totalorder %s11841_s23, %s11837_s0 }
  0x54   :  { %p11844_p10 = por %p11843_p9, %p11842_p8 }
  0x56   :  { %p11845_p11 = pnand %p11844_p10, %p11838_p7 }
  0x58   :  { %11848 = shalt.err (!%p11845_p11)
}
  0x59   :  { %54 = dma.hbm_to_vmem [thread:$0]  %s13350_s3, 48, %s52_s24, [#allocation6]  }
  0x5a   :  { %s11849_s2 = scalar_lea.hbm %s13352_s5, 16 }
  0x5b   :  { %p11850_p12 = scmp.ne.s32.totalorder %s13352_s5, %s11849_s2  ;;  %p11853_p13 = scmp.lt.u32.totalorder %s11849_s2, %s13352_s5 }
  0x5d   :  { %p11855_p0 = pnand %p11853_p13, %p11850_p12 }
  0x5f   :  { %11858 = shalt.err (!%p11855_p0)
}
  0x60   :  { %s11859_s7 = scalar_lea.vmem %s74_s26, 16  ;;  %s11863_s21 = scalar_lea.vmem %s74_s26, 32 }
  0x61   :  { %p11860_p1 = scmp.ne.s32.totalorder %s74_s26, %s11859_s7  ;;  %p11864_p2 = scmp.lt.s32.totalorder %s74_s26, %s74_s26 }
  0x62   :  { %p11865_p3 = scmp.lt.s32.totalorder %s11863_s21, %s11859_s7 }
  0x64   :  { %p11866_p4 = por %p11865_p3, %p11864_p2 }
  0x66   :  { %p11867_p5 = pnand %p11866_p4, %p11860_p1 }
  0x68   :  { %11870 = shalt.err (!%p11867_p5)
}
  0x69   :  { %76 = dma.hbm_to_vmem [thread:$0]  %s13352_s5, 16, %s74_s26, [#allocation9]  }
  0x6a   :  { %s11959_s24 = smov [#allocation13]   ;;  %s11960_s27 = smov [#allocation14]  }
  0x6b   :  { %s95_s25 = sshll.u32 %s11959_s24, 4  ;;  %s105_s29 = sshll.u32 %s11960_s27, 4  ;;  %s96_s25 = int_to_ptr.vmem [resolvable:$true] %s95_s25  ;;  %s106_s29 = int_to_ptr.vmem [resolvable:$true] %s105_s29 }
  0x6c   :  { %s11871_s4 = scalar_lea.hbm %s13355_s8, 512 }
  0x6d   :  { %p11872_p6 = scmp.ne.s32.totalorder %s13355_s8, %s11871_s4  ;;  %p11875_p7 = scmp.lt.u32.totalorder %s11871_s4, %s13355_s8 }
  0x6f   :  { %p11877_p8 = pnand %p11875_p7, %p11872_p6 }
  0x71   :  { %11880 = shalt.err (!%p11877_p8)
}
  0x72   :  { %s11881_s5 = scalar_lea.vmem %s96_s25, 512  ;;  %p11886_p10 = scmp.lt.s32.totalorder %s96_s25, %s96_s25 }
  0x73   :  { %p11882_p9 = scmp.ne.s32.totalorder %s96_s25, %s11881_s5  ;;  %p11887_p11 = scmp.lt.s32.totalorder %s11881_s5, %s11881_s5 }
  0x75   :  { %p11888_p12 = por %p11887_p11, %p11886_p10 }
  0x77   :  { %p11889_p13 = pnand %p11888_p12, %p11882_p9 }
  0x79   :  { %11892 = shalt.err (!%p11889_p13)
}
  0x7a   :  { %98 = dma.hbm_to_vmem [thread:$0]  %s13355_s8, 512, %s96_s25, [#allocation12]  }
  0x7b   :  { %s11893_s17 = scalar_lea.hbm %s13356_s9, 64 }
  0x7c   :  { %p11894_p0 = scmp.ne.s32.totalorder %s13356_s9, %s11893_s17  ;;  %p11897_p1 = scmp.lt.u32.totalorder %s11893_s17, %s13356_s9 }
  0x7e   :  { %p11899_p2 = pnand %p11897_p1, %p11894_p0 }
  0x80   :  { %11902 = shalt.err (!%p11899_p2)
}
  0x81   :  { %s11903_s20 = scalar_lea.vmem %s106_s29, 64  ;;  %p11908_p4 = scmp.lt.s32.totalorder %s106_s29, %s106_s29 }
  0x82   :  { %p11904_p3 = scmp.ne.s32.totalorder %s106_s29, %s11903_s20  ;;  %p11909_p5 = scmp.lt.s32.totalorder %s11903_s20, %s11903_s20 }
  0x84   :  { %p11910_p6 = por %p11909_p5, %p11908_p4 }
  0x86   :  { %p11911_p7 = pnand %p11910_p6, %p11904_p3 }
  0x88   :  { %11914 = shalt.err (!%p11911_p7)
}
  0x89   :  { %108 = dma.hbm_to_vmem [thread:$0]  %s13356_s9, 64, %s106_s29, [#allocation15]  }
  0x8a   :  { %11937 = dma.done.wait [#allocation3], 1024  }
  0x8b   :  { %11938 = vsyncadd [#allocation3], 4294966272 }
  0x8c   :  { %11939 = dma.done.wait [#allocation6], 98352  }
  0x8d   :  { %11940 = vsyncadd [#allocation6], 4294868944 }
  0x8e   :  { %11941 = dma.done.wait [#allocation9], 12304  }
  0x8f   :  { %11942 = vsyncadd [#allocation9], 4294954992 }
  0x90   :  { %11943 = dma.done.wait [#allocation12], 528  }
  0x91   :  { %11944 = vsyncadd [#allocation12], 4294966768 }
  0x92   :  { %11945 = dma.done.wait [#allocation15], 64  }
  0x93   :  { %11946 = vsyncadd [#allocation15], 4294967232  ;;  %v10443_v0 = vld [vmem:[#allocation5 + $0x4] ss:$48 sps:$4 sm:$0xff]   ;;  %v10445_v1 = vld [vmem:[#allocation5 + $0xc] ss:$48 sps:$4 sm:$0xff]  }
  0x94   :  { %4758 = vmatprep.subr.bf16.mxu0 %v10443_v0  ;;  %v10447_v2 = vld [vmem:[#allocation5] ss:$48 sps:$4 sm:$0xff]   ;;  %v10448_v3 = vld [vmem:[#allocation5 + $0x8] ss:$48 sps:$4 sm:$0xff]   ;;  %4922 = vmatprep.subr.bf16.mxu1 %v10445_v1  ;;  %v10449_v4 = vld [vmem:[#allocation5 + $0x64] ss:$48 sps:$4 sm:$0xff]  }
  0x95   :  { %4759 = vmatpush1.bf16.msra.mxu0 %v10447_v2  ;;  %4923 = vmatpush1.bf16.msra.mxu1 %v10448_v3  ;;  %v10451_v5 = vld [vmem:[#allocation5 + $0x6c] ss:$48 sps:$4 sm:$0xff]   ;;  %v10453_v6 = vld [vmem:[#allocation5 + $0x60] ss:$48 sps:$4 sm:$0xff]   ;;  %v10454_v7 = vld [vmem:[#allocation5 + $0x68] ss:$48 sps:$4 sm:$0xff]  }
  0x96   :  { %4760 = vmatprep.subr.bf16.mxu0 %v10449_v4  ;;  %4924 = vmatprep.subr.bf16.mxu1 %v10451_v5  ;;  %v10455_v8 = vld [vmem:[#allocation5 + $0xc4] ss:$48 sps:$4 sm:$0xff]   ;;  %v10457_v9 = vld [vmem:[#allocation5 + $0xcc] ss:$48 sps:$4 sm:$0xff]   ;;  %v10459_v10 = vld [vmem:[#allocation5 + $0xc0] ss:$48 sps:$4 sm:$0xff]  }
  0x97   :  { %v10460_v11 = vld [vmem:[#allocation5 + $0xc8] ss:$48 sps:$4 sm:$0xff]   ;;  %v10461_v12 = vld [vmem:[#allocation5 + $0x124] ss:$48 sps:$4 sm:$0xff]   ;;  %v10463_v13 = vld [vmem:[#allocation5 + $0x12c] ss:$48 sps:$4 sm:$0xff]  }
  0x98   :  { %v10465_v14 = vld [vmem:[#allocation5 + $0x120] ss:$48 sps:$4 sm:$0xff]   ;;  %v10466_v15 = vld [vmem:[#allocation5 + $0x128] ss:$48 sps:$4 sm:$0xff]   ;;  %v10467_v16 = vld [vmem:[#allocation5 + $0x184] ss:$48 sps:$4 sm:$0xff]  }
  0x99   :  { %4761 = vmatpush1.bf16.msra.mxu0 %v10453_v6  ;;  %4925 = vmatpush1.bf16.msra.mxu1 %v10454_v7  ;;  %v10469_v17 = vld [vmem:[#allocation5 + $0x18c] ss:$48 sps:$4 sm:$0xff]   ;;  %v10471_v18 = vld [vmem:[#allocation5 + $0x180] ss:$48 sps:$4 sm:$0xff]   ;;  %v10472_v19 = vld [vmem:[#allocation5 + $0x188] ss:$48 sps:$4 sm:$0xff]  }
  0x9a   :  { %4762 = vmatprep.subr.bf16.mxu0 %v10455_v8  ;;  %4926 = vmatprep.subr.bf16.mxu1 %v10457_v9  ;;  %v10473_v20 = vld [vmem:[#allocation5 + $0x1e4] ss:$48 sps:$4 sm:$0xff]   ;;  %v10475_v21 = vld [vmem:[#allocation5 + $0x1ec] ss:$48 sps:$4 sm:$0xff]   ;;  %v10477_v22 = vld [vmem:[#allocation5 + $0x1e0] ss:$48 sps:$4 sm:$0xff]  }
  0x9b   :  { %v10478_v23 = vld [vmem:[#allocation5 + $0x1e8] ss:$48 sps:$4 sm:$0xff]   ;;  %v10479_v24 = vld [vmem:[#allocation5 + $0x244] ss:$48 sps:$4 sm:$0xff]   ;;  %v10481_v25 = vld [vmem:[#allocation5 + $0x24c] ss:$48 sps:$4 sm:$0xff]  }
  0x9c   :  { %v10483_v26 = vld [vmem:[#allocation5 + $0x240] ss:$48 sps:$4 sm:$0xff]   ;;  %v10484_v27 = vld [vmem:[#allocation5 + $0x248] ss:$48 sps:$4 sm:$0xff]   ;;  %v10485_v28 = vld [vmem:[#allocation5 + $0x2a4] ss:$48 sps:$4 sm:$0xff]  }
  0x9d   :  { %4763 = vmatpush1.bf16.msra.mxu0 %v10459_v10  ;;  %4927 = vmatpush1.bf16.msra.mxu1 %v10460_v11  ;;  %v10487_v29 = vld [vmem:[#allocation5 + $0x2ac] ss:$48 sps:$4 sm:$0xff]   ;;  %v10489_v30 = vld [vmem:[#allocation5 + $0x2a0] ss:$48 sps:$4 sm:$0xff]   ;;  %v10490_v31 = vld [vmem:[#allocation5 + $0x2a8] ss:$48 sps:$4 sm:$0xff]  }
  0x9e   :  { %4764 = vmatprep.subr.bf16.mxu0 %v10461_v12  ;;  %4928 = vmatprep.subr.bf16.mxu1 %v10463_v13  ;;  %v10491_v32 = vld [vmem:[#allocation5 + $0x304] ss:$48 sps:$4 sm:$0xff]   ;;  %v10493_v33 = vld [vmem:[#allocation5 + $0x30c] ss:$48 sps:$4 sm:$0xff]   ;;  %v10495_v34 = vld [vmem:[#allocation5 + $0x300] ss:$48 sps:$4 sm:$0xff]  }
  0x9f   :  { %v10496_v35 = vld [vmem:[#allocation5 + $0x308] ss:$48 sps:$4 sm:$0xff]   ;;  %v10497_v36 = vld [vmem:[#allocation5 + $0x364] ss:$48 sps:$4 sm:$0xff]   ;;  %v10499_v37 = vld [vmem:[#allocation5 + $0x36c] ss:$48 sps:$4 sm:$0xff]  }
  0xa0   :  { %v10501_v38 = vld [vmem:[#allocation5 + $0x360] ss:$48 sps:$4 sm:$0xff]   ;;  %v10502_v39 = vld [vmem:[#allocation5 + $0x368] ss:$48 sps:$4 sm:$0xff]   ;;  %v10503_v40 = vld [vmem:[#allocation5 + $0x3c4] ss:$48 sps:$4 sm:$0xff]  }
  0xa1   :  { %4765 = vmatpush1.bf16.msra.mxu0 %v10465_v14  ;;  %4929 = vmatpush1.bf16.msra.mxu1 %v10466_v15  ;;  %v10505_v41 = vld [vmem:[#allocation5 + $0x3cc] ss:$48 sps:$4 sm:$0xff]   ;;  %v10507_v42 = vld [vmem:[#allocation5 + $0x3c0] ss:$48 sps:$4 sm:$0xff]   ;;  %v10508_v43 = vld [vmem:[#allocation5 + $0x3c8] ss:$48 sps:$4 sm:$0xff]  }
  0xa2   :  { %4766 = vmatprep.subr.bf16.mxu0 %v10467_v16  ;;  %4930 = vmatprep.subr.bf16.mxu1 %v10469_v17  ;;  %v10509_v44 = vld [vmem:[#allocation5 + $0x424] ss:$48 sps:$4 sm:$0xff]   ;;  %v10511_v45 = vld [vmem:[#allocation5 + $0x42c] ss:$48 sps:$4 sm:$0xff]   ;;  %v10513_v47 = vld [vmem:[#allocation5 + $0x420] ss:$48 sps:$4 sm:$0xff]  }
  0xa3   :  { %v135_v46 = vld [vmem:[#allocation2 + $0x8] sm:$0xff]  ;;  %v10515_v50 = vld [vmem:[#allocation5 + $0x484] ss:$48 sps:$4 sm:$0xff]   ;;  %v10519_v52 = vld [vmem:[#allocation5 + $0x480] ss:$48 sps:$4 sm:$0xff]   ;;  %vm11963_vm0 = vmmov 0  }
  0xa4   :  { %v12120_v48 = vpack.c.bf16 %v135_v46, %v135_v46  ;;  %v10514_v49 = vld [vmem:[#allocation5 + $0x428] ss:$48 sps:$4 sm:$0xff]   ;;  %v10517_v51 = vld [vmem:[#allocation5 + $0x48c] ss:$48 sps:$4 sm:$0xff]   ;;  %v10521_v54 = vld [vmem:[#allocation5 + $0x4e4] ss:$48 sps:$4 sm:$0xff]  }
  0xa5   :  { %4767 = vmatpush1.bf16.msra.mxu0 %v10471_v18  ;;  %4931 = vmatpush1.bf16.msra.mxu1 %v10472_v19  ;;  %v10520_v53 = vld [vmem:[#allocation5 + $0x488] ss:$48 sps:$4 sm:$0xff]   ;;  %v10523_v55 = vld [vmem:[#allocation5 + $0x4ec] ss:$48 sps:$4 sm:$0xff]   ;;  %v10525_v56 = vld [vmem:[#allocation5 + $0x4e0] ss:$48 sps:$4 sm:$0xff]  }
  0xa6   :  { %4768 = vmatprep.subr.bf16.mxu0 %v10473_v20  ;;  %4932 = vmatprep.subr.bf16.mxu1 %v10475_v21  ;;  %v10526_v57 = vld [vmem:[#allocation5 + $0x4e8] ss:$48 sps:$4 sm:$0xff]   ;;  %v10527_v58 = vld [vmem:[#allocation5 + $0x544] ss:$48 sps:$4 sm:$0xff]   ;;  %v10529_v59 = vld [vmem:[#allocation5 + $0x54c] ss:$48 sps:$4 sm:$0xff]  }
  0xa7   :  { %4790 = vmatprep.mubr.bf16.mxu0 %v12120_v48  ;;  %4954 = vmatprep.mubr.bf16.mxu1 %v12120_v48  ;;  %v10531_v60 = vld [vmem:[#allocation5 + $0x540] ss:$48 sps:$4 sm:$0xff]   ;;  %v10532_v61 = vld [vmem:[#allocation5 + $0x548] ss:$48 sps:$4 sm:$0xff]   ;;  %v10533_v62 = vld [vmem:[#allocation5 + $0x5a4] ss:$48 sps:$4 sm:$0xff]  }
  0xa8   :  { %v10535_v63 = vld [vmem:[#allocation5 + $0x5ac] ss:$48 sps:$4 sm:$0xff]   ;;  %v10537_v0 = vld [vmem:[#allocation5 + $0x5a0] ss:$48 sps:$4 sm:$0xff]   ;;  %v10538_v1 = vld [vmem:[#allocation5 + $0x5a8] ss:$48 sps:$4 sm:$0xff]  }
  0xa9   :  { %4769 = vmatpush1.bf16.msra.mxu0 %v10477_v22  ;;  %4933 = vmatpush1.bf16.msra.mxu1 %v10478_v23  ;;  %v134_v2 = vld [vmem:[#allocation2] sm:$0xff]  ;;  %v10544_v4 = vld [vmem:[#allocation5 + $0x60c] ss:$48 sps:$4 sm:$0xff]   ;;  %v10542_v7 = vld [vmem:[#allocation5 + $0x608] ss:$48 sps:$4 sm:$0xff]   ;;  %vm6653_vm1 = vcmask 1045504  }
  0xaa   :  { %4770 = vmatprep.subr.bf16.mxu0 %v10479_v24  ;;  %4934 = vmatprep.subr.bf16.mxu1 %v10481_v25  ;;  %v10541_v3 = vld [vmem:[#allocation5 + $0x604] ss:$48 sps:$4 sm:$0xff]   ;;  %v12124_v5 = vpack.c.bf16 %v134_v2, %v134_v2  ;;  %v10539_v6 = vld [vmem:[#allocation5 + $0x600] ss:$48 sps:$4 sm:$0xff]   ;;  %v10550_v9 = vld [vmem:[#allocation5 + $0x66c] ss:$48 sps:$4 sm:$0xff]  }
  0xab   :  { %v10547_v8 = vld [vmem:[#allocation5 + $0x664] ss:$48 sps:$4 sm:$0xff]   ;;  %v10545_v10 = vld [vmem:[#allocation5 + $0x660] ss:$48 sps:$4 sm:$0xff]   ;;  %v10548_v11 = vld [vmem:[#allocation5 + $0x668] ss:$48 sps:$4 sm:$0xff]  }
  0xac   :  { %v10553_v12 = vld [vmem:[#allocation5 + $0x6c4] ss:$48 sps:$4 sm:$0xff]   ;;  %v10556_v13 = vld [vmem:[#allocation5 + $0x6cc] ss:$48 sps:$4 sm:$0xff]   ;;  %v10551_v14 = vld [vmem:[#allocation5 + $0x6c0] ss:$48 sps:$4 sm:$0xff]  }
  0xad   :  { %4771 = vmatpush1.bf16.msra.mxu0 %v10483_v26  ;;  %4935 = vmatpush1.bf16.msra.mxu1 %v10484_v27  ;;  %v10554_v15 = vld [vmem:[#allocation5 + $0x6c8] ss:$48 sps:$4 sm:$0xff]   ;;  %v10559_v16 = vld [vmem:[#allocation5 + $0x724] ss:$48 sps:$4 sm:$0xff]   ;;  %v10562_v17 = vld [vmem:[#allocation5 + $0x72c] ss:$48 sps:$4 sm:$0xff]  }
  0xae   :  { %4772 = vmatprep.subr.bf16.mxu0 %v10485_v28  ;;  %4936 = vmatprep.subr.bf16.mxu1 %v10487_v29  ;;  %v10557_v18 = vld [vmem:[#allocation5 + $0x720] ss:$48 sps:$4 sm:$0xff]   ;;  %v10560_v19 = vld [vmem:[#allocation5 + $0x728] ss:$48 sps:$4 sm:$0xff]   ;;  %v10565_v20 = vld [vmem:[#allocation5 + $0x784] ss:$48 sps:$4 sm:$0xff]  }
  0xaf   :  { %v10568_v21 = vld [vmem:[#allocation5 + $0x78c] ss:$48 sps:$4 sm:$0xff]   ;;  %v10563_v22 = vld [vmem:[#allocation5 + $0x780] ss:$48 sps:$4 sm:$0xff]   ;;  %v10566_v23 = vld [vmem:[#allocation5 + $0x788] ss:$48 sps:$4 sm:$0xff]  }
  0xb0   :  { %v10571_v24 = vld [vmem:[#allocation5 + $0x7e4] ss:$48 sps:$4 sm:$0xff]   ;;  %v10574_v25 = vld [vmem:[#allocation5 + $0x7ec] ss:$48 sps:$4 sm:$0xff]   ;;  %v10569_v26 = vld [vmem:[#allocation5 + $0x7e0] ss:$48 sps:$4 sm:$0xff]  }
  0xb1   :  { %4773 = vmatpush1.bf16.msra.mxu0 %v10489_v30  ;;  %4937 = vmatpush1.bf16.msra.mxu1 %v10490_v31  ;;  %v10572_v27 = vld [vmem:[#allocation5 + $0x7e8] ss:$48 sps:$4 sm:$0xff]   ;;  %v10577_v28 = vld [vmem:[#allocation5 + $0x844] ss:$48 sps:$4 sm:$0xff]   ;;  %v10580_v29 = vld [vmem:[#allocation5 + $0x84c] ss:$48 sps:$4 sm:$0xff]  }
  0xb2   :  { %4774 = vmatprep.subr.bf16.mxu0 %v10491_v32  ;;  %4938 = vmatprep.subr.bf16.mxu1 %v10493_v33  ;;  %v137_v30 = vld [vmem:[#allocation2 + $0x18] sm:$0xff]  ;;  %v10575_v31 = vld [vmem:[#allocation5 + $0x840] ss:$48 sps:$4 sm:$0xff]   ;;  %v10601_v46 = vld [vmem:[#allocation5 + $0x9c4] ss:$48 sps:$4 sm:$0xff]   ;;  %vm6649_vm2 = vcmask 48128  }
  0xb3   :  { %v12128_v32 = vpack.c.bf16 %v137_v30, %v137_v30  ;;  %v10578_v33 = vld [vmem:[#allocation5 + $0x848] ss:$48 sps:$4 sm:$0xff]   ;;  %v10659_v30 = vld [vmem:[#allocation5 + $0xd80] ss:$48 sps:$4 sm:$0xff]   ;;  %vm7409_vm3 = vcmask 130048   ;;  %vm9179_vm4 = vcmask 1041409  }
  0xb4   :  { %v10626_v2 = vld [vmem:[#allocation5 + $0xb48] ss:$48 sps:$4 sm:$0xff]   ;;  %vm9181_vm5 = vcmask 1045509   ;;  %vm9184_vm6 = vcmask 1042434   ;;  %vm9186_vm7 = vcmask 1046534   ;;  %vm9189_vm8 = vcmask 1043459  }
  0xb5   :  { %4775 = vmatpush1.bf16.msra.mxu0 %v10495_v34  ;;  %4939 = vmatpush1.bf16.msra.mxu1 %v10496_v35  ;;  %v10583_v34 = vld [vmem:[#allocation5 + $0x8a4] ss:$48 sps:$4 sm:$0xff]   ;;  %v10586_v35 = vld [vmem:[#allocation5 + $0x8ac] ss:$48 sps:$4 sm:$0xff]   ;;  %vm9191_vm9 = vcmask 1047559  }
  0xb6   :  { %4776 = vmatprep.subr.bf16.mxu0 %v10497_v36  ;;  %4940 = vmatprep.subr.bf16.mxu1 %v10499_v37  ;;  %v10581_v36 = vld [vmem:[#allocation5 + $0x8a0] ss:$48 sps:$4 sm:$0xff]   ;;  %v10584_v37 = vld [vmem:[#allocation5 + $0x8a8] ss:$48 sps:$4 sm:$0xff]  }
  0xb9   :  { %4777 = vmatpush1.bf16.msra.mxu0 %v10501_v38  ;;  %4941 = vmatpush1.bf16.msra.mxu1 %v10502_v39  ;;  %v10589_v38 = vld [vmem:[#allocation5 + $0x904] ss:$48 sps:$4 sm:$0xff]   ;;  %v10592_v39 = vld [vmem:[#allocation5 + $0x90c] ss:$48 sps:$4 sm:$0xff]  }
  0xba   :  { %4778 = vmatprep.subr.bf16.mxu0 %v10503_v40  ;;  %4942 = vmatprep.subr.bf16.mxu1 %v10505_v41  ;;  %v10587_v40 = vld [vmem:[#allocation5 + $0x900] ss:$48 sps:$4 sm:$0xff]   ;;  %v10590_v41 = vld [vmem:[#allocation5 + $0x908] ss:$48 sps:$4 sm:$0xff]  }
  0xbd   :  { %4779 = vmatpush1.bf16.msra.mxu0 %v10507_v42  ;;  %4943 = vmatpush1.bf16.msra.mxu1 %v10508_v43  ;;  %v10595_v42 = vld [vmem:[#allocation5 + $0x964] ss:$48 sps:$4 sm:$0xff]   ;;  %v10598_v43 = vld [vmem:[#allocation5 + $0x96c] ss:$48 sps:$4 sm:$0xff]  }
  0xbe   :  { %4780 = vmatprep.subr.bf16.mxu0 %v10509_v44  ;;  %4944 = vmatprep.subr.bf16.mxu1 %v10511_v45  ;;  %v10593_v44 = vld [vmem:[#allocation5 + $0x960] ss:$48 sps:$4 sm:$0xff]   ;;  %v10596_v45 = vld [vmem:[#allocation5 + $0x968] ss:$48 sps:$4 sm:$0xff]  }
  0xc1   :  { %4781 = vmatpush1.bf16.msra.mxu0 %v10513_v47  ;;  %4945 = vmatpush1.bf16.msra.mxu1 %v10514_v49  ;;  %v10604_v47 = vld [vmem:[#allocation5 + $0x9cc] ss:$48 sps:$4 sm:$0xff]   ;;  %v10599_v49 = vld [vmem:[#allocation5 + $0x9c0] ss:$48 sps:$4 sm:$0xff]  }
  0xc2   :  { %4782 = vmatprep.subr.bf16.mxu0 %v10515_v50  ;;  %4946 = vmatprep.subr.bf16.mxu1 %v10517_v51  ;;  %v10602_v50 = vld [vmem:[#allocation5 + $0x9c8] ss:$48 sps:$4 sm:$0xff]   ;;  %v10607_v51 = vld [vmem:[#allocation5 + $0xa24] ss:$48 sps:$4 sm:$0xff]  }
  0xc5   :  { %4783 = vmatpush1.bf16.msra.mxu0 %v10519_v52  ;;  %4947 = vmatpush1.bf16.msra.mxu1 %v10520_v53  ;;  %v10610_v52 = vld [vmem:[#allocation5 + $0xa2c] ss:$48 sps:$4 sm:$0xff]   ;;  %v10605_v53 = vld [vmem:[#allocation5 + $0xa20] ss:$48 sps:$4 sm:$0xff]  }
  0xc6   :  { %4784 = vmatprep.subr.bf16.mxu0 %v10521_v54  ;;  %4948 = vmatprep.subr.bf16.mxu1 %v10523_v55  ;;  %v10608_v54 = vld [vmem:[#allocation5 + $0xa28] ss:$48 sps:$4 sm:$0xff]   ;;  %v10613_v55 = vld [vmem:[#allocation5 + $0xa84] ss:$48 sps:$4 sm:$0xff]  }
  0xc9   :  { %4785 = vmatpush1.bf16.msra.mxu0 %v10525_v56  ;;  %4949 = vmatpush1.bf16.msra.mxu1 %v10526_v57  ;;  %v10616_v56 = vld [vmem:[#allocation5 + $0xa8c] ss:$48 sps:$4 sm:$0xff]   ;;  %v10611_v57 = vld [vmem:[#allocation5 + $0xa80] ss:$48 sps:$4 sm:$0xff]  }
  0xca   :  { %4786 = vmatprep.subr.bf16.mxu0 %v10527_v58  ;;  %4950 = vmatprep.subr.bf16.mxu1 %v10529_v59  ;;  %v10614_v58 = vld [vmem:[#allocation5 + $0xa88] ss:$48 sps:$4 sm:$0xff]   ;;  %v10619_v59 = vld [vmem:[#allocation5 + $0xae4] ss:$48 sps:$4 sm:$0xff]  }
  0xcd   :  { %4787 = vmatpush1.bf16.msra.mxu0 %v10531_v60  ;;  %4951 = vmatpush1.bf16.msra.mxu1 %v10532_v61  ;;  %v10622_v60 = vld [vmem:[#allocation5 + $0xaec] ss:$48 sps:$4 sm:$0xff]   ;;  %v10617_v61 = vld [vmem:[#allocation5 + $0xae0] ss:$48 sps:$4 sm:$0xff]  }
  0xce   :  { %4788 = vmatprep.subr.bf16.mxu0 %v10533_v62  ;;  %4952 = vmatprep.subr.bf16.mxu1 %v10535_v63  ;;  %v10620_v62 = vld [vmem:[#allocation5 + $0xae8] ss:$48 sps:$4 sm:$0xff]   ;;  %v10625_v63 = vld [vmem:[#allocation5 + $0xb44] ss:$48 sps:$4 sm:$0xff]  }
  0xd1   :  { %4789 = vmatpush1.bf16.msra.mxu0 %v10537_v0  ;;  %4953 = vmatpush1.bf16.msra.mxu1 %v10538_v1  ;;  %v10628_v0 = vld [vmem:[#allocation5 + $0xb4c] ss:$48 sps:$4 sm:$0xff]   ;;  %v10623_v1 = vld [vmem:[#allocation5 + $0xb40] ss:$48 sps:$4 sm:$0xff]  }
  0xd2   :  { %4799 = vmatprep.subr.bf16.mxu0 %v10541_v3  ;;  %4963 = vmatprep.subr.bf16.mxu1 %v10544_v4  ;;  %v10631_v3 = vld [vmem:[#allocation5 + $0xba4] ss:$48 sps:$4 sm:$0xff]   ;;  %v10634_v4 = vld [vmem:[#allocation5 + $0xbac] ss:$48 sps:$4 sm:$0xff]  }
  0xd4   :  { %4791 = vmatmul.mubr.bf16.vlgmr.msra.gmra.mrb[0].mxu0 %v12124_v5  ;;  %4955 = vmatmul.mubr.bf16.vlgmr.msra.gmra.mrb[0].mxu1 %v12124_v5 }
  0xd5   :  { %4800 = vmatpush1.bf16.msra.mxu0 %v10539_v6  ;;  %4964 = vmatpush1.bf16.msra.mxu1 %v10542_v7  ;;  %v10629_v6 = vld [vmem:[#allocation5 + $0xba0] ss:$48 sps:$4 sm:$0xff]   ;;  %v10632_v7 = vld [vmem:[#allocation5 + $0xba8] ss:$48 sps:$4 sm:$0xff]  }
  0xd6   :  { %4801 = vmatprep.subr.bf16.mxu0 %v10547_v8  ;;  %4965 = vmatprep.subr.bf16.mxu1 %v10550_v9  ;;  %v10637_v8 = vld [vmem:[#allocation5 + $0xc04] ss:$48 sps:$4 sm:$0xff]  }
  0xd7   :  { %4831 = vmatprep.mubr.bf16.mxu0 %v12128_v32  ;;  %4995 = vmatprep.mubr.bf16.mxu1 %v12128_v32  ;;  %v136_v9 = vld [vmem:[#allocation2 + $0x10] sm:$0xff] }
  0xd9   :  { %4802 = vmatpush1.bf16.msra.mxu0 %v10545_v10  ;;  %4966 = vmatpush1.bf16.msra.mxu1 %v10548_v11  ;;  %v10640_v10 = vld [vmem:[#allocation5 + $0xc0c] ss:$48 sps:$4 sm:$0xff]   ;;  %v10635_v11 = vld [vmem:[#allocation5 + $0xc00] ss:$48 sps:$4 sm:$0xff]  }
  0xda   :  { %4803 = vmatprep.subr.bf16.mxu0 %v10553_v12  ;;  %4967 = vmatprep.subr.bf16.mxu1 %v10556_v13  ;;  %v10638_v12 = vld [vmem:[#allocation5 + $0xc08] ss:$48 sps:$4 sm:$0xff]   ;;  %v12132_v13 = vpack.c.bf16 %v136_v9, %v136_v9  ;;  %v10719_v9 = vld [vmem:[#allocation5 + $0x1140] ss:$48 sps:$4 sm:$0xff]  }
  0xdd   :  { %4804 = vmatpush1.bf16.msra.mxu0 %v10551_v14  ;;  %4968 = vmatpush1.bf16.msra.mxu1 %v10554_v15  ;;  %v10643_v14 = vld [vmem:[#allocation5 + $0xc64] ss:$48 sps:$4 sm:$0xff]   ;;  %v10646_v15 = vld [vmem:[#allocation5 + $0xc6c] ss:$48 sps:$4 sm:$0xff]  }
  0xde   :  { %4805 = vmatprep.subr.bf16.mxu0 %v10559_v16  ;;  %4969 = vmatprep.subr.bf16.mxu1 %v10562_v17  ;;  %v139_v16 = vld [vmem:[#allocation2 + $0x28] sm:$0xff] }
  0xdf   :  { %v12134_v17 = vpack.c.bf16 %v139_v16, %v139_v16  ;;  %v10733_v16 = vld [vmem:[#allocation5 + $0x1204] ss:$48 sps:$4 sm:$0xff]  }
  0xe1   :  { %4806 = vmatpush1.bf16.msra.mxu0 %v10557_v18  ;;  %4970 = vmatpush1.bf16.msra.mxu1 %v10560_v19  ;;  %v10641_v18 = vld [vmem:[#allocation5 + $0xc60] ss:$48 sps:$4 sm:$0xff]   ;;  %v10644_v19 = vld [vmem:[#allocation5 + $0xc68] ss:$48 sps:$4 sm:$0xff]  }
  0xe2   :  { %4807 = vmatprep.subr.bf16.mxu0 %v10565_v20  ;;  %4971 = vmatprep.subr.bf16.mxu1 %v10568_v21  ;;  %v10649_v20 = vld [vmem:[#allocation5 + $0xcc4] ss:$48 sps:$4 sm:$0xff]   ;;  %v10652_v21 = vld [vmem:[#allocation5 + $0xccc] ss:$48 sps:$4 sm:$0xff]  }
  0xe5   :  { %4808 = vmatpush1.bf16.msra.mxu0 %v10563_v22  ;;  %4972 = vmatpush1.bf16.msra.mxu1 %v10566_v23  ;;  %v10647_v22 = vld [vmem:[#allocation5 + $0xcc0] ss:$48 sps:$4 sm:$0xff]   ;;  %v10650_v23 = vld [vmem:[#allocation5 + $0xcc8] ss:$48 sps:$4 sm:$0xff]  }
  0xe6   :  { %4809 = vmatprep.subr.bf16.mxu0 %v10571_v24  ;;  %4973 = vmatprep.subr.bf16.mxu1 %v10574_v25  ;;  %v10655_v24 = vld [vmem:[#allocation5 + $0xd24] ss:$48 sps:$4 sm:$0xff]   ;;  %v10658_v25 = vld [vmem:[#allocation5 + $0xd2c] ss:$48 sps:$4 sm:$0xff]  }
  0xe9   :  { %4810 = vmatpush1.bf16.msra.mxu0 %v10569_v26  ;;  %4974 = vmatpush1.bf16.msra.mxu1 %v10572_v27  ;;  %v10653_v26 = vld [vmem:[#allocation5 + $0xd20] ss:$48 sps:$4 sm:$0xff]   ;;  %v10656_v27 = vld [vmem:[#allocation5 + $0xd28] ss:$48 sps:$4 sm:$0xff]  }
  0xea   :  { %4811 = vmatprep.subr.bf16.mxu0 %v10577_v28  ;;  %4975 = vmatprep.subr.bf16.mxu1 %v10580_v29  ;;  %v10661_v28 = vld [vmem:[#allocation5 + $0xd84] ss:$48 sps:$4 sm:$0xff]   ;;  %v10664_v29 = vld [vmem:[#allocation5 + $0xd8c] ss:$48 sps:$4 sm:$0xff]  }
  0xed   :  { %4812 = vmatpush1.bf16.msra.mxu0 %v10575_v31  ;;  %4976 = vmatpush1.bf16.msra.mxu1 %v10578_v33  ;;  %v10662_v31 = vld [vmem:[#allocation5 + $0xd88] ss:$48 sps:$4 sm:$0xff]   ;;  %v10667_v33 = vld [vmem:[#allocation5 + $0xde4] ss:$48 sps:$4 sm:$0xff]  }
  0xee   :  { %4813 = vmatprep.subr.bf16.mxu0 %v10583_v34  ;;  %4977 = vmatprep.subr.bf16.mxu1 %v10586_v35  ;;  %v10670_v34 = vld [vmem:[#allocation5 + $0xdec] ss:$48 sps:$4 sm:$0xff]   ;;  %v10665_v35 = vld [vmem:[#allocation5 + $0xde0] ss:$48 sps:$4 sm:$0xff]  }
  0xf1   :  { %4814 = vmatpush1.bf16.msra.mxu0 %v10581_v36  ;;  %4978 = vmatpush1.bf16.msra.mxu1 %v10584_v37  ;;  %v10668_v36 = vld [vmem:[#allocation5 + $0xde8] ss:$48 sps:$4 sm:$0xff]   ;;  %v10673_v37 = vld [vmem:[#allocation5 + $0xe44] ss:$48 sps:$4 sm:$0xff]  }
  0xf2   :  { %4815 = vmatprep.subr.bf16.mxu0 %v10589_v38  ;;  %4979 = vmatprep.subr.bf16.mxu1 %v10592_v39  ;;  %v10676_v38 = vld [vmem:[#allocation5 + $0xe4c] ss:$48 sps:$4 sm:$0xff]   ;;  %v10671_v39 = vld [vmem:[#allocation5 + $0xe40] ss:$48 sps:$4 sm:$0xff]  }
  0xf5   :  { %4816 = vmatpush1.bf16.msra.mxu0 %v10587_v40  ;;  %4980 = vmatpush1.bf16.msra.mxu1 %v10590_v41  ;;  %v10674_v40 = vld [vmem:[#allocation5 + $0xe48] ss:$48 sps:$4 sm:$0xff]   ;;  %v10679_v41 = vld [vmem:[#allocation5 + $0xea4] ss:$48 sps:$4 sm:$0xff]  }
  0xf6   :  { %4817 = vmatprep.subr.bf16.mxu0 %v10595_v42  ;;  %4981 = vmatprep.subr.bf16.mxu1 %v10598_v43  ;;  %v10682_v42 = vld [vmem:[#allocation5 + $0xeac] ss:$48 sps:$4 sm:$0xff]   ;;  %v10677_v43 = vld [vmem:[#allocation5 + $0xea0] ss:$48 sps:$4 sm:$0xff]  }
  0xf9   :  { %4818 = vmatpush1.bf16.msra.mxu0 %v10593_v44  ;;  %4982 = vmatpush1.bf16.msra.mxu1 %v10596_v45  ;;  %v10680_v44 = vld [vmem:[#allocation5 + $0xea8] ss:$48 sps:$4 sm:$0xff]   ;;  %v10685_v45 = vld [vmem:[#allocation5 + $0xf04] ss:$48 sps:$4 sm:$0xff]  }
  0xfa   :  { %4819 = vmatprep.subr.bf16.mxu0 %v10601_v46  ;;  %4983 = vmatprep.subr.bf16.mxu1 %v10604_v47  ;;  %v10688_v46 = vld [vmem:[#allocation5 + $0xf0c] ss:$48 sps:$4 sm:$0xff]   ;;  %v10683_v47 = vld [vmem:[#allocation5 + $0xf00] ss:$48 sps:$4 sm:$0xff]  }
  0xfd   :  { %4820 = vmatpush1.bf16.msra.mxu0 %v10599_v49  ;;  %4984 = vmatpush1.bf16.msra.mxu1 %v10602_v50  ;;  %v10686_v49 = vld [vmem:[#allocation5 + $0xf08] ss:$48 sps:$4 sm:$0xff]   ;;  %v10691_v50 = vld [vmem:[#allocation5 + $0xf64] ss:$48 sps:$4 sm:$0xff]  }
  0xfe   :  { %4821 = vmatprep.subr.bf16.mxu0 %v10607_v51  ;;  %4985 = vmatprep.subr.bf16.mxu1 %v10610_v52  ;;  %v10694_v51 = vld [vmem:[#allocation5 + $0xf6c] ss:$48 sps:$4 sm:$0xff]   ;;  %v10689_v52 = vld [vmem:[#allocation5 + $0xf60] ss:$48 sps:$4 sm:$0xff]  }
 0x101   :  { %4822 = vmatpush1.bf16.msra.mxu0 %v10605_v53  ;;  %4986 = vmatpush1.bf16.msra.mxu1 %v10608_v54  ;;  %v10692_v53 = vld [vmem:[#allocation5 + $0xf68] ss:$48 sps:$4 sm:$0xff]   ;;  %v10697_v54 = vld [vmem:[#allocation5 + $0xfc4] ss:$48 sps:$4 sm:$0xff]  }
 0x102   :  { %4823 = vmatprep.subr.bf16.mxu0 %v10613_v55  ;;  %4987 = vmatprep.subr.bf16.mxu1 %v10616_v56  ;;  %v10700_v55 = vld [vmem:[#allocation5 + $0xfcc] ss:$48 sps:$4 sm:$0xff]   ;;  %v10695_v56 = vld [vmem:[#allocation5 + $0xfc0] ss:$48 sps:$4 sm:$0xff]  }
 0x105   :  { %4824 = vmatpush1.bf16.msra.mxu0 %v10611_v57  ;;  %4988 = vmatpush1.bf16.msra.mxu1 %v10614_v58  ;;  %v10698_v57 = vld [vmem:[#allocation5 + $0xfc8] ss:$48 sps:$4 sm:$0xff]   ;;  %v10703_v58 = vld [vmem:[#allocation5 + $0x1024] ss:$48 sps:$4 sm:$0xff]  }
 0x106   :  { %4825 = vmatprep.subr.bf16.mxu0 %v10619_v59  ;;  %4989 = vmatprep.subr.bf16.mxu1 %v10622_v60  ;;  %v10706_v59 = vld [vmem:[#allocation5 + $0x102c] ss:$48 sps:$4 sm:$0xff]   ;;  %v10701_v60 = vld [vmem:[#allocation5 + $0x1020] ss:$48 sps:$4 sm:$0xff]  }
 0x109   :  { %4826 = vmatpush1.bf16.msra.mxu0 %v10617_v61  ;;  %4990 = vmatpush1.bf16.msra.mxu1 %v10620_v62  ;;  %v10704_v61 = vld [vmem:[#allocation5 + $0x1028] ss:$48 sps:$4 sm:$0xff]   ;;  %v10709_v62 = vld [vmem:[#allocation5 + $0x1084] ss:$48 sps:$4 sm:$0xff]  }
 0x10a   :  { %4827 = vmatprep.subr.bf16.mxu0 %v10625_v63  ;;  %4991 = vmatprep.subr.bf16.mxu1 %v10628_v0  ;;  %v10712_v63 = vld [vmem:[#allocation5 + $0x108c] ss:$48 sps:$4 sm:$0xff]   ;;  %v10707_v0 = vld [vmem:[#allocation5 + $0x1080] ss:$48 sps:$4 sm:$0xff]  }
 0x10d   :  { %4828 = vmatpush1.bf16.msra.mxu0 %v10623_v1  ;;  %4992 = vmatpush1.bf16.msra.mxu1 %v10626_v2  ;;  %v10710_v1 = vld [vmem:[#allocation5 + $0x1088] ss:$48 sps:$4 sm:$0xff]   ;;  %v10715_v2 = vld [vmem:[#allocation5 + $0x10e4] ss:$48 sps:$4 sm:$0xff]  }
 0x10e   :  { %4829 = vmatprep.subr.bf16.mxu0 %v10631_v3  ;;  %4993 = vmatprep.subr.bf16.mxu1 %v10634_v4  ;;  %v10718_v3 = vld [vmem:[#allocation5 + $0x10ec] ss:$48 sps:$4 sm:$0xff]   ;;  %v10713_v4 = vld [vmem:[#allocation5 + $0x10e0] ss:$48 sps:$4 sm:$0xff]  }
 0x111   :  { %4830 = vmatpush1.bf16.msra.mxu0 %v10629_v6  ;;  %4994 = vmatpush1.bf16.msra.mxu1 %v10632_v7  ;;  %v10716_v6 = vld [vmem:[#allocation5 + $0x10e8] ss:$48 sps:$4 sm:$0xff]   ;;  %v10721_v7 = vld [vmem:[#allocation5 + $0x1144] ss:$48 sps:$4 sm:$0xff]  }
 0x112   :  { %4840 = vmatprep.subr.bf16.mxu0 %v10637_v8  ;;  %5004 = vmatprep.subr.bf16.mxu1 %v10640_v10  ;;  %v10724_v8 = vld [vmem:[#allocation5 + $0x114c] ss:$48 sps:$4 sm:$0xff]   ;;  %v10722_v10 = vld [vmem:[#allocation5 + $0x1148] ss:$48 sps:$4 sm:$0xff]  }
 0x114   :  { %4832 = vmatmul.mubr.bf16.vlgmr.msra.gmra.mrb[0].mxu0 %v12132_v13  ;;  %4996 = vmatmul.mubr.bf16.vlgmr.msra.gmra.mrb[0].mxu1 %v12132_v13 }
 0x115   :  { %4841 = vmatpush1.bf16.msra.mxu0 %v10635_v11  ;;  %5005 = vmatpush1.bf16.msra.mxu1 %v10638_v12  ;;  %v10727_v11 = vld [vmem:[#allocation5 + $0x11a4] ss:$48 sps:$4 sm:$0xff]   ;;  %v10730_v12 = vld [vmem:[#allocation5 + $0x11ac] ss:$48 sps:$4 sm:$0xff]  }
 0x116   :  { %4842 = vmatprep.subr.bf16.mxu0 %v10643_v14  ;;  %5006 = vmatprep.subr.bf16.mxu1 %v10646_v15  ;;  %v10725_v14 = vld [vmem:[#allocation5 + $0x11a0] ss:$48 sps:$4 sm:$0xff]   ;;  %v10728_v15 = vld [vmem:[#allocation5 + $0x11a8] ss:$48 sps:$4 sm:$0xff]  }
 0x117   :  { %4872 = vmatprep.mubr.bf16.mxu0 %v12134_v17  ;;  %5036 = vmatprep.mubr.bf16.mxu1 %v12134_v17 }
 0x119   :  { %4843 = vmatpush1.bf16.msra.mxu0 %v10641_v18  ;;  %5007 = vmatpush1.bf16.msra.mxu1 %v10644_v19  ;;  %v138_v18 = vld [vmem:[#allocation2 + $0x20] sm:$0xff]  ;;  %v10736_v19 = vld [vmem:[#allocation5 + $0x120c] ss:$48 sps:$4 sm:$0xff]  }
 0x11a   :  { %4844 = vmatprep.subr.bf16.mxu0 %v10649_v20  ;;  %5008 = vmatprep.subr.bf16.mxu1 %v10652_v21  ;;  %v10731_v20 = vld [vmem:[#allocation5 + $0x1200] ss:$48 sps:$4 sm:$0xff]   ;;  %v10734_v21 = vld [vmem:[#allocation5 + $0x1208] ss:$48 sps:$4 sm:$0xff]  }
 0x11d   :  { %4845 = vmatpush1.bf16.msra.mxu0 %v10647_v22  ;;  %5009 = vmatpush1.bf16.msra.mxu1 %v10650_v23  ;;  %v12140_v22 = vpack.c.bf16 %v138_v18, %v138_v18  ;;  %v141_v23 = vld [vmem:[#allocation2 + $0x38] sm:$0xff]  ;;  %v10817_v18 = vld [vmem:[#allocation5 + $0x1744] ss:$48 sps:$4 sm:$0xff]  }
 0x11e   :  { %4846 = vmatprep.subr.bf16.mxu0 %v10655_v24  ;;  %5010 = vmatprep.subr.bf16.mxu1 %v10658_v25  ;;  %v10739_v24 = vld [vmem:[#allocation5 + $0x1264] ss:$48 sps:$4 sm:$0xff]   ;;  %v10742_v25 = vld [vmem:[#allocation5 + $0x126c] ss:$48 sps:$4 sm:$0xff]  }
 0x121   :  { %4847 = vmatpush1.bf16.msra.mxu0 %v10653_v26  ;;  %5011 = vmatpush1.bf16.msra.mxu1 %v10656_v27  ;;  %v12142_v26 = vpack.c.bf16 %v141_v23, %v141_v23  ;;  %v10737_v27 = vld [vmem:[#allocation5 + $0x1260] ss:$48 sps:$4 sm:$0xff]   ;;  %v10823_v23 = vld [vmem:[#allocation5 + $0x17a4] ss:$48 sps:$4 sm:$0xff]  }
 0x122   :  { %4848 = vmatprep.subr.bf16.mxu0 %v10661_v28  ;;  %5012 = vmatprep.subr.bf16.mxu1 %v10664_v29  ;;  %v10740_v28 = vld [vmem:[#allocation5 + $0x1268] ss:$48 sps:$4 sm:$0xff]   ;;  %v10745_v29 = vld [vmem:[#allocation5 + $0x12c4] ss:$48 sps:$4 sm:$0xff]  }
 0x125   :  { %4849 = vmatpush1.bf16.msra.mxu0 %v10659_v30  ;;  %5013 = vmatpush1.bf16.msra.mxu1 %v10662_v31  ;;  %v10748_v30 = vld [vmem:[#allocation5 + $0x12cc] ss:$48 sps:$4 sm:$0xff]   ;;  %v10743_v31 = vld [vmem:[#allocation5 + $0x12c0] ss:$48 sps:$4 sm:$0xff]  }
 0x126   :  { %4850 = vmatprep.subr.bf16.mxu0 %v10667_v33  ;;  %5014 = vmatprep.subr.bf16.mxu1 %v10670_v34  ;;  %v10746_v33 = vld [vmem:[#allocation5 + $0x12c8] ss:$48 sps:$4 sm:$0xff]   ;;  %v10751_v34 = vld [vmem:[#allocation5 + $0x1324] ss:$48 sps:$4 sm:$0xff]  }
 0x129   :  { %4851 = vmatpush1.bf16.msra.mxu0 %v10665_v35  ;;  %5015 = vmatpush1.bf16.msra.mxu1 %v10668_v36  ;;  %v10754_v35 = vld [vmem:[#allocation5 + $0x132c] ss:$48 sps:$4 sm:$0xff]   ;;  %v10749_v36 = vld [vmem:[#allocation5 + $0x1320] ss:$48 sps:$4 sm:$0xff]  }
 0x12a   :  { %4852 = vmatprep.subr.bf16.mxu0 %v10673_v37  ;;  %5016 = vmatprep.subr.bf16.mxu1 %v10676_v38  ;;  %v10752_v37 = vld [vmem:[#allocation5 + $0x1328] ss:$48 sps:$4 sm:$0xff]   ;;  %v10757_v38 = vld [vmem:[#allocation5 + $0x1384] ss:$48 sps:$4 sm:$0xff]  }
 0x12d   :  { %4853 = vmatpush1.bf16.msra.mxu0 %v10671_v39  ;;  %5017 = vmatpush1.bf16.msra.mxu1 %v10674_v40  ;;  %v10760_v39 = vld [vmem:[#allocation5 + $0x138c] ss:$48 sps:$4 sm:$0xff]   ;;  %v10755_v40 = vld [vmem:[#allocation5 + $0x1380] ss:$48 sps:$4 sm:$0xff]  }
 0x12e   :  { %4854 = vmatprep.subr.bf16.mxu0 %v10679_v41  ;;  %5018 = vmatprep.subr.bf16.mxu1 %v10682_v42  ;;  %v10758_v41 = vld [vmem:[#allocation5 + $0x1388] ss:$48 sps:$4 sm:$0xff]   ;;  %v10763_v42 = vld [vmem:[#allocation5 + $0x13e4] ss:$48 sps:$4 sm:$0xff]  }
 0x131   :  { %4855 = vmatpush1.bf16.msra.mxu0 %v10677_v43  ;;  %5019 = vmatpush1.bf16.msra.mxu1 %v10680_v44  ;;  %v10766_v43 = vld [vmem:[#allocation5 + $0x13ec] ss:$48 sps:$4 sm:$0xff]   ;;  %v10761_v44 = vld [vmem:[#allocation5 + $0x13e0] ss:$48 sps:$4 sm:$0xff]  }
 0x132   :  { %4856 = vmatprep.subr.bf16.mxu0 %v10685_v45  ;;  %5020 = vmatprep.subr.bf16.mxu1 %v10688_v46  ;;  %v10764_v45 = vld [vmem:[#allocation5 + $0x13e8] ss:$48 sps:$4 sm:$0xff]   ;;  %v10769_v46 = vld [vmem:[#allocation5 + $0x1444] ss:$48 sps:$4 sm:$0xff]  }
 0x135   :  { %4857 = vmatpush1.bf16.msra.mxu0 %v10683_v47  ;;  %5021 = vmatpush1.bf16.msra.mxu1 %v10686_v49  ;;  %v10772_v47 = vld [vmem:[#allocation5 + $0x144c] ss:$48 sps:$4 sm:$0xff]   ;;  %v10767_v49 = vld [vmem:[#allocation5 + $0x1440] ss:$48 sps:$4 sm:$0xff]  }
 0x136   :  { %4858 = vmatprep.subr.bf16.mxu0 %v10691_v50  ;;  %5022 = vmatprep.subr.bf16.mxu1 %v10694_v51  ;;  %v10770_v50 = vld [vmem:[#allocation5 + $0x1448] ss:$48 sps:$4 sm:$0xff]   ;;  %v10775_v51 = vld [vmem:[#allocation5 + $0x14a4] ss:$48 sps:$4 sm:$0xff]  }
 0x139   :  { %4859 = vmatpush1.bf16.msra.mxu0 %v10689_v52  ;;  %5023 = vmatpush1.bf16.msra.mxu1 %v10692_v53  ;;  %v10778_v52 = vld [vmem:[#allocation5 + $0x14ac] ss:$48 sps:$4 sm:$0xff]   ;;  %v10773_v53 = vld [vmem:[#allocation5 + $0x14a0] ss:$48 sps:$4 sm:$0xff]  }
 0x13a   :  { %4860 = vmatprep.subr.bf16.mxu0 %v10697_v54  ;;  %5024 = vmatprep.subr.bf16.mxu1 %v10700_v55  ;;  %v10776_v54 = vld [vmem:[#allocation5 + $0x14a8] ss:$48 sps:$4 sm:$0xff]   ;;  %v10781_v55 = vld [vmem:[#allocation5 + $0x1504] ss:$48 sps:$4 sm:$0xff]  }
 0x13d   :  { %4861 = vmatpush1.bf16.msra.mxu0 %v10695_v56  ;;  %5025 = vmatpush1.bf16.msra.mxu1 %v10698_v57  ;;  %v10784_v56 = vld [vmem:[#allocation5 + $0x150c] ss:$48 sps:$4 sm:$0xff]   ;;  %v10779_v57 = vld [vmem:[#allocation5 + $0x1500] ss:$48 sps:$4 sm:$0xff]  }
 0x13e   :  { %4862 = vmatprep.subr.bf16.mxu0 %v10703_v58  ;;  %5026 = vmatprep.subr.bf16.mxu1 %v10706_v59  ;;  %v10782_v58 = vld [vmem:[#allocation5 + $0x1508] ss:$48 sps:$4 sm:$0xff]   ;;  %v10787_v59 = vld [vmem:[#allocation5 + $0x1564] ss:$48 sps:$4 sm:$0xff]  }
 0x141   :  { %4863 = vmatpush1.bf16.msra.mxu0 %v10701_v60  ;;  %5027 = vmatpush1.bf16.msra.mxu1 %v10704_v61  ;;  %v10790_v60 = vld [vmem:[#allocation5 + $0x156c] ss:$48 sps:$4 sm:$0xff]   ;;  %v10785_v61 = vld [vmem:[#allocation5 + $0x1560] ss:$48 sps:$4 sm:$0xff]  }
 0x142   :  { %4864 = vmatprep.subr.bf16.mxu0 %v10709_v62  ;;  %5028 = vmatprep.subr.bf16.mxu1 %v10712_v63  ;;  %v10788_v62 = vld [vmem:[#allocation5 + $0x1568] ss:$48 sps:$4 sm:$0xff]   ;;  %v10793_v63 = vld [vmem:[#allocation5 + $0x15c4] ss:$48 sps:$4 sm:$0xff]  }
 0x145   :  { %4865 = vmatpush1.bf16.msra.mxu0 %v10707_v0  ;;  %5029 = vmatpush1.bf16.msra.mxu1 %v10710_v1  ;;  %v10796_v0 = vld [vmem:[#allocation5 + $0x15cc] ss:$48 sps:$4 sm:$0xff]   ;;  %v10791_v1 = vld [vmem:[#allocation5 + $0x15c0] ss:$48 sps:$4 sm:$0xff]  }
 0x146   :  { %4866 = vmatprep.subr.bf16.mxu0 %v10715_v2  ;;  %5030 = vmatprep.subr.bf16.mxu1 %v10718_v3  ;;  %v10794_v2 = vld [vmem:[#allocation5 + $0x15c8] ss:$48 sps:$4 sm:$0xff]   ;;  %v10799_v3 = vld [vmem:[#allocation5 + $0x1624] ss:$48 sps:$4 sm:$0xff]  }
 0x149   :  { %4867 = vmatpush1.bf16.msra.mxu0 %v10713_v4  ;;  %5031 = vmatpush1.bf16.msra.mxu1 %v10716_v6  ;;  %v10802_v4 = vld [vmem:[#allocation5 + $0x162c] ss:$48 sps:$4 sm:$0xff]   ;;  %v10797_v6 = vld [vmem:[#allocation5 + $0x1620] ss:$48 sps:$4 sm:$0xff]  }
 0x14a   :  { %4868 = vmatprep.subr.bf16.mxu0 %v10721_v7  ;;  %5032 = vmatprep.subr.bf16.mxu1 %v10724_v8  ;;  %v10800_v7 = vld [vmem:[#allocation5 + $0x1628] ss:$48 sps:$4 sm:$0xff]   ;;  %v10805_v8 = vld [vmem:[#allocation5 + $0x1684] ss:$48 sps:$4 sm:$0xff]  }
 0x14d   :  { %4869 = vmatpush1.bf16.msra.mxu0 %v10719_v9  ;;  %5033 = vmatpush1.bf16.msra.mxu1 %v10722_v10  ;;  %v10808_v9 = vld [vmem:[#allocation5 + $0x168c] ss:$48 sps:$4 sm:$0xff]   ;;  %v10803_v10 = vld [vmem:[#allocation5 + $0x1680] ss:$48 sps:$4 sm:$0xff]  }
 0x14e   :  { %4870 = vmatprep.subr.bf16.mxu0 %v10727_v11  ;;  %5034 = vmatprep.subr.bf16.mxu1 %v10730_v12  ;;  %v10806_v11 = vld [vmem:[#allocation5 + $0x1688] ss:$48 sps:$4 sm:$0xff]   ;;  %v10811_v12 = vld [vmem:[#allocation5 + $0x16e4] ss:$48 sps:$4 sm:$0xff]  }
 0x151   :  { %4871 = vmatpush1.bf16.msra.mxu0 %v10725_v14  ;;  %5035 = vmatpush1.bf16.msra.mxu1 %v10728_v15  ;;  %v10814_v14 = vld [vmem:[#allocation5 + $0x16ec] ss:$48 sps:$4 sm:$0xff]   ;;  %v10809_v15 = vld [vmem:[#allocation5 + $0x16e0] ss:$48 sps:$4 sm:$0xff]  }
 0x152   :  { %4881 = vmatprep.subr.bf16.mxu0 %v10733_v16  ;;  %5045 = vmatprep.subr.bf16.mxu1 %v10736_v19  ;;  %v10812_v16 = vld [vmem:[#allocation5 + $0x16e8] ss:$48 sps:$4 sm:$0xff]   ;;  %v10820_v19 = vld [vmem:[#allocation5 + $0x174c] ss:$48 sps:$4 sm:$0xff]  }
 0x154   :  { %4873 = vmatmul.mubr.bf16.vlgmr.msra.gmra.mrb[0].mxu0 %v12140_v22  ;;  %5037 = vmatmul.mubr.bf16.vlgmr.msra.gmra.mrb[0].mxu1 %v12140_v22 }
 0x155   :  { %4882 = vmatpush1.bf16.msra.mxu0 %v10731_v20  ;;  %5046 = vmatpush1.bf16.msra.mxu1 %v10734_v21  ;;  %v10815_v20 = vld [vmem:[#allocation5 + $0x1740] ss:$48 sps:$4 sm:$0xff]   ;;  %v10818_v21 = vld [vmem:[#allocation5 + $0x1748] ss:$48 sps:$4 sm:$0xff]  }
 0x156   :  { %4883 = vmatprep.subr.bf16.mxu0 %v10739_v24  ;;  %5047 = vmatprep.subr.bf16.mxu1 %v10742_v25  ;;  %v10826_v24 = vld [vmem:[#allocation5 + $0x17ac] ss:$48 sps:$4 sm:$0xff]   ;;  %v10821_v25 = vld [vmem:[#allocation5 + $0x17a0] ss:$48 sps:$4 sm:$0xff]  }
 0x157   :  { %4913 = vmatprep.mubr.bf16.mxu0 %v12142_v26  ;;  %5077 = vmatprep.mubr.bf16.mxu1 %v12142_v26 }
 0x159   :  { %4884 = vmatpush1.bf16.msra.mxu0 %v10737_v27  ;;  %5048 = vmatpush1.bf16.msra.mxu1 %v10740_v28  ;;  %v10824_v27 = vld [vmem:[#allocation5 + $0x17a8] ss:$48 sps:$4 sm:$0xff]   ;;  %v140_v28 = vld [vmem:[#allocation2 + $0x30] sm:$0xff] }
 0x15a   :  { %4885 = vmatprep.subr.bf16.mxu0 %v10745_v29  ;;  %5049 = vmatprep.subr.bf16.mxu1 %v10748_v30  ;;  %v10829_v29 = vld [vmem:[#allocation5 + $0x14] ss:$48 sps:$4 sm:$0xff]   ;;  %v10832_v30 = vld [vmem:[#allocation5 + $0x1c] ss:$48 sps:$4 sm:$0xff]  }
 0x15d   :  { %4886 = vmatpush1.bf16.msra.mxu0 %v10743_v31  ;;  %5050 = vmatpush1.bf16.msra.mxu1 %v10746_v33  ;;  %v12148_v31 = vpack.c.bf16 %v140_v28, %v140_v28  ;;  %v10827_v33 = vld [vmem:[#allocation5 + $0x10] ss:$48 sps:$4 sm:$0xff]   ;;  %v10908_v28 = vld [vmem:[#allocation5 + $0x4f8] ss:$48 sps:$4 sm:$0xff]  }
 0x15e   :  { %4887 = vmatprep.subr.bf16.mxu0 %v10751_v34  ;;  %5051 = vmatprep.subr.bf16.mxu1 %v10754_v35  ;;  %v10830_v34 = vld [vmem:[#allocation5 + $0x18] ss:$48 sps:$4 sm:$0xff]   ;;  %v10835_v35 = vld [vmem:[#allocation5 + $0x74] ss:$48 sps:$4 sm:$0xff]  }
 0x161   :  { %4888 = vmatpush1.bf16.msra.mxu0 %v10749_v36  ;;  %5052 = vmatpush1.bf16.msra.mxu1 %v10752_v37  ;;  %v10838_v36 = vld [vmem:[#allocation5 + $0x7c] ss:$48 sps:$4 sm:$0xff]   ;;  %v10833_v37 = vld [vmem:[#allocation5 + $0x70] ss:$48 sps:$4 sm:$0xff]  }
 0x162   :  { %4889 = vmatprep.subr.bf16.mxu0 %v10757_v38  ;;  %5053 = vmatprep.subr.bf16.mxu1 %v10760_v39  ;;  %v10836_v38 = vld [vmem:[#allocation5 + $0x78] ss:$48 sps:$4 sm:$0xff]   ;;  %v10841_v39 = vld [vmem:[#allocation5 + $0xd4] ss:$48 sps:$4 sm:$0xff]  }
 0x165   :  { %4890 = vmatpush1.bf16.msra.mxu0 %v10755_v40  ;;  %5054 = vmatpush1.bf16.msra.mxu1 %v10758_v41  ;;  %v10844_v40 = vld [vmem:[#allocation5 + $0xdc] ss:$48 sps:$4 sm:$0xff]   ;;  %v10839_v41 = vld [vmem:[#allocation5 + $0xd0] ss:$48 sps:$4 sm:$0xff]  }
 0x166   :  { %4891 = vmatprep.subr.bf16.mxu0 %v10763_v42  ;;  %5055 = vmatprep.subr.bf16.mxu1 %v10766_v43  ;;  %v10842_v42 = vld [vmem:[#allocation5 + $0xd8] ss:$48 sps:$4 sm:$0xff]   ;;  %v10847_v43 = vld [vmem:[#allocation5 + $0x134] ss:$48 sps:$4 sm:$0xff]  }
 0x169   :  { %4892 = vmatpush1.bf16.msra.mxu0 %v10761_v44  ;;  %5056 = vmatpush1.bf16.msra.mxu1 %v10764_v45  ;;  %v10850_v44 = vld [vmem:[#allocation5 + $0x13c] ss:$48 sps:$4 sm:$0xff]   ;;  %v10845_v45 = vld [vmem:[#allocation5 + $0x130] ss:$48 sps:$4 sm:$0xff]  }
 0x16a   :  { %4893 = vmatprep.subr.bf16.mxu0 %v10769_v46  ;;  %5057 = vmatprep.subr.bf16.mxu1 %v10772_v47  ;;  %v10848_v46 = vld [vmem:[#allocation5 + $0x138] ss:$48 sps:$4 sm:$0xff]   ;;  %v10853_v47 = vld [vmem:[#allocation5 + $0x194] ss:$48 sps:$4 sm:$0xff]  }
 0x16d   :  { %4894 = vmatpush1.bf16.msra.mxu0 %v10767_v49  ;;  %5058 = vmatpush1.bf16.msra.mxu1 %v10770_v50  ;;  %v10856_v49 = vld [vmem:[#allocation5 + $0x19c] ss:$48 sps:$4 sm:$0xff]   ;;  %v10851_v50 = vld [vmem:[#allocation5 + $0x190] ss:$48 sps:$4 sm:$0xff]  }
 0x16e   :  { %4895 = vmatprep.subr.bf16.mxu0 %v10775_v51  ;;  %5059 = vmatprep.subr.bf16.mxu1 %v10778_v52  ;;  %v10854_v51 = vld [vmem:[#allocation5 + $0x198] ss:$48 sps:$4 sm:$0xff]   ;;  %v10859_v52 = vld [vmem:[#allocation5 + $0x1f4] ss:$48 sps:$4 sm:$0xff]  }
 0x171   :  { %4896 = vmatpush1.bf16.msra.mxu0 %v10773_v53  ;;  %5060 = vmatpush1.bf16.msra.mxu1 %v10776_v54  ;;  %v10862_v53 = vld [vmem:[#allocation5 + $0x1fc] ss:$48 sps:$4 sm:$0xff]   ;;  %v10857_v54 = vld [vmem:[#allocation5 + $0x1f0] ss:$48 sps:$4 sm:$0xff]  }
 0x172   :  { %4897 = vmatprep.subr.bf16.mxu0 %v10781_v55  ;;  %5061 = vmatprep.subr.bf16.mxu1 %v10784_v56  ;;  %v10860_v55 = vld [vmem:[#allocation5 + $0x1f8] ss:$48 sps:$4 sm:$0xff]   ;;  %v10865_v56 = vld [vmem:[#allocation5 + $0x254] ss:$48 sps:$4 sm:$0xff]  }
 0x175   :  { %4898 = vmatpush1.bf16.msra.mxu0 %v10779_v57  ;;  %5062 = vmatpush1.bf16.msra.mxu1 %v10782_v58  ;;  %v10868_v57 = vld [vmem:[#allocation5 + $0x25c] ss:$48 sps:$4 sm:$0xff]   ;;  %v10863_v58 = vld [vmem:[#allocation5 + $0x250] ss:$48 sps:$4 sm:$0xff]  }
 0x176   :  { %4899 = vmatprep.subr.bf16.mxu0 %v10787_v59  ;;  %5063 = vmatprep.subr.bf16.mxu1 %v10790_v60  ;;  %v10866_v59 = vld [vmem:[#allocation5 + $0x258] ss:$48 sps:$4 sm:$0xff]   ;;  %v10871_v60 = vld [vmem:[#allocation5 + $0x2b4] ss:$48 sps:$4 sm:$0xff]  }
 0x179   :  { %4900 = vmatpush1.bf16.msra.mxu0 %v10785_v61  ;;  %5064 = vmatpush1.bf16.msra.mxu1 %v10788_v62  ;;  %v10874_v61 = vld [vmem:[#allocation5 + $0x2bc] ss:$48 sps:$4 sm:$0xff]   ;;  %v10869_v62 = vld [vmem:[#allocation5 + $0x2b0] ss:$48 sps:$4 sm:$0xff]  }
 0x17a   :  { %4901 = vmatprep.subr.bf16.mxu0 %v10793_v63  ;;  %5065 = vmatprep.subr.bf16.mxu1 %v10796_v0  ;;  %v10872_v63 = vld [vmem:[#allocation5 + $0x2b8] ss:$48 sps:$4 sm:$0xff]   ;;  %v10877_v0 = vld [vmem:[#allocation5 + $0x314] ss:$48 sps:$4 sm:$0xff]  }
 0x17d   :  { %4902 = vmatpush1.bf16.msra.mxu0 %v10791_v1  ;;  %5066 = vmatpush1.bf16.msra.mxu1 %v10794_v2  ;;  %v10880_v1 = vld [vmem:[#allocation5 + $0x31c] ss:$48 sps:$4 sm:$0xff]   ;;  %v10875_v2 = vld [vmem:[#allocation5 + $0x310] ss:$48 sps:$4 sm:$0xff]  }
 0x17e   :  { %4903 = vmatprep.subr.bf16.mxu0 %v10799_v3  ;;  %5067 = vmatprep.subr.bf16.mxu1 %v10802_v4  ;;  %v10878_v3 = vld [vmem:[#allocation5 + $0x318] ss:$48 sps:$4 sm:$0xff]   ;;  %v10883_v4 = vld [vmem:[#allocation5 + $0x374] ss:$48 sps:$4 sm:$0xff]  }
 0x181   :  { %4904 = vmatpush1.bf16.msra.mxu0 %v10797_v6  ;;  %5068 = vmatpush1.bf16.msra.mxu1 %v10800_v7  ;;  %v10886_v6 = vld [vmem:[#allocation5 + $0x37c] ss:$48 sps:$4 sm:$0xff]   ;;  %v10881_v7 = vld [vmem:[#allocation5 + $0x370] ss:$48 sps:$4 sm:$0xff]  }
 0x182   :  { %4905 = vmatprep.subr.bf16.mxu0 %v10805_v8  ;;  %5069 = vmatprep.subr.bf16.mxu1 %v10808_v9  ;;  %v10884_v8 = vld [vmem:[#allocation5 + $0x378] ss:$48 sps:$4 sm:$0xff]   ;;  %v10889_v9 = vld [vmem:[#allocation5 + $0x3d4] ss:$48 sps:$4 sm:$0xff]  }
 0x185   :  { %4906 = vmatpush1.bf16.msra.mxu0 %v10803_v10  ;;  %5070 = vmatpush1.bf16.msra.mxu1 %v10806_v11  ;;  %v10892_v10 = vld [vmem:[#allocation5 + $0x3dc] ss:$48 sps:$4 sm:$0xff]   ;;  %v10887_v11 = vld [vmem:[#allocation5 + $0x3d0] ss:$48 sps:$4 sm:$0xff]  }
 0x186   :  { %4907 = vmatprep.subr.bf16.mxu0 %v10811_v12  ;;  %5071 = vmatprep.subr.bf16.mxu1 %v10814_v14  ;;  %v10890_v12 = vld [vmem:[#allocation5 + $0x3d8] ss:$48 sps:$4 sm:$0xff]   ;;  %v10895_v14 = vld [vmem:[#allocation5 + $0x434] ss:$48 sps:$4 sm:$0xff]  }
 0x189   :  { %4908 = vmatpush1.bf16.msra.mxu0 %v10809_v15  ;;  %5072 = vmatpush1.bf16.msra.mxu1 %v10812_v16  ;;  %v10898_v15 = vld [vmem:[#allocation5 + $0x43c] ss:$48 sps:$4 sm:$0xff]   ;;  %v10893_v16 = vld [vmem:[#allocation5 + $0x430] ss:$48 sps:$4 sm:$0xff]  }
 0x18a   :  { %4909 = vmatprep.subr.bf16.mxu0 %v10817_v18  ;;  %5073 = vmatprep.subr.bf16.mxu1 %v10820_v19  ;;  %v10896_v18 = vld [vmem:[#allocation5 + $0x438] ss:$48 sps:$4 sm:$0xff]   ;;  %v10901_v19 = vld [vmem:[#allocation5 + $0x494] ss:$48 sps:$4 sm:$0xff]  }
 0x18d   :  { %4910 = vmatpush1.bf16.msra.mxu0 %v10815_v20  ;;  %5074 = vmatpush1.bf16.msra.mxu1 %v10818_v21  ;;  %v10904_v20 = vld [vmem:[#allocation5 + $0x49c] ss:$48 sps:$4 sm:$0xff]   ;;  %v10899_v21 = vld [vmem:[#allocation5 + $0x490] ss:$48 sps:$4 sm:$0xff]  }
 0x18e   :  { %4911 = vmatprep.subr.bf16.mxu0 %v10823_v23  ;;  %5075 = vmatprep.subr.bf16.mxu1 %v10826_v24  ;;  %v10902_v23 = vld [vmem:[#allocation5 + $0x498] ss:$48 sps:$4 sm:$0xff]   ;;  %v10907_v24 = vld [vmem:[#allocation5 + $0x4f4] ss:$48 sps:$4 sm:$0xff]  }
 0x191   :  { %4912 = vmatpush1.bf16.msra.mxu0 %v10821_v25  ;;  %5076 = vmatpush1.bf16.msra.mxu1 %v10824_v27  ;;  %v10910_v25 = vld [vmem:[#allocation5 + $0x4fc] ss:$48 sps:$4 sm:$0xff]   ;;  %v10905_v27 = vld [vmem:[#allocation5 + $0x4f0] ss:$48 sps:$4 sm:$0xff]  }
 0x192   :  { %5086 = vmatprep.subr.bf16.mxu0 %v10829_v29  ;;  %5250 = vmatprep.subr.bf16.mxu1 %v10832_v30  ;;  %v10913_v29 = vld [vmem:[#allocation5 + $0x554] ss:$48 sps:$4 sm:$0xff]   ;;  %v10916_v30 = vld [vmem:[#allocation5 + $0x55c] ss:$48 sps:$4 sm:$0xff]  }
 0x194   :  { %4914 = vmatmul.mubr.bf16.vlgmr.msra.gmra.mrb[0].mxu0 %v12148_v31  ;;  %5078 = vmatmul.mubr.bf16.vlgmr.msra.gmra.mrb[0].mxu1 %v12148_v31 }
 0x195   :  { %5087 = vmatpush1.bf16.msra.mxu0 %v10827_v33  ;;  %5251 = vmatpush1.bf16.msra.mxu1 %v10830_v34  ;;  %v10911_v33 = vld [vmem:[#allocation5 + $0x550] ss:$48 sps:$4 sm:$0xff]   ;;  %v10914_v34 = vld [vmem:[#allocation5 + $0x558] ss:$48 sps:$4 sm:$0xff]  }
 0x196   :  { %5088 = vmatprep.subr.bf16.mxu0 %v10835_v35  ;;  %5252 = vmatprep.subr.bf16.mxu1 %v10838_v36  ;;  %v10919_v35 = vld [vmem:[#allocation5 + $0x5b4] ss:$48 sps:$4 sm:$0xff]   ;;  %v10922_v36 = vld [vmem:[#allocation5 + $0x5bc] ss:$48 sps:$4 sm:$0xff]  }
 0x197   :  { %5118 = vmatprep.mubr.bf16.mxu0 %v12120_v48  ;;  %5282 = vmatprep.mubr.bf16.mxu1 %v12120_v48 }
 0x199   :  { %5089 = vmatpush1.bf16.msra.mxu0 %v10833_v37  ;;  %5253 = vmatpush1.bf16.msra.mxu1 %v10836_v38  ;;  %v10917_v37 = vld [vmem:[#allocation5 + $0x5b0] ss:$48 sps:$4 sm:$0xff]   ;;  %v10920_v38 = vld [vmem:[#allocation5 + $0x5b8] ss:$48 sps:$4 sm:$0xff]  }
 0x19a   :  { %5090 = vmatprep.subr.bf16.mxu0 %v10841_v39  ;;  %5254 = vmatprep.subr.bf16.mxu1 %v10844_v40  ;;  %v10925_v39 = vld [vmem:[#allocation5 + $0x614] ss:$48 sps:$4 sm:$0xff]   ;;  %v10928_v40 = vld [vmem:[#allocation5 + $0x61c] ss:$48 sps:$4 sm:$0xff]  }
 0x19d   :  { %5091 = vmatpush1.bf16.msra.mxu0 %v10839_v41  ;;  %5255 = vmatpush1.bf16.msra.mxu1 %v10842_v42  ;;  %v10923_v41 = vld [vmem:[#allocation5 + $0x610] ss:$48 sps:$4 sm:$0xff]   ;;  %v10926_v42 = vld [vmem:[#allocation5 + $0x618] ss:$48 sps:$4 sm:$0xff]  }
 0x19e   :  { %5092 = vmatprep.subr.bf16.mxu0 %v10847_v43  ;;  %5256 = vmatprep.subr.bf16.mxu1 %v10850_v44  ;;  %v10931_v43 = vld [vmem:[#allocation5 + $0x674] ss:$48 sps:$4 sm:$0xff]   ;;  %v10934_v44 = vld [vmem:[#allocation5 + $0x67c] ss:$48 sps:$4 sm:$0xff]  }
 0x1a1   :  { %5093 = vmatpush1.bf16.msra.mxu0 %v10845_v45  ;;  %5257 = vmatpush1.bf16.msra.mxu1 %v10848_v46  ;;  %v10929_v45 = vld [vmem:[#allocation5 + $0x670] ss:$48 sps:$4 sm:$0xff]   ;;  %v10932_v46 = vld [vmem:[#allocation5 + $0x678] ss:$48 sps:$4 sm:$0xff]  }
 0x1a2   :  { %5094 = vmatprep.subr.bf16.mxu0 %v10853_v47  ;;  %5258 = vmatprep.subr.bf16.mxu1 %v10856_v49  ;;  %v10937_v47 = vld [vmem:[#allocation5 + $0x6d4] ss:$48 sps:$4 sm:$0xff]   ;;  %v10940_v49 = vld [vmem:[#allocation5 + $0x6dc] ss:$48 sps:$4 sm:$0xff]  }
 0x1a5   :  { %5095 = vmatpush1.bf16.msra.mxu0 %v10851_v50  ;;  %5259 = vmatpush1.bf16.msra.mxu1 %v10854_v51  ;;  %v10935_v50 = vld [vmem:[#allocation5 + $0x6d0] ss:$48 sps:$4 sm:$0xff]   ;;  %v10938_v51 = vld [vmem:[#allocation5 + $0x6d8] ss:$48 sps:$4 sm:$0xff]  }
 0x1a6   :  { %5096 = vmatprep.subr.bf16.mxu0 %v10859_v52  ;;  %5260 = vmatprep.subr.bf16.mxu1 %v10862_v53  ;;  %v10943_v52 = vld [vmem:[#allocation5 + $0x734] ss:$48 sps:$4 sm:$0xff]   ;;  %v10946_v53 = vld [vmem:[#allocation5 + $0x73c] ss:$48 sps:$4 sm:$0xff]  }
 0x1a9   :  { %5097 = vmatpush1.bf16.msra.mxu0 %v10857_v54  ;;  %5261 = vmatpush1.bf16.msra.mxu1 %v10860_v55  ;;  %v10941_v54 = vld [vmem:[#allocation5 + $0x730] ss:$48 sps:$4 sm:$0xff]   ;;  %v10944_v55 = vld [vmem:[#allocation5 + $0x738] ss:$48 sps:$4 sm:$0xff]  }
 0x1aa   :  { %5098 = vmatprep.subr.bf16.mxu0 %v10865_v56  ;;  %5262 = vmatprep.subr.bf16.mxu1 %v10868_v57  ;;  %v10949_v56 = vld [vmem:[#allocation5 + $0x794] ss:$48 sps:$4 sm:$0xff]   ;;  %v10952_v57 = vld [vmem:[#allocation5 + $0x79c] ss:$48 sps:$4 sm:$0xff]  }
 0x1ad   :  { %5099 = vmatpush1.bf16.msra.mxu0 %v10863_v58  ;;  %5263 = vmatpush1.bf16.msra.mxu1 %v10866_v59  ;;  %v10947_v58 = vld [vmem:[#allocation5 + $0x790] ss:$48 sps:$4 sm:$0xff]   ;;  %v10950_v59 = vld [vmem:[#allocation5 + $0x798] ss:$48 sps:$4 sm:$0xff]  }
 0x1ae   :  { %5100 = vmatprep.subr.bf16.mxu0 %v10871_v60  ;;  %5264 = vmatprep.subr.bf16.mxu1 %v10874_v61  ;;  %v10955_v60 = vld [vmem:[#allocation5 + $0x7f4] ss:$48 sps:$4 sm:$0xff]   ;;  %v10958_v61 = vld [vmem:[#allocation5 + $0x7fc] ss:$48 sps:$4 sm:$0xff]  }
 0x1b1   :  { %5101 = vmatpush1.bf16.msra.mxu0 %v10869_v62  ;;  %5265 = vmatpush1.bf16.msra.mxu1 %v10872_v63  ;;  %v10953_v62 = vld [vmem:[#allocation5 + $0x7f0] ss:$48 sps:$4 sm:$0xff]   ;;  %v10956_v63 = vld [vmem:[#allocation5 + $0x7f8] ss:$48 sps:$4 sm:$0xff]  }
 0x1b2   :  { %5102 = vmatprep.subr.bf16.mxu0 %v10877_v0  ;;  %5266 = vmatprep.subr.bf16.mxu1 %v10880_v1  ;;  %v10961_v0 = vld [vmem:[#allocation5 + $0x854] ss:$48 sps:$4 sm:$0xff]   ;;  %v10964_v1 = vld [vmem:[#allocation5 + $0x85c] ss:$48 sps:$4 sm:$0xff]  }
 0x1b5   :  { %5103 = vmatpush1.bf16.msra.mxu0 %v10875_v2  ;;  %5267 = vmatpush1.bf16.msra.mxu1 %v10878_v3  ;;  %v10959_v2 = vld [vmem:[#allocation5 + $0x850] ss:$48 sps:$4 sm:$0xff]   ;;  %v10962_v3 = vld [vmem:[#allocation5 + $0x858] ss:$48 sps:$4 sm:$0xff]  }
 0x1b6   :  { %5104 = vmatprep.subr.bf16.mxu0 %v10883_v4  ;;  %5268 = vmatprep.subr.bf16.mxu1 %v10886_v6  ;;  %v10967_v4 = vld [vmem:[#allocation5 + $0x8b4] ss:$48 sps:$4 sm:$0xff]   ;;  %v10970_v6 = vld [vmem:[#allocation5 + $0x8bc] ss:$48 sps:$4 sm:$0xff]  }
 0x1b9   :  { %5105 = vmatpush1.bf16.msra.mxu0 %v10881_v7  ;;  %5269 = vmatpush1.bf16.msra.mxu1 %v10884_v8  ;;  %v10965_v7 = vld [vmem:[#allocation5 + $0x8b0] ss:$48 sps:$4 sm:$0xff]   ;;  %v10968_v8 = vld [vmem:[#allocation5 + $0x8b8] ss:$48 sps:$4 sm:$0xff]  }
 0x1ba   :  { %5106 = vmatprep.subr.bf16.mxu0 %v10889_v9  ;;  %5270 = vmatprep.subr.bf16.mxu1 %v10892_v10  ;;  %v10973_v9 = vld [vmem:[#allocation5 + $0x914] ss:$48 sps:$4 sm:$0xff]   ;;  %v10976_v10 = vld [vmem:[#allocation5 + $0x91c] ss:$48 sps:$4 sm:$0xff]  }
 0x1bd   :  { %5107 = vmatpush1.bf16.msra.mxu0 %v10887_v11  ;;  %5271 = vmatpush1.bf16.msra.mxu1 %v10890_v12  ;;  %v10971_v11 = vld [vmem:[#allocation5 + $0x910] ss:$48 sps:$4 sm:$0xff]   ;;  %v10974_v12 = vld [vmem:[#allocation5 + $0x918] ss:$48 sps:$4 sm:$0xff]  }
 0x1be   :  { %5108 = vmatprep.subr.bf16.mxu0 %v10895_v14  ;;  %5272 = vmatprep.subr.bf16.mxu1 %v10898_v15  ;;  %v10979_v14 = vld [vmem:[#allocation5 + $0x974] ss:$48 sps:$4 sm:$0xff]   ;;  %v10982_v15 = vld [vmem:[#allocation5 + $0x97c] ss:$48 sps:$4 sm:$0xff]  }
 0x1c1   :  { %5109 = vmatpush1.bf16.msra.mxu0 %v10893_v16  ;;  %5273 = vmatpush1.bf16.msra.mxu1 %v10896_v18  ;;  %v10977_v16 = vld [vmem:[#allocation5 + $0x970] ss:$48 sps:$4 sm:$0xff]   ;;  %v10980_v18 = vld [vmem:[#allocation5 + $0x978] ss:$48 sps:$4 sm:$0xff]  }
 0x1c2   :  { %5110 = vmatprep.subr.bf16.mxu0 %v10901_v19  ;;  %5274 = vmatprep.subr.bf16.mxu1 %v10904_v20  ;;  %v10985_v19 = vld [vmem:[#allocation5 + $0x9d4] ss:$48 sps:$4 sm:$0xff]   ;;  %v10988_v20 = vld [vmem:[#allocation5 + $0x9dc] ss:$48 sps:$4 sm:$0xff]  }
 0x1c5   :  { %5111 = vmatpush1.bf16.msra.mxu0 %v10899_v21  ;;  %5275 = vmatpush1.bf16.msra.mxu1 %v10902_v23  ;;  %v10983_v21 = vld [vmem:[#allocation5 + $0x9d0] ss:$48 sps:$4 sm:$0xff]   ;;  %v10986_v23 = vld [vmem:[#allocation5 + $0x9d8] ss:$48 sps:$4 sm:$0xff]  }
 0x1c6   :  { %5112 = vmatprep.subr.bf16.mxu0 %v10907_v24  ;;  %5276 = vmatprep.subr.bf16.mxu1 %v10910_v25  ;;  %v10991_v24 = vld [vmem:[#allocation5 + $0xa34] ss:$48 sps:$4 sm:$0xff]   ;;  %v10994_v25 = vld [vmem:[#allocation5 + $0xa3c] ss:$48 sps:$4 sm:$0xff]  }
 0x1c9   :  { %5113 = vmatpush1.bf16.msra.mxu0 %v10905_v27  ;;  %5277 = vmatpush1.bf16.msra.mxu1 %v10908_v28  ;;  %v10989_v27 = vld [vmem:[#allocation5 + $0xa30] ss:$48 sps:$4 sm:$0xff]   ;;  %v10992_v28 = vld [vmem:[#allocation5 + $0xa38] ss:$48 sps:$4 sm:$0xff]  }
 0x1ca   :  { %5114 = vmatprep.subr.bf16.mxu0 %v10913_v29  ;;  %5278 = vmatprep.subr.bf16.mxu1 %v10916_v30  ;;  %v10997_v29 = vld [vmem:[#allocation5 + $0xa94] ss:$48 sps:$4 sm:$0xff]   ;;  %v11000_v30 = vld [vmem:[#allocation5 + $0xa9c] ss:$48 sps:$4 sm:$0xff]  }
 0x1cd   :  { %5115 = vmatpush1.bf16.msra.mxu0 %v10911_v33  ;;  %5279 = vmatpush1.bf16.msra.mxu1 %v10914_v34  ;;  %v10995_v33 = vld [vmem:[#allocation5 + $0xa90] ss:$48 sps:$4 sm:$0xff]   ;;  %v10998_v34 = vld [vmem:[#allocation5 + $0xa98] ss:$48 sps:$4 sm:$0xff]  }
 0x1ce   :  { %5116 = vmatprep.subr.bf16.mxu0 %v10919_v35  ;;  %5280 = vmatprep.subr.bf16.mxu1 %v10922_v36  ;;  %v11003_v35 = vld [vmem:[#allocation5 + $0xaf4] ss:$48 sps:$4 sm:$0xff]   ;;  %v11006_v36 = vld [vmem:[#allocation5 + $0xafc] ss:$48 sps:$4 sm:$0xff]  }
 0x1d1   :  { %5117 = vmatpush1.bf16.msra.mxu0 %v10917_v37  ;;  %5281 = vmatpush1.bf16.msra.mxu1 %v10920_v38  ;;  %v11001_v37 = vld [vmem:[#allocation5 + $0xaf0] ss:$48 sps:$4 sm:$0xff]   ;;  %v11004_v38 = vld [vmem:[#allocation5 + $0xaf8] ss:$48 sps:$4 sm:$0xff]  }
 0x1d2   :  { %5127 = vmatprep.subr.bf16.mxu0 %v10925_v39  ;;  %5291 = vmatprep.subr.bf16.mxu1 %v10928_v40  ;;  %v11009_v39 = vld [vmem:[#allocation5 + $0xb54] ss:$48 sps:$4 sm:$0xff]   ;;  %v11012_v40 = vld [vmem:[#allocation5 + $0xb5c] ss:$48 sps:$4 sm:$0xff]  }
 0x1d4   :  { %5119 = vmatmul.mubr.bf16.vlgmr.msra.gmra.mrb[4].mxu0 %v12124_v5  ;;  %5283 = vmatmul.mubr.bf16.vlgmr.msra.gmra.mrb[4].mxu1 %v12124_v5 }
 0x1d5   :  { %5128 = vmatpush1.bf16.msra.mxu0 %v10923_v41  ;;  %5292 = vmatpush1.bf16.msra.mxu1 %v10926_v42  ;;  %v11007_v41 = vld [vmem:[#allocation5 + $0xb50] ss:$48 sps:$4 sm:$0xff]   ;;  %v11010_v42 = vld [vmem:[#allocation5 + $0xb58] ss:$48 sps:$4 sm:$0xff]  }
 0x1d6   :  { %5129 = vmatprep.subr.bf16.mxu0 %v10931_v43  ;;  %5293 = vmatprep.subr.bf16.mxu1 %v10934_v44  ;;  %v11015_v43 = vld [vmem:[#allocation5 + $0xbb4] ss:$48 sps:$4 sm:$0xff]   ;;  %v11018_v44 = vld [vmem:[#allocation5 + $0xbbc] ss:$48 sps:$4 sm:$0xff]  }
 0x1d7   :  { %5159 = vmatprep.mubr.bf16.mxu0 %v12128_v32  ;;  %5323 = vmatprep.mubr.bf16.mxu1 %v12128_v32 }
 0x1d9   :  { %5130 = vmatpush1.bf16.msra.mxu0 %v10929_v45  ;;  %5294 = vmatpush1.bf16.msra.mxu1 %v10932_v46  ;;  %v11013_v45 = vld [vmem:[#allocation5 + $0xbb0] ss:$48 sps:$4 sm:$0xff]   ;;  %v11016_v46 = vld [vmem:[#allocation5 + $0xbb8] ss:$48 sps:$4 sm:$0xff]  }
 0x1da   :  { %5131 = vmatprep.subr.bf16.mxu0 %v10937_v47  ;;  %5295 = vmatprep.subr.bf16.mxu1 %v10940_v49  ;;  %v11021_v47 = vld [vmem:[#allocation5 + $0xc14] ss:$48 sps:$4 sm:$0xff]   ;;  %v11024_v49 = vld [vmem:[#allocation5 + $0xc1c] ss:$48 sps:$4 sm:$0xff]  }
 0x1dd   :  { %5132 = vmatpush1.bf16.msra.mxu0 %v10935_v50  ;;  %5296 = vmatpush1.bf16.msra.mxu1 %v10938_v51  ;;  %v11019_v50 = vld [vmem:[#allocation5 + $0xc10] ss:$48 sps:$4 sm:$0xff]   ;;  %v11022_v51 = vld [vmem:[#allocation5 + $0xc18] ss:$48 sps:$4 sm:$0xff]  }
 0x1de   :  { %5133 = vmatprep.subr.bf16.mxu0 %v10943_v52  ;;  %5297 = vmatprep.subr.bf16.mxu1 %v10946_v53  ;;  %v11027_v52 = vld [vmem:[#allocation5 + $0xc74] ss:$48 sps:$4 sm:$0xff]   ;;  %v11030_v53 = vld [vmem:[#allocation5 + $0xc7c] ss:$48 sps:$4 sm:$0xff]  }
 0x1e1   :  { %5134 = vmatpush1.bf16.msra.mxu0 %v10941_v54  ;;  %5298 = vmatpush1.bf16.msra.mxu1 %v10944_v55  ;;  %v11025_v54 = vld [vmem:[#allocation5 + $0xc70] ss:$48 sps:$4 sm:$0xff]   ;;  %v11028_v55 = vld [vmem:[#allocation5 + $0xc78] ss:$48 sps:$4 sm:$0xff]  }
 0x1e2   :  { %5135 = vmatprep.subr.bf16.mxu0 %v10949_v56  ;;  %5299 = vmatprep.subr.bf16.mxu1 %v10952_v57  ;;  %v11033_v56 = vld [vmem:[#allocation5 + $0xcd4] ss:$48 sps:$4 sm:$0xff]   ;;  %v11036_v57 = vld [vmem:[#allocation5 + $0xcdc] ss:$48 sps:$4 sm:$0xff]  }
 0x1e5   :  { %5136 = vmatpush1.bf16.msra.mxu0 %v10947_v58  ;;  %5300 = vmatpush1.bf16.msra.mxu1 %v10950_v59  ;;  %v11031_v58 = vld [vmem:[#allocation5 + $0xcd0] ss:$48 sps:$4 sm:$0xff]   ;;  %v11034_v59 = vld [vmem:[#allocation5 + $0xcd8] ss:$48 sps:$4 sm:$0xff]  }
 0x1e6   :  { %5137 = vmatprep.subr.bf16.mxu0 %v10955_v60  ;;  %5301 = vmatprep.subr.bf16.mxu1 %v10958_v61  ;;  %v11039_v60 = vld [vmem:[#allocation5 + $0xd34] ss:$48 sps:$4 sm:$0xff]   ;;  %v11042_v61 = vld [vmem:[#allocation5 + $0xd3c] ss:$48 sps:$4 sm:$0xff]  }
 0x1e9   :  { %5138 = vmatpush1.bf16.msra.mxu0 %v10953_v62  ;;  %5302 = vmatpush1.bf16.msra.mxu1 %v10956_v63  ;;  %v11037_v62 = vld [vmem:[#allocation5 + $0xd30] ss:$48 sps:$4 sm:$0xff]   ;;  %v11040_v63 = vld [vmem:[#allocation5 + $0xd38] ss:$48 sps:$4 sm:$0xff]  }
 0x1ea   :  { %5139 = vmatprep.subr.bf16.mxu0 %v10961_v0  ;;  %5303 = vmatprep.subr.bf16.mxu1 %v10964_v1  ;;  %v11045_v0 = vld [vmem:[#allocation5 + $0xd94] ss:$48 sps:$4 sm:$0xff]   ;;  %v11048_v1 = vld [vmem:[#allocation5 + $0xd9c] ss:$48 sps:$4 sm:$0xff]  }
 0x1ed   :  { %5140 = vmatpush1.bf16.msra.mxu0 %v10959_v2  ;;  %5304 = vmatpush1.bf16.msra.mxu1 %v10962_v3  ;;  %v11043_v2 = vld [vmem:[#allocation5 + $0xd90] ss:$48 sps:$4 sm:$0xff]   ;;  %v11046_v3 = vld [vmem:[#allocation5 + $0xd98] ss:$48 sps:$4 sm:$0xff]  }
 0x1ee   :  { %5141 = vmatprep.subr.bf16.mxu0 %v10967_v4  ;;  %5305 = vmatprep.subr.bf16.mxu1 %v10970_v6  ;;  %v11051_v4 = vld [vmem:[#allocation5 + $0xdf4] ss:$48 sps:$4 sm:$0xff]   ;;  %v11054_v6 = vld [vmem:[#allocation5 + $0xdfc] ss:$48 sps:$4 sm:$0xff]  }
 0x1f1   :  { %5142 = vmatpush1.bf16.msra.mxu0 %v10965_v7  ;;  %5306 = vmatpush1.bf16.msra.mxu1 %v10968_v8  ;;  %v11049_v7 = vld [vmem:[#allocation5 + $0xdf0] ss:$48 sps:$4 sm:$0xff]   ;;  %v11052_v8 = vld [vmem:[#allocation5 + $0xdf8] ss:$48 sps:$4 sm:$0xff]  }
 0x1f2   :  { %5143 = vmatprep.subr.bf16.mxu0 %v10973_v9  ;;  %5307 = vmatprep.subr.bf16.mxu1 %v10976_v10  ;;  %v11057_v9 = vld [vmem:[#allocation5 + $0xe54] ss:$48 sps:$4 sm:$0xff]   ;;  %v11060_v10 = vld [vmem:[#allocation5 + $0xe5c] ss:$48 sps:$4 sm:$0xff]  }
 0x1f5   :  { %5144 = vmatpush1.bf16.msra.mxu0 %v10971_v11  ;;  %5308 = vmatpush1.bf16.msra.mxu1 %v10974_v12  ;;  %v11055_v11 = vld [vmem:[#allocation5 + $0xe50] ss:$48 sps:$4 sm:$0xff]   ;;  %v11058_v12 = vld [vmem:[#allocation5 + $0xe58] ss:$48 sps:$4 sm:$0xff]  }
 0x1f6   :  { %5145 = vmatprep.subr.bf16.mxu0 %v10979_v14  ;;  %5309 = vmatprep.subr.bf16.mxu1 %v10982_v15  ;;  %v11063_v14 = vld [vmem:[#allocation5 + $0xeb4] ss:$48 sps:$4 sm:$0xff]   ;;  %v11066_v15 = vld [vmem:[#allocation5 + $0xebc] ss:$48 sps:$4 sm:$0xff]  }
 0x1f9   :  { %5146 = vmatpush1.bf16.msra.mxu0 %v10977_v16  ;;  %5310 = vmatpush1.bf16.msra.mxu1 %v10980_v18  ;;  %v11061_v16 = vld [vmem:[#allocation5 + $0xeb0] ss:$48 sps:$4 sm:$0xff]   ;;  %v11064_v18 = vld [vmem:[#allocation5 + $0xeb8] ss:$48 sps:$4 sm:$0xff]  }
 0x1fa   :  { %5147 = vmatprep.subr.bf16.mxu0 %v10985_v19  ;;  %5311 = vmatprep.subr.bf16.mxu1 %v10988_v20  ;;  %v11069_v19 = vld [vmem:[#allocation5 + $0xf14] ss:$48 sps:$4 sm:$0xff]   ;;  %v11072_v20 = vld [vmem:[#allocation5 + $0xf1c] ss:$48 sps:$4 sm:$0xff]  }
 0x1fd   :  { %5148 = vmatpush1.bf16.msra.mxu0 %v10983_v21  ;;  %5312 = vmatpush1.bf16.msra.mxu1 %v10986_v23  ;;  %v11067_v21 = vld [vmem:[#allocation5 + $0xf10] ss:$48 sps:$4 sm:$0xff]   ;;  %v11070_v23 = vld [vmem:[#allocation5 + $0xf18] ss:$48 sps:$4 sm:$0xff]  }
 0x1fe   :  { %5149 = vmatprep.subr.bf16.mxu0 %v10991_v24  ;;  %5313 = vmatprep.subr.bf16.mxu1 %v10994_v25  ;;  %v11075_v24 = vld [vmem:[#allocation5 + $0xf74] ss:$48 sps:$4 sm:$0xff]   ;;  %v11078_v25 = vld [vmem:[#allocation5 + $0xf7c] ss:$48 sps:$4 sm:$0xff]  }
 0x201   :  { %5150 = vmatpush1.bf16.msra.mxu0 %v10989_v27  ;;  %5314 = vmatpush1.bf16.msra.mxu1 %v10992_v28  ;;  %v11073_v27 = vld [vmem:[#allocation5 + $0xf70] ss:$48 sps:$4 sm:$0xff]   ;;  %v11076_v28 = vld [vmem:[#allocation5 + $0xf78] ss:$48 sps:$4 sm:$0xff]  }
 0x202   :  { %5151 = vmatprep.subr.bf16.mxu0 %v10997_v29  ;;  %5315 = vmatprep.subr.bf16.mxu1 %v11000_v30  ;;  %v11081_v29 = vld [vmem:[#allocation5 + $0xfd4] ss:$48 sps:$4 sm:$0xff]   ;;  %v11084_v30 = vld [vmem:[#allocation5 + $0xfdc] ss:$48 sps:$4 sm:$0xff]  }
 0x205   :  { %5152 = vmatpush1.bf16.msra.mxu0 %v10995_v33  ;;  %5316 = vmatpush1.bf16.msra.mxu1 %v10998_v34  ;;  %v11079_v33 = vld [vmem:[#allocation5 + $0xfd0] ss:$48 sps:$4 sm:$0xff]   ;;  %v11082_v34 = vld [vmem:[#allocation5 + $0xfd8] ss:$48 sps:$4 sm:$0xff]  }
 0x206   :  { %5153 = vmatprep.subr.bf16.mxu0 %v11003_v35  ;;  %5317 = vmatprep.subr.bf16.mxu1 %v11006_v36  ;;  %v11087_v35 = vld [vmem:[#allocation5 + $0x1034] ss:$48 sps:$4 sm:$0xff]   ;;  %v11090_v36 = vld [vmem:[#allocation5 + $0x103c] ss:$48 sps:$4 sm:$0xff]  }
 0x209   :  { %5154 = vmatpush1.bf16.msra.mxu0 %v11001_v37  ;;  %5318 = vmatpush1.bf16.msra.mxu1 %v11004_v38  ;;  %v11085_v37 = vld [vmem:[#allocation5 + $0x1030] ss:$48 sps:$4 sm:$0xff]   ;;  %v11088_v38 = vld [vmem:[#allocation5 + $0x1038] ss:$48 sps:$4 sm:$0xff]  }
 0x20a   :  { %5155 = vmatprep.subr.bf16.mxu0 %v11009_v39  ;;  %5319 = vmatprep.subr.bf16.mxu1 %v11012_v40  ;;  %v11093_v39 = vld [vmem:[#allocation5 + $0x1094] ss:$48 sps:$4 sm:$0xff]   ;;  %v11096_v40 = vld [vmem:[#allocation5 + $0x109c] ss:$48 sps:$4 sm:$0xff]  }
 0x20d   :  { %5156 = vmatpush1.bf16.msra.mxu0 %v11007_v41  ;;  %5320 = vmatpush1.bf16.msra.mxu1 %v11010_v42  ;;  %v11091_v41 = vld [vmem:[#allocation5 + $0x1090] ss:$48 sps:$4 sm:$0xff]   ;;  %v11094_v42 = vld [vmem:[#allocation5 + $0x1098] ss:$48 sps:$4 sm:$0xff]  }
 0x20e   :  { %5157 = vmatprep.subr.bf16.mxu0 %v11015_v43  ;;  %5321 = vmatprep.subr.bf16.mxu1 %v11018_v44  ;;  %v11099_v43 = vld [vmem:[#allocation5 + $0x10f4] ss:$48 sps:$4 sm:$0xff]   ;;  %v11102_v44 = vld [vmem:[#allocation5 + $0x10fc] ss:$48 sps:$4 sm:$0xff]  }
 0x211   :  { %5158 = vmatpush1.bf16.msra.mxu0 %v11013_v45  ;;  %5322 = vmatpush1.bf16.msra.mxu1 %v11016_v46  ;;  %v11097_v45 = vld [vmem:[#allocation5 + $0x10f0] ss:$48 sps:$4 sm:$0xff]   ;;  %v11100_v46 = vld [vmem:[#allocation5 + $0x10f8] ss:$48 sps:$4 sm:$0xff]  }
 0x212   :  { %5168 = vmatprep.subr.bf16.mxu0 %v11021_v47  ;;  %5332 = vmatprep.subr.bf16.mxu1 %v11024_v49  ;;  %v11105_v47 = vld [vmem:[#allocation5 + $0x1154] ss:$48 sps:$4 sm:$0xff]   ;;  %v11108_v49 = vld [vmem:[#allocation5 + $0x115c] ss:$48 sps:$4 sm:$0xff]  }
 0x214   :  { %5160 = vmatmul.mubr.bf16.vlgmr.msra.gmra.mrb[4].mxu0 %v12132_v13  ;;  %5324 = vmatmul.mubr.bf16.vlgmr.msra.gmra.mrb[4].mxu1 %v12132_v13 }
 0x215   :  { %5169 = vmatpush1.bf16.msra.mxu0 %v11019_v50  ;;  %5333 = vmatpush1.bf16.msra.mxu1 %v11022_v51  ;;  %v11103_v50 = vld [vmem:[#allocation5 + $0x1150] ss:$48 sps:$4 sm:$0xff]   ;;  %v11106_v51 = vld [vmem:[#allocation5 + $0x1158] ss:$48 sps:$4 sm:$0xff]  }
 0x216   :  { %5170 = vmatprep.subr.bf16.mxu0 %v11027_v52  ;;  %5334 = vmatprep.subr.bf16.mxu1 %v11030_v53  ;;  %v11111_v52 = vld [vmem:[#allocation5 + $0x11b4] ss:$48 sps:$4 sm:$0xff]   ;;  %v11114_v53 = vld [vmem:[#allocation5 + $0x11bc] ss:$48 sps:$4 sm:$0xff]  }
 0x217   :  { %5200 = vmatprep.mubr.bf16.mxu0 %v12134_v17  ;;  %5364 = vmatprep.mubr.bf16.mxu1 %v12134_v17 }
 0x219   :  { %5171 = vmatpush1.bf16.msra.mxu0 %v11025_v54  ;;  %5335 = vmatpush1.bf16.msra.mxu1 %v11028_v55  ;;  %v11109_v54 = vld [vmem:[#allocation5 + $0x11b0] ss:$48 sps:$4 sm:$0xff]   ;;  %v11112_v55 = vld [vmem:[#allocation5 + $0x11b8] ss:$48 sps:$4 sm:$0xff]  }
 0x21a   :  { %5172 = vmatprep.subr.bf16.mxu0 %v11033_v56  ;;  %5336 = vmatprep.subr.bf16.mxu1 %v11036_v57  ;;  %v11117_v56 = vld [vmem:[#allocation5 + $0x1214] ss:$48 sps:$4 sm:$0xff]   ;;  %v11120_v57 = vld [vmem:[#allocation5 + $0x121c] ss:$48 sps:$4 sm:$0xff]  }
 0x21d   :  { %5173 = vmatpush1.bf16.msra.mxu0 %v11031_v58  ;;  %5337 = vmatpush1.bf16.msra.mxu1 %v11034_v59  ;;  %v11115_v58 = vld [vmem:[#allocation5 + $0x1210] ss:$48 sps:$4 sm:$0xff]   ;;  %v11118_v59 = vld [vmem:[#allocation5 + $0x1218] ss:$48 sps:$4 sm:$0xff]  }
 0x21e   :  { %5174 = vmatprep.subr.bf16.mxu0 %v11039_v60  ;;  %5338 = vmatprep.subr.bf16.mxu1 %v11042_v61  ;;  %v11123_v60 = vld [vmem:[#allocation5 + $0x1274] ss:$48 sps:$4 sm:$0xff]   ;;  %v11126_v61 = vld [vmem:[#allocation5 + $0x127c] ss:$48 sps:$4 sm:$0xff]  }
 0x221   :  { %5175 = vmatpush1.bf16.msra.mxu0 %v11037_v62  ;;  %5339 = vmatpush1.bf16.msra.mxu1 %v11040_v63  ;;  %v11121_v62 = vld [vmem:[#allocation5 + $0x1270] ss:$48 sps:$4 sm:$0xff]   ;;  %v11124_v63 = vld [vmem:[#allocation5 + $0x1278] ss:$48 sps:$4 sm:$0xff]  }
 0x222   :  { %5176 = vmatprep.subr.bf16.mxu0 %v11045_v0  ;;  %5340 = vmatprep.subr.bf16.mxu1 %v11048_v1  ;;  %v11129_v0 = vld [vmem:[#allocation5 + $0x12d4] ss:$48 sps:$4 sm:$0xff]   ;;  %v11132_v1 = vld [vmem:[#allocation5 + $0x12dc] ss:$48 sps:$4 sm:$0xff]  }
 0x225   :  { %5177 = vmatpush1.bf16.msra.mxu0 %v11043_v2  ;;  %5341 = vmatpush1.bf16.msra.mxu1 %v11046_v3  ;;  %v11127_v2 = vld [vmem:[#allocation5 + $0x12d0] ss:$48 sps:$4 sm:$0xff]   ;;  %v11130_v3 = vld [vmem:[#allocation5 + $0x12d8] ss:$48 sps:$4 sm:$0xff]  }
 0x226   :  { %5178 = vmatprep.subr.bf16.mxu0 %v11051_v4  ;;  %5342 = vmatprep.subr.bf16.mxu1 %v11054_v6  ;;  %v11135_v4 = vld [vmem:[#allocation5 + $0x1334] ss:$48 sps:$4 sm:$0xff]   ;;  %v11138_v6 = vld [vmem:[#allocation5 + $0x133c] ss:$48 sps:$4 sm:$0xff]  }
 0x229   :  { %5179 = vmatpush1.bf16.msra.mxu0 %v11049_v7  ;;  %5343 = vmatpush1.bf16.msra.mxu1 %v11052_v8  ;;  %v11133_v7 = vld [vmem:[#allocation5 + $0x1330] ss:$48 sps:$4 sm:$0xff]   ;;  %v11136_v8 = vld [vmem:[#allocation5 + $0x1338] ss:$48 sps:$4 sm:$0xff]  }
 0x22a   :  { %5180 = vmatprep.subr.bf16.mxu0 %v11057_v9  ;;  %5344 = vmatprep.subr.bf16.mxu1 %v11060_v10  ;;  %v11141_v9 = vld [vmem:[#allocation5 + $0x1394] ss:$48 sps:$4 sm:$0xff]   ;;  %v11144_v10 = vld [vmem:[#allocation5 + $0x139c] ss:$48 sps:$4 sm:$0xff]  }
 0x22d   :  { %5181 = vmatpush1.bf16.msra.mxu0 %v11055_v11  ;;  %5345 = vmatpush1.bf16.msra.mxu1 %v11058_v12  ;;  %v11139_v11 = vld [vmem:[#allocation5 + $0x1390] ss:$48 sps:$4 sm:$0xff]   ;;  %v11142_v12 = vld [vmem:[#allocation5 + $0x1398] ss:$48 sps:$4 sm:$0xff]  }
 0x22e   :  { %5182 = vmatprep.subr.bf16.mxu0 %v11063_v14  ;;  %5346 = vmatprep.subr.bf16.mxu1 %v11066_v15  ;;  %v11147_v14 = vld [vmem:[#allocation5 + $0x13f4] ss:$48 sps:$4 sm:$0xff]   ;;  %v11150_v15 = vld [vmem:[#allocation5 + $0x13fc] ss:$48 sps:$4 sm:$0xff]  }
 0x231   :  { %5183 = vmatpush1.bf16.msra.mxu0 %v11061_v16  ;;  %5347 = vmatpush1.bf16.msra.mxu1 %v11064_v18  ;;  %v11145_v16 = vld [vmem:[#allocation5 + $0x13f0] ss:$48 sps:$4 sm:$0xff]   ;;  %v11148_v18 = vld [vmem:[#allocation5 + $0x13f8] ss:$48 sps:$4 sm:$0xff]  }
 0x232   :  { %5184 = vmatprep.subr.bf16.mxu0 %v11069_v19  ;;  %5348 = vmatprep.subr.bf16.mxu1 %v11072_v20  ;;  %v11153_v19 = vld [vmem:[#allocation5 + $0x1454] ss:$48 sps:$4 sm:$0xff]   ;;  %v11156_v20 = vld [vmem:[#allocation5 + $0x145c] ss:$48 sps:$4 sm:$0xff]  }
 0x235   :  { %5185 = vmatpush1.bf16.msra.mxu0 %v11067_v21  ;;  %5349 = vmatpush1.bf16.msra.mxu1 %v11070_v23 }
 0x236   :  { %5186 = vmatprep.subr.bf16.mxu0 %v11075_v24  ;;  %5350 = vmatprep.subr.bf16.mxu1 %v11078_v25 }
 0x239   :  { %5187 = vmatpush1.bf16.msra.mxu0 %v11073_v27  ;;  %5351 = vmatpush1.bf16.msra.mxu1 %v11076_v28 }
 0x23a   :  { %5188 = vmatprep.subr.bf16.mxu0 %v11081_v29  ;;  %5352 = vmatprep.subr.bf16.mxu1 %v11084_v30  ;;  %v11151_v30 = vld [vmem:[#allocation5 + $0x1450] ss:$48 sps:$4 sm:$0xff]  }
 0x23d   :  { %5189 = vmatpush1.bf16.msra.mxu0 %v11079_v33  ;;  %5353 = vmatpush1.bf16.msra.mxu1 %v11082_v34  ;;  %v11154_v33 = vld [vmem:[#allocation5 + $0x1458] ss:$48 sps:$4 sm:$0xff]  }
 0x23e   :  { %5190 = vmatprep.subr.bf16.mxu0 %v11087_v35  ;;  %5354 = vmatprep.subr.bf16.mxu1 %v11090_v36  ;;  %v11159_v36 = vld [vmem:[#allocation5 + $0x14b4] ss:$48 sps:$4 sm:$0xff]  }
 0x241   :  { %5191 = vmatpush1.bf16.msra.mxu0 %v11085_v37  ;;  %5355 = vmatpush1.bf16.msra.mxu1 %v11088_v38  ;;  %v11162_v37 = vld [vmem:[#allocation5 + $0x14bc] ss:$48 sps:$4 sm:$0xff]   ;;  %v11157_v38 = vld [vmem:[#allocation5 + $0x14b0] ss:$48 sps:$4 sm:$0xff]  }
 0x242   :  { %5192 = vmatprep.subr.bf16.mxu0 %v11093_v39  ;;  %5356 = vmatprep.subr.bf16.mxu1 %v11096_v40  ;;  %v11160_v39 = vld [vmem:[#allocation5 + $0x14b8] ss:$48 sps:$4 sm:$0xff]   ;;  %v11165_v40 = vld [vmem:[#allocation5 + $0x1514] ss:$48 sps:$4 sm:$0xff]  }
 0x245   :  { %5193 = vmatpush1.bf16.msra.mxu0 %v11091_v41  ;;  %5357 = vmatpush1.bf16.msra.mxu1 %v11094_v42  ;;  %v11168_v41 = vld [vmem:[#allocation5 + $0x151c] ss:$48 sps:$4 sm:$0xff]   ;;  %v11163_v42 = vld [vmem:[#allocation5 + $0x1510] ss:$48 sps:$4 sm:$0xff]  }
 0x246   :  { %5194 = vmatprep.subr.bf16.mxu0 %v11099_v43  ;;  %5358 = vmatprep.subr.bf16.mxu1 %v11102_v44  ;;  %v11166_v43 = vld [vmem:[#allocation5 + $0x1518] ss:$48 sps:$4 sm:$0xff]   ;;  %v11171_v44 = vld [vmem:[#allocation5 + $0x1574] ss:$48 sps:$4 sm:$0xff]  }
 0x249   :  { %5195 = vmatpush1.bf16.msra.mxu0 %v11097_v45  ;;  %5359 = vmatpush1.bf16.msra.mxu1 %v11100_v46  ;;  %v11174_v45 = vld [vmem:[#allocation5 + $0x157c] ss:$48 sps:$4 sm:$0xff]   ;;  %v11169_v46 = vld [vmem:[#allocation5 + $0x1570] ss:$48 sps:$4 sm:$0xff]  }
 0x24a   :  { %5196 = vmatprep.subr.bf16.mxu0 %v11105_v47  ;;  %5360 = vmatprep.subr.bf16.mxu1 %v11108_v49  ;;  %v11172_v47 = vld [vmem:[#allocation5 + $0x1578] ss:$48 sps:$4 sm:$0xff]   ;;  %v11177_v49 = vld [vmem:[#allocation5 + $0x15d4] ss:$48 sps:$4 sm:$0xff]  }
 0x24d   :  { %5197 = vmatpush1.bf16.msra.mxu0 %v11103_v50  ;;  %5361 = vmatpush1.bf16.msra.mxu1 %v11106_v51  ;;  %v11180_v50 = vld [vmem:[#allocation5 + $0x15dc] ss:$48 sps:$4 sm:$0xff]   ;;  %v11175_v51 = vld [vmem:[#allocation5 + $0x15d0] ss:$48 sps:$4 sm:$0xff]  }
 0x24e   :  { %5198 = vmatprep.subr.bf16.mxu0 %v11111_v52  ;;  %5362 = vmatprep.subr.bf16.mxu1 %v11114_v53  ;;  %v11178_v52 = vld [vmem:[#allocation5 + $0x15d8] ss:$48 sps:$4 sm:$0xff]   ;;  %v11183_v53 = vld [vmem:[#allocation5 + $0x1634] ss:$48 sps:$4 sm:$0xff]  }
 0x251   :  { %5199 = vmatpush1.bf16.msra.mxu0 %v11109_v54  ;;  %5363 = vmatpush1.bf16.msra.mxu1 %v11112_v55  ;;  %v11186_v54 = vld [vmem:[#allocation5 + $0x163c] ss:$48 sps:$4 sm:$0xff]   ;;  %v11181_v55 = vld [vmem:[#allocation5 + $0x1630] ss:$48 sps:$4 sm:$0xff]  }
 0x252   :  { %5209 = vmatprep.subr.bf16.mxu0 %v11117_v56  ;;  %5373 = vmatprep.subr.bf16.mxu1 %v11120_v57  ;;  %v11184_v56 = vld [vmem:[#allocation5 + $0x1638] ss:$48 sps:$4 sm:$0xff]   ;;  %v11189_v57 = vld [vmem:[#allocation5 + $0x1694] ss:$48 sps:$4 sm:$0xff]  }
 0x254   :  { %5201 = vmatmul.mubr.bf16.vlgmr.msra.gmra.mrb[4].mxu0 %v12140_v22  ;;  %5365 = vmatmul.mubr.bf16.vlgmr.msra.gmra.mrb[4].mxu1 %v12140_v22 }
 0x255   :  { %5210 = vmatpush1.bf16.msra.mxu0 %v11115_v58  ;;  %5374 = vmatpush1.bf16.msra.mxu1 %v11118_v59  ;;  %v11192_v58 = vld [vmem:[#allocation5 + $0x169c] ss:$48 sps:$4 sm:$0xff]   ;;  %v11187_v59 = vld [vmem:[#allocation5 + $0x1690] ss:$48 sps:$4 sm:$0xff]  }
 0x256   :  { %5211 = vmatprep.subr.bf16.mxu0 %v11123_v60  ;;  %5375 = vmatprep.subr.bf16.mxu1 %v11126_v61  ;;  %v11190_v60 = vld [vmem:[#allocation5 + $0x1698] ss:$48 sps:$4 sm:$0xff]   ;;  %v11195_v61 = vld [vmem:[#allocation5 + $0x16f4] ss:$48 sps:$4 sm:$0xff]  }
 0x257   :  { %5241 = vmatprep.mubr.bf16.mxu0 %v12142_v26  ;;  %5405 = vmatprep.mubr.bf16.mxu1 %v12142_v26 }
 0x259   :  { %5212 = vmatpush1.bf16.msra.mxu0 %v11121_v62  ;;  %5376 = vmatpush1.bf16.msra.mxu1 %v11124_v63  ;;  %v11198_v62 = vld [vmem:[#allocation5 + $0x16fc] ss:$48 sps:$4 sm:$0xff]   ;;  %v11193_v63 = vld [vmem:[#allocation5 + $0x16f0] ss:$48 sps:$4 sm:$0xff]  }
 0x25a   :  { %5213 = vmatprep.subr.bf16.mxu0 %v11129_v0  ;;  %5377 = vmatprep.subr.bf16.mxu1 %v11132_v1  ;;  %v11196_v0 = vld [vmem:[#allocation5 + $0x16f8] ss:$48 sps:$4 sm:$0xff]   ;;  %v11201_v1 = vld [vmem:[#allocation5 + $0x1754] ss:$48 sps:$4 sm:$0xff]  }
 0x25d   :  { %5214 = vmatpush1.bf16.msra.mxu0 %v11127_v2  ;;  %5378 = vmatpush1.bf16.msra.mxu1 %v11130_v3  ;;  %v11204_v2 = vld [vmem:[#allocation5 + $0x175c] ss:$48 sps:$4 sm:$0xff]   ;;  %v11199_v3 = vld [vmem:[#allocation5 + $0x1750] ss:$48 sps:$4 sm:$0xff]  }
 0x25e   :  { %5215 = vmatprep.subr.bf16.mxu0 %v11135_v4  ;;  %5379 = vmatprep.subr.bf16.mxu1 %v11138_v6  ;;  %v11202_v4 = vld [vmem:[#allocation5 + $0x1758] ss:$48 sps:$4 sm:$0xff]   ;;  %v11207_v6 = vld [vmem:[#allocation5 + $0x17b4] ss:$48 sps:$4 sm:$0xff]  }
 0x261   :  { %5216 = vmatpush1.bf16.msra.mxu0 %v11133_v7  ;;  %5380 = vmatpush1.bf16.msra.mxu1 %v11136_v8  ;;  %v11210_v7 = vld [vmem:[#allocation5 + $0x17bc] ss:$48 sps:$4 sm:$0xff]   ;;  %v11205_v8 = vld [vmem:[#allocation5 + $0x17b0] ss:$48 sps:$4 sm:$0xff]  }
 0x262   :  { %5217 = vmatprep.subr.bf16.mxu0 %v11141_v9  ;;  %5381 = vmatprep.subr.bf16.mxu1 %v11144_v10  ;;  %v11208_v9 = vld [vmem:[#allocation5 + $0x17b8] ss:$48 sps:$4 sm:$0xff]   ;;  %v11213_v10 = vld [vmem:[#allocation5 + $0x24] ss:$48 sps:$4 sm:$0xff]  }
 0x265   :  { %5218 = vmatpush1.bf16.msra.mxu0 %v11139_v11  ;;  %5382 = vmatpush1.bf16.msra.mxu1 %v11142_v12  ;;  %v11216_v11 = vld [vmem:[#allocation5 + $0x2c] ss:$48 sps:$4 sm:$0xff]   ;;  %v11211_v12 = vld [vmem:[#allocation5 + $0x20] ss:$48 sps:$4 sm:$0xff]  }
 0x266   :  { %5219 = vmatprep.subr.bf16.mxu0 %v11147_v14  ;;  %5383 = vmatprep.subr.bf16.mxu1 %v11150_v15  ;;  %v11214_v14 = vld [vmem:[#allocation5 + $0x28] ss:$48 sps:$4 sm:$0xff]   ;;  %v11219_v15 = vld [vmem:[#allocation5 + $0x84] ss:$48 sps:$4 sm:$0xff]  }
 0x267   :  { %v12166_v21 = vpop.f32.mrb[0].mxu0  ;;  %v12168_v23 = vpop.f32.mrb[0].mxu1 }
 0x268   :  { %v12170_v24 = vpop.f32.mrb[1].mxu0  ;;  %v12172_v25 = vpop.f32.mrb[1].mxu1 }
 0x269   :  { %v5742_v27 = vmax.f32 %v12166_v21, %v12172_v25  ;;  %v4919_v28 = vpop.f32.mrb[2].mxu0  ;;  %v5083_v29 = vpop.f32.mrb[2].mxu1  ;;  %5220 = vmatpush1.bf16.msra.mxu0 %v11145_v16  ;;  %5384 = vmatpush1.bf16.msra.mxu1 %v11148_v18  ;;  %v11222_v16 = vld [vmem:[#allocation5 + $0x8c] ss:$48 sps:$4 sm:$0xff]   ;;  %v11217_v18 = vld [vmem:[#allocation5 + $0x80] ss:$48 sps:$4 sm:$0xff]  }
 0x26a   :  { %v4920_v34 = vpop.f32.mrb[3].mxu0  ;;  %v5084_v35 = vpop.f32.mrb[3].mxu1  ;;  %5221 = vmatprep.subr.bf16.mxu0 %v11153_v19  ;;  %5385 = vmatprep.subr.bf16.mxu1 %v11156_v20  ;;  %v11220_v19 = vld [vmem:[#allocation5 + $0x88] ss:$48 sps:$4 sm:$0xff]   ;;  %v11225_v20 = vld [vmem:[#allocation5 + $0xe4] ss:$48 sps:$4 sm:$0xff]  }
 0x26b   :  { %v11228_v28 = vld [vmem:[#allocation5 + $0xec] ss:$48 sps:$4 sm:$0xff]   ;;  %v11223_v29 = vld [vmem:[#allocation5 + $0xe0] ss:$48 sps:$4 sm:$0xff]   ;;  %v11697_v21 = vld [vmem:[#allocation8 + $0x220] ss:$16 sps:$4 sm:$0xff]  }
 0x26c   :  { %v11234_v34 = vld [vmem:[#allocation5 + $0x14c] ss:$48 sps:$4 sm:$0xff]   ;;  %v11229_v35 = vld [vmem:[#allocation5 + $0x140] ss:$48 sps:$4 sm:$0xff]   ;;  %v11705_v25 = vld [vmem:[#allocation8 + $0x244] ss:$16 sps:$4 sm:$0xff]  }
 0x26d   :  { %5222 = vmatpush1.bf16.msra.mxu0 %v11151_v30  ;;  %5386 = vmatpush1.bf16.msra.mxu1 %v11154_v33  ;;  %v11226_v30 = vld [vmem:[#allocation5 + $0xe8] ss:$48 sps:$4 sm:$0xff]   ;;  %v11231_v33 = vld [vmem:[#allocation5 + $0x144] ss:$48 sps:$4 sm:$0xff]  }
 0x26e   :  { %5223 = vmatprep.subr.bf16.mxu0 %v11159_v36  ;;  %5387 = vmatprep.subr.bf16.mxu1 %v11162_v37  ;;  %v11232_v36 = vld [vmem:[#allocation5 + $0x148] ss:$48 sps:$4 sm:$0xff]   ;;  %v11237_v37 = vld [vmem:[#allocation5 + $0x1a4] ss:$48 sps:$4 sm:$0xff]  }
 0x271   :  { %5224 = vmatpush1.bf16.msra.mxu0 %v11157_v38  ;;  %5388 = vmatpush1.bf16.msra.mxu1 %v11160_v39  ;;  %v11240_v38 = vld [vmem:[#allocation5 + $0x1ac] ss:$48 sps:$4 sm:$0xff]   ;;  %v11235_v39 = vld [vmem:[#allocation5 + $0x1a0] ss:$48 sps:$4 sm:$0xff]  }
 0x272   :  { %5225 = vmatprep.subr.bf16.mxu0 %v11165_v40  ;;  %5389 = vmatprep.subr.bf16.mxu1 %v11168_v41  ;;  %v11243_v40 = vld [vmem:[#allocation5 + $0x204] ss:$48 sps:$4 sm:$0xff]   ;;  %v11246_v41 = vld [vmem:[#allocation5 + $0x20c] ss:$48 sps:$4 sm:$0xff]  }
 0x275   :  { %5226 = vmatpush1.bf16.msra.mxu0 %v11163_v42  ;;  %5390 = vmatpush1.bf16.msra.mxu1 %v11166_v43  ;;  %v11241_v42 = vld [vmem:[#allocation5 + $0x200] ss:$48 sps:$4 sm:$0xff]   ;;  %v11244_v43 = vld [vmem:[#allocation5 + $0x208] ss:$48 sps:$4 sm:$0xff]  }
 0x276   :  { %5227 = vmatprep.subr.bf16.mxu0 %v11171_v44  ;;  %5391 = vmatprep.subr.bf16.mxu1 %v11174_v45  ;;  %v11249_v44 = vld [vmem:[#allocation5 + $0x264] ss:$48 sps:$4 sm:$0xff]   ;;  %v11252_v45 = vld [vmem:[#allocation5 + $0x26c] ss:$48 sps:$4 sm:$0xff]  }
 0x279   :  { %5228 = vmatpush1.bf16.msra.mxu0 %v11169_v46  ;;  %5392 = vmatpush1.bf16.msra.mxu1 %v11172_v47  ;;  %v11247_v46 = vld [vmem:[#allocation5 + $0x260] ss:$48 sps:$4 sm:$0xff]   ;;  %v11250_v47 = vld [vmem:[#allocation5 + $0x268] ss:$48 sps:$4 sm:$0xff]  }
 0x27a   :  { %5229 = vmatprep.subr.bf16.mxu0 %v11177_v49  ;;  %5393 = vmatprep.subr.bf16.mxu1 %v11180_v50  ;;  %v11255_v49 = vld [vmem:[#allocation5 + $0x2c4] ss:$48 sps:$4 sm:$0xff]   ;;  %v11258_v50 = vld [vmem:[#allocation5 + $0x2cc] ss:$48 sps:$4 sm:$0xff]  }
 0x27d   :  { %5230 = vmatpush1.bf16.msra.mxu0 %v11175_v51  ;;  %5394 = vmatpush1.bf16.msra.mxu1 %v11178_v52  ;;  %v11253_v51 = vld [vmem:[#allocation5 + $0x2c0] ss:$48 sps:$4 sm:$0xff]   ;;  %v11256_v52 = vld [vmem:[#allocation5 + $0x2c8] ss:$48 sps:$4 sm:$0xff]  }
 0x27e   :  { %5231 = vmatprep.subr.bf16.mxu0 %v11183_v53  ;;  %5395 = vmatprep.subr.bf16.mxu1 %v11186_v54  ;;  %v11261_v53 = vld [vmem:[#allocation5 + $0x324] ss:$48 sps:$4 sm:$0xff]   ;;  %v11264_v54 = vld [vmem:[#allocation5 + $0x32c] ss:$48 sps:$4 sm:$0xff]  }
 0x281   :  { %5232 = vmatpush1.bf16.msra.mxu0 %v11181_v55  ;;  %5396 = vmatpush1.bf16.msra.mxu1 %v11184_v56  ;;  %v11259_v55 = vld [vmem:[#allocation5 + $0x320] ss:$48 sps:$4 sm:$0xff]   ;;  %v11262_v56 = vld [vmem:[#allocation5 + $0x328] ss:$48 sps:$4 sm:$0xff]  }
 0x282   :  { %5233 = vmatprep.subr.bf16.mxu0 %v11189_v57  ;;  %5397 = vmatprep.subr.bf16.mxu1 %v11192_v58  ;;  %v11267_v57 = vld [vmem:[#allocation5 + $0x384] ss:$48 sps:$4 sm:$0xff]   ;;  %v11270_v58 = vld [vmem:[#allocation5 + $0x38c] ss:$48 sps:$4 sm:$0xff]  }
 0x285   :  { %5234 = vmatpush1.bf16.msra.mxu0 %v11187_v59  ;;  %5398 = vmatpush1.bf16.msra.mxu1 %v11190_v60  ;;  %v11265_v59 = vld [vmem:[#allocation5 + $0x380] ss:$48 sps:$4 sm:$0xff]   ;;  %v11268_v60 = vld [vmem:[#allocation5 + $0x388] ss:$48 sps:$4 sm:$0xff]  }
 0x286   :  { %5235 = vmatprep.subr.bf16.mxu0 %v11195_v61  ;;  %5399 = vmatprep.subr.bf16.mxu1 %v11198_v62  ;;  %v11273_v61 = vld [vmem:[#allocation5 + $0x3e4] ss:$48 sps:$4 sm:$0xff]   ;;  %v11276_v62 = vld [vmem:[#allocation5 + $0x3ec] ss:$48 sps:$4 sm:$0xff]  }
 0x289   :  { %5236 = vmatpush1.bf16.msra.mxu0 %v11193_v63  ;;  %5400 = vmatpush1.bf16.msra.mxu1 %v11196_v0  ;;  %v11271_v63 = vld [vmem:[#allocation5 + $0x3e0] ss:$48 sps:$4 sm:$0xff]   ;;  %v11274_v0 = vld [vmem:[#allocation5 + $0x3e8] ss:$48 sps:$4 sm:$0xff]  }
 0x28a   :  { %5237 = vmatprep.subr.bf16.mxu0 %v11201_v1  ;;  %5401 = vmatprep.subr.bf16.mxu1 %v11204_v2  ;;  %v11279_v1 = vld [vmem:[#allocation5 + $0x444] ss:$48 sps:$4 sm:$0xff]   ;;  %v11282_v2 = vld [vmem:[#allocation5 + $0x44c] ss:$48 sps:$4 sm:$0xff]  }
 0x28d   :  { %5238 = vmatpush1.bf16.msra.mxu0 %v11199_v3  ;;  %5402 = vmatpush1.bf16.msra.mxu1 %v11202_v4  ;;  %v11277_v3 = vld [vmem:[#allocation5 + $0x440] ss:$48 sps:$4 sm:$0xff]   ;;  %v11280_v4 = vld [vmem:[#allocation5 + $0x448] ss:$48 sps:$4 sm:$0xff]  }
 0x28e   :  { %5239 = vmatprep.subr.bf16.mxu0 %v11207_v6  ;;  %5403 = vmatprep.subr.bf16.mxu1 %v11210_v7  ;;  %v11285_v6 = vld [vmem:[#allocation5 + $0x4a4] ss:$48 sps:$4 sm:$0xff]   ;;  %v11288_v7 = vld [vmem:[#allocation5 + $0x4ac] ss:$48 sps:$4 sm:$0xff]  }
 0x291   :  { %5240 = vmatpush1.bf16.msra.mxu0 %v11205_v8  ;;  %5404 = vmatpush1.bf16.msra.mxu1 %v11208_v9  ;;  %v11283_v8 = vld [vmem:[#allocation5 + $0x4a0] ss:$48 sps:$4 sm:$0xff]   ;;  %v11286_v9 = vld [vmem:[#allocation5 + $0x4a8] ss:$48 sps:$4 sm:$0xff]  }
 0x292   :  { %5414 = vmatprep.subr.bf16.mxu0 %v11213_v10  ;;  %5578 = vmatprep.subr.bf16.mxu1 %v11216_v11  ;;  %v11291_v10 = vld [vmem:[#allocation5 + $0x504] ss:$48 sps:$4 sm:$0xff]   ;;  %v11294_v11 = vld [vmem:[#allocation5 + $0x50c] ss:$48 sps:$4 sm:$0xff]  }
 0x294   :  { %5242 = vmatmul.mubr.bf16.vlgmr.msra.gmra.mrb[4].mxu0 %v12148_v31  ;;  %5406 = vmatmul.mubr.bf16.vlgmr.msra.gmra.mrb[4].mxu1 %v12148_v31 }
 0x295   :  { %5415 = vmatpush1.bf16.msra.mxu0 %v11211_v12  ;;  %5579 = vmatpush1.bf16.msra.mxu1 %v11214_v14  ;;  %v11289_v12 = vld [vmem:[#allocation5 + $0x500] ss:$48 sps:$4 sm:$0xff]   ;;  %v11292_v14 = vld [vmem:[#allocation5 + $0x508] ss:$48 sps:$4 sm:$0xff]  }
 0x296   :  { %5416 = vmatprep.subr.bf16.mxu0 %v11219_v15  ;;  %5580 = vmatprep.subr.bf16.mxu1 %v11222_v16  ;;  %v11297_v15 = vld [vmem:[#allocation5 + $0x564] ss:$48 sps:$4 sm:$0xff]   ;;  %v11300_v16 = vld [vmem:[#allocation5 + $0x56c] ss:$48 sps:$4 sm:$0xff]  }
 0x297   :  { %5446 = vmatprep.mubr.bf16.mxu0 %v12120_v48  ;;  %5610 = vmatprep.mubr.bf16.mxu1 %v12120_v48  ;;  %v11238_v48 = vld [vmem:[#allocation5 + $0x1a8] ss:$48 sps:$4 sm:$0xff]  }
 0x299   :  { %5417 = vmatpush1.bf16.msra.mxu0 %v11217_v18  ;;  %5581 = vmatpush1.bf16.msra.mxu1 %v11220_v19  ;;  %v11295_v18 = vld [vmem:[#allocation5 + $0x560] ss:$48 sps:$4 sm:$0xff]   ;;  %v11298_v19 = vld [vmem:[#allocation5 + $0x568] ss:$48 sps:$4 sm:$0xff]  }
 0x29a   :  { %5418 = vmatprep.subr.bf16.mxu0 %v11225_v20  ;;  %5582 = vmatprep.subr.bf16.mxu1 %v11228_v28  ;;  %v11303_v20 = vld [vmem:[#allocation5 + $0x5c4] ss:$48 sps:$4 sm:$0xff]   ;;  %v11306_v28 = vld [vmem:[#allocation5 + $0x5cc] ss:$48 sps:$4 sm:$0xff]  }
 0x29d   :  { %5419 = vmatpush1.bf16.msra.mxu0 %v11223_v29  ;;  %5583 = vmatpush1.bf16.msra.mxu1 %v11226_v30  ;;  %v11301_v29 = vld [vmem:[#allocation5 + $0x5c0] ss:$48 sps:$4 sm:$0xff]   ;;  %v11304_v30 = vld [vmem:[#allocation5 + $0x5c8] ss:$48 sps:$4 sm:$0xff]  }
 0x29e   :  { %5420 = vmatprep.subr.bf16.mxu0 %v11231_v33  ;;  %5584 = vmatprep.subr.bf16.mxu1 %v11234_v34  ;;  %v11309_v33 = vld [vmem:[#allocation5 + $0x624] ss:$48 sps:$4 sm:$0xff]   ;;  %v11312_v34 = vld [vmem:[#allocation5 + $0x62c] ss:$48 sps:$4 sm:$0xff]  }
 0x2a1   :  { %5421 = vmatpush1.bf16.msra.mxu0 %v11229_v35  ;;  %5585 = vmatpush1.bf16.msra.mxu1 %v11232_v36  ;;  %v11307_v35 = vld [vmem:[#allocation5 + $0x620] ss:$48 sps:$4 sm:$0xff]   ;;  %v11310_v36 = vld [vmem:[#allocation5 + $0x628] ss:$48 sps:$4 sm:$0xff]  }
 0x2a2   :  { %5422 = vmatprep.subr.bf16.mxu0 %v11237_v37  ;;  %5586 = vmatprep.subr.bf16.mxu1 %v11240_v38  ;;  %v11315_v37 = vld [vmem:[#allocation5 + $0x684] ss:$48 sps:$4 sm:$0xff]   ;;  %v11318_v38 = vld [vmem:[#allocation5 + $0x68c] ss:$48 sps:$4 sm:$0xff]  }
 0x2a5   :  { %5423 = vmatpush1.bf16.msra.mxu0 %v11235_v39  ;;  %5587 = vmatpush1.bf16.msra.mxu1 %v11238_v48  ;;  %v11313_v39 = vld [vmem:[#allocation5 + $0x680] ss:$48 sps:$4 sm:$0xff]   ;;  %v11316_v48 = vld [vmem:[#allocation5 + $0x688] ss:$48 sps:$4 sm:$0xff]  }
 0x2a6   :  { %5424 = vmatprep.subr.bf16.mxu0 %v11243_v40  ;;  %5588 = vmatprep.subr.bf16.mxu1 %v11246_v41  ;;  %v11321_v40 = vld [vmem:[#allocation5 + $0x6e4] ss:$48 sps:$4 sm:$0xff]   ;;  %v11324_v41 = vld [vmem:[#allocation5 + $0x6ec] ss:$48 sps:$4 sm:$0xff]  }
 0x2a9   :  { %5425 = vmatpush1.bf16.msra.mxu0 %v11241_v42  ;;  %5589 = vmatpush1.bf16.msra.mxu1 %v11244_v43  ;;  %v11319_v42 = vld [vmem:[#allocation5 + $0x6e0] ss:$48 sps:$4 sm:$0xff]   ;;  %v11322_v43 = vld [vmem:[#allocation5 + $0x6e8] ss:$48 sps:$4 sm:$0xff]  }
 0x2aa   :  { %5426 = vmatprep.subr.bf16.mxu0 %v11249_v44  ;;  %5590 = vmatprep.subr.bf16.mxu1 %v11252_v45  ;;  %v11327_v44 = vld [vmem:[#allocation5 + $0x744] ss:$48 sps:$4 sm:$0xff]   ;;  %v11325_v45 = vld [vmem:[#allocation5 + $0x740] ss:$48 sps:$4 sm:$0xff]  }
 0x2ad   :  { %5427 = vmatpush1.bf16.msra.mxu0 %v11247_v46  ;;  %5591 = vmatpush1.bf16.msra.mxu1 %v11250_v47  ;;  %v11328_v46 = vld [vmem:[#allocation5 + $0x748] ss:$48 sps:$4 sm:$0xff]   ;;  %v11333_v47 = vld [vmem:[#allocation5 + $0x7a4] ss:$48 sps:$4 sm:$0xff]  }
 0x2ae   :  { %5428 = vmatprep.subr.bf16.mxu0 %v11255_v49  ;;  %5592 = vmatprep.subr.bf16.mxu1 %v11258_v50  ;;  %v11336_v49 = vld [vmem:[#allocation5 + $0x7ac] ss:$48 sps:$4 sm:$0xff]   ;;  %v11331_v50 = vld [vmem:[#allocation5 + $0x7a0] ss:$48 sps:$4 sm:$0xff]  }
 0x2b1   :  { %5429 = vmatpush1.bf16.msra.mxu0 %v11253_v51  ;;  %5593 = vmatpush1.bf16.msra.mxu1 %v11256_v52  ;;  %v11339_v51 = vld [vmem:[#allocation5 + $0x804] ss:$48 sps:$4 sm:$0xff]   ;;  %v11342_v52 = vld [vmem:[#allocation5 + $0x80c] ss:$48 sps:$4 sm:$0xff]  }
 0x2b2   :  { %5430 = vmatprep.subr.bf16.mxu0 %v11261_v53  ;;  %5594 = vmatprep.subr.bf16.mxu1 %v11264_v54  ;;  %v11337_v53 = vld [vmem:[#allocation5 + $0x800] ss:$48 sps:$4 sm:$0xff]   ;;  %v11340_v54 = vld [vmem:[#allocation5 + $0x808] ss:$48 sps:$4 sm:$0xff]  }
 0x2b5   :  { %5431 = vmatpush1.bf16.msra.mxu0 %v11259_v55  ;;  %5595 = vmatpush1.bf16.msra.mxu1 %v11262_v56  ;;  %v11345_v55 = vld [vmem:[#allocation5 + $0x864] ss:$48 sps:$4 sm:$0xff]   ;;  %v11348_v56 = vld [vmem:[#allocation5 + $0x86c] ss:$48 sps:$4 sm:$0xff]  }
 0x2b6   :  { %5432 = vmatprep.subr.bf16.mxu0 %v11267_v57  ;;  %5596 = vmatprep.subr.bf16.mxu1 %v11270_v58  ;;  %v11343_v57 = vld [vmem:[#allocation5 + $0x860] ss:$48 sps:$4 sm:$0xff]   ;;  %v11346_v58 = vld [vmem:[#allocation5 + $0x868] ss:$48 sps:$4 sm:$0xff]  }
 0x2b9   :  { %5433 = vmatpush1.bf16.msra.mxu0 %v11265_v59  ;;  %5597 = vmatpush1.bf16.msra.mxu1 %v11268_v60  ;;  %v11351_v59 = vld [vmem:[#allocation5 + $0x8c4] ss:$48 sps:$4 sm:$0xff]   ;;  %v11354_v60 = vld [vmem:[#allocation5 + $0x8cc] ss:$48 sps:$4 sm:$0xff]  }
 0x2ba   :  { %5434 = vmatprep.subr.bf16.mxu0 %v11273_v61  ;;  %5598 = vmatprep.subr.bf16.mxu1 %v11276_v62  ;;  %v11349_v61 = vld [vmem:[#allocation5 + $0x8c0] ss:$48 sps:$4 sm:$0xff]   ;;  %v11352_v62 = vld [vmem:[#allocation5 + $0x8c8] ss:$48 sps:$4 sm:$0xff]  }
 0x2bd   :  { %5435 = vmatpush1.bf16.msra.mxu0 %v11271_v63  ;;  %5599 = vmatpush1.bf16.msra.mxu1 %v11274_v0  ;;  %v11357_v63 = vld [vmem:[#allocation5 + $0x924] ss:$48 sps:$4 sm:$0xff]   ;;  %v11360_v0 = vld [vmem:[#allocation5 + $0x92c] ss:$48 sps:$4 sm:$0xff]  }
 0x2be   :  { %5436 = vmatprep.subr.bf16.mxu0 %v11279_v1  ;;  %5600 = vmatprep.subr.bf16.mxu1 %v11282_v2  ;;  %v11355_v1 = vld [vmem:[#allocation5 + $0x920] ss:$48 sps:$4 sm:$0xff]   ;;  %v11358_v2 = vld [vmem:[#allocation5 + $0x928] ss:$48 sps:$4 sm:$0xff]  }
 0x2c1   :  { %5437 = vmatpush1.bf16.msra.mxu0 %v11277_v3  ;;  %5601 = vmatpush1.bf16.msra.mxu1 %v11280_v4  ;;  %v11363_v3 = vld [vmem:[#allocation5 + $0x984] ss:$48 sps:$4 sm:$0xff]   ;;  %v11366_v4 = vld [vmem:[#allocation5 + $0x98c] ss:$48 sps:$4 sm:$0xff]  }
 0x2c2   :  { %5438 = vmatprep.subr.bf16.mxu0 %v11285_v6  ;;  %5602 = vmatprep.subr.bf16.mxu1 %v11288_v7  ;;  %v11361_v6 = vld [vmem:[#allocation5 + $0x980] ss:$48 sps:$4 sm:$0xff]   ;;  %v11364_v7 = vld [vmem:[#allocation5 + $0x988] ss:$48 sps:$4 sm:$0xff]  }
 0x2c5   :  { %5439 = vmatpush1.bf16.msra.mxu0 %v11283_v8  ;;  %5603 = vmatpush1.bf16.msra.mxu1 %v11286_v9  ;;  %v11369_v8 = vld [vmem:[#allocation5 + $0x9e4] ss:$48 sps:$4 sm:$0xff]   ;;  %v11372_v9 = vld [vmem:[#allocation5 + $0x9ec] ss:$48 sps:$4 sm:$0xff]  }
 0x2c6   :  { %5440 = vmatprep.subr.bf16.mxu0 %v11291_v10  ;;  %5604 = vmatprep.subr.bf16.mxu1 %v11294_v11  ;;  %v11367_v10 = vld [vmem:[#allocation5 + $0x9e0] ss:$48 sps:$4 sm:$0xff]   ;;  %v11370_v11 = vld [vmem:[#allocation5 + $0x9e8] ss:$48 sps:$4 sm:$0xff]  }
 0x2c9   :  { %5441 = vmatpush1.bf16.msra.mxu0 %v11289_v12  ;;  %5605 = vmatpush1.bf16.msra.mxu1 %v11292_v14  ;;  %v11375_v12 = vld [vmem:[#allocation5 + $0xa44] ss:$48 sps:$4 sm:$0xff]   ;;  %v11378_v14 = vld [vmem:[#allocation5 + $0xa4c] ss:$48 sps:$4 sm:$0xff]  }
 0x2ca   :  { %5442 = vmatprep.subr.bf16.mxu0 %v11297_v15  ;;  %5606 = vmatprep.subr.bf16.mxu1 %v11300_v16  ;;  %v11373_v15 = vld [vmem:[#allocation5 + $0xa40] ss:$48 sps:$4 sm:$0xff]   ;;  %v11376_v16 = vld [vmem:[#allocation5 + $0xa48] ss:$48 sps:$4 sm:$0xff]  }
 0x2cd   :  { %5443 = vmatpush1.bf16.msra.mxu0 %v11295_v18  ;;  %5607 = vmatpush1.bf16.msra.mxu1 %v11298_v19  ;;  %v11381_v18 = vld [vmem:[#allocation5 + $0xaa4] ss:$48 sps:$4 sm:$0xff]   ;;  %v11384_v19 = vld [vmem:[#allocation5 + $0xaac] ss:$48 sps:$4 sm:$0xff]  }
 0x2ce   :  { %5444 = vmatprep.subr.bf16.mxu0 %v11303_v20  ;;  %5608 = vmatprep.subr.bf16.mxu1 %v11306_v28  ;;  %v11379_v20 = vld [vmem:[#allocation5 + $0xaa0] ss:$48 sps:$4 sm:$0xff]   ;;  %v11382_v28 = vld [vmem:[#allocation5 + $0xaa8] ss:$48 sps:$4 sm:$0xff]  }
 0x2d1   :  { %5445 = vmatpush1.bf16.msra.mxu0 %v11301_v29  ;;  %5609 = vmatpush1.bf16.msra.mxu1 %v11304_v30  ;;  %v11387_v29 = vld [vmem:[#allocation5 + $0xb04] ss:$48 sps:$4 sm:$0xff]   ;;  %v11390_v30 = vld [vmem:[#allocation5 + $0xb0c] ss:$48 sps:$4 sm:$0xff]  }
 0x2d2   :  { %5455 = vmatprep.subr.bf16.mxu0 %v11309_v33  ;;  %5619 = vmatprep.subr.bf16.mxu1 %v11312_v34  ;;  %v11385_v33 = vld [vmem:[#allocation5 + $0xb00] ss:$48 sps:$4 sm:$0xff]   ;;  %v11388_v34 = vld [vmem:[#allocation5 + $0xb08] ss:$48 sps:$4 sm:$0xff]  }
 0x2d4   :  { %5447 = vmatmul.mubr.bf16.vlgmr.msra.gmra.mrb[8].mxu0 %v12124_v5  ;;  %5611 = vmatmul.mubr.bf16.vlgmr.msra.gmra.mrb[8].mxu1 %v12124_v5  ;;  %v11330_v5 = vld [vmem:[#allocation5 + $0x74c] ss:$48 sps:$4 sm:$0xff]  }
 0x2d5   :  { %5456 = vmatpush1.bf16.msra.mxu0 %v11307_v35  ;;  %5620 = vmatpush1.bf16.msra.mxu1 %v11310_v36  ;;  %v11393_v35 = vld [vmem:[#allocation5 + $0xb64] ss:$48 sps:$4 sm:$0xff]   ;;  %v11396_v36 = vld [vmem:[#allocation5 + $0xb6c] ss:$48 sps:$4 sm:$0xff]  }
 0x2d6   :  { %5457 = vmatprep.subr.bf16.mxu0 %v11315_v37  ;;  %5621 = vmatprep.subr.bf16.mxu1 %v11318_v38  ;;  %v11391_v37 = vld [vmem:[#allocation5 + $0xb60] ss:$48 sps:$4 sm:$0xff]   ;;  %v11394_v38 = vld [vmem:[#allocation5 + $0xb68] ss:$48 sps:$4 sm:$0xff]  }
 0x2d7   :  { %5487 = vmatprep.mubr.bf16.mxu0 %v12128_v32  ;;  %5651 = vmatprep.mubr.bf16.mxu1 %v12128_v32  ;;  %v11334_v32 = vld [vmem:[#allocation5 + $0x7a8] ss:$48 sps:$4 sm:$0xff]  }
 0x2d9   :  { %5458 = vmatpush1.bf16.msra.mxu0 %v11313_v39  ;;  %5622 = vmatpush1.bf16.msra.mxu1 %v11316_v48  ;;  %v11399_v39 = vld [vmem:[#allocation5 + $0xbc4] ss:$48 sps:$4 sm:$0xff]   ;;  %v11402_v48 = vld [vmem:[#allocation5 + $0xbcc] ss:$48 sps:$4 sm:$0xff]  }
 0x2da   :  { %5459 = vmatprep.subr.bf16.mxu0 %v11321_v40  ;;  %5623 = vmatprep.subr.bf16.mxu1 %v11324_v41  ;;  %v11397_v40 = vld [vmem:[#allocation5 + $0xbc0] ss:$48 sps:$4 sm:$0xff]   ;;  %v11400_v41 = vld [vmem:[#allocation5 + $0xbc8] ss:$48 sps:$4 sm:$0xff]  }
 0x2dd   :  { %5460 = vmatpush1.bf16.msra.mxu0 %v11319_v42  ;;  %5624 = vmatpush1.bf16.msra.mxu1 %v11322_v43  ;;  %v11405_v42 = vld [vmem:[#allocation5 + $0xc24] ss:$48 sps:$4 sm:$0xff]   ;;  %v11408_v43 = vld [vmem:[#allocation5 + $0xc2c] ss:$48 sps:$4 sm:$0xff]  }
 0x2de   :  { %5461 = vmatprep.subr.bf16.mxu0 %v11327_v44  ;;  %5625 = vmatprep.subr.bf16.mxu1 %v11330_v5  ;;  %v11403_v44 = vld [vmem:[#allocation5 + $0xc20] ss:$48 sps:$4 sm:$0xff]   ;;  %v11406_v5 = vld [vmem:[#allocation5 + $0xc28] ss:$48 sps:$4 sm:$0xff]  }
 0x2e1   :  { %5462 = vmatpush1.bf16.msra.mxu0 %v11325_v45  ;;  %5626 = vmatpush1.bf16.msra.mxu1 %v11328_v46  ;;  %v11411_v45 = vld [vmem:[#allocation5 + $0xc84] ss:$48 sps:$4 sm:$0xff]   ;;  %v11414_v46 = vld [vmem:[#allocation5 + $0xc8c] ss:$48 sps:$4 sm:$0xff]  }
 0x2e2   :  { %5463 = vmatprep.subr.bf16.mxu0 %v11333_v47  ;;  %5627 = vmatprep.subr.bf16.mxu1 %v11336_v49  ;;  %v11409_v47 = vld [vmem:[#allocation5 + $0xc80] ss:$48 sps:$4 sm:$0xff]   ;;  %v11412_v49 = vld [vmem:[#allocation5 + $0xc88] ss:$48 sps:$4 sm:$0xff]  }
 0x2e5   :  { %5464 = vmatpush1.bf16.msra.mxu0 %v11331_v50  ;;  %5628 = vmatpush1.bf16.msra.mxu1 %v11334_v32  ;;  %v11417_v50 = vld [vmem:[#allocation5 + $0xce4] ss:$48 sps:$4 sm:$0xff]   ;;  %v11420_v32 = vld [vmem:[#allocation5 + $0xcec] ss:$48 sps:$4 sm:$0xff]  }
 0x2e6   :  { %5465 = vmatprep.subr.bf16.mxu0 %v11339_v51  ;;  %5629 = vmatprep.subr.bf16.mxu1 %v11342_v52  ;;  %v11415_v51 = vld [vmem:[#allocation5 + $0xce0] ss:$48 sps:$4 sm:$0xff]   ;;  %v11418_v52 = vld [vmem:[#allocation5 + $0xce8] ss:$48 sps:$4 sm:$0xff]  }
 0x2e9   :  { %5466 = vmatpush1.bf16.msra.mxu0 %v11337_v53  ;;  %5630 = vmatpush1.bf16.msra.mxu1 %v11340_v54  ;;  %v11423_v53 = vld [vmem:[#allocation5 + $0xd44] ss:$48 sps:$4 sm:$0xff]   ;;  %v11421_v54 = vld [vmem:[#allocation5 + $0xd40] ss:$48 sps:$4 sm:$0xff]  }
 0x2ea   :  { %5467 = vmatprep.subr.bf16.mxu0 %v11345_v55  ;;  %5631 = vmatprep.subr.bf16.mxu1 %v11348_v56  ;;  %v11424_v55 = vld [vmem:[#allocation5 + $0xd48] ss:$48 sps:$4 sm:$0xff]   ;;  %v11429_v56 = vld [vmem:[#allocation5 + $0xda4] ss:$48 sps:$4 sm:$0xff]  }
 0x2ed   :  { %5468 = vmatpush1.bf16.msra.mxu0 %v11343_v57  ;;  %5632 = vmatpush1.bf16.msra.mxu1 %v11346_v58  ;;  %v11432_v57 = vld [vmem:[#allocation5 + $0xdac] ss:$48 sps:$4 sm:$0xff]   ;;  %v11427_v58 = vld [vmem:[#allocation5 + $0xda0] ss:$48 sps:$4 sm:$0xff]  }
 0x2ee   :  { %5469 = vmatprep.subr.bf16.mxu0 %v11351_v59  ;;  %5633 = vmatprep.subr.bf16.mxu1 %v11354_v60  ;;  %v11435_v59 = vld [vmem:[#allocation5 + $0xe04] ss:$48 sps:$4 sm:$0xff]   ;;  %v11438_v60 = vld [vmem:[#allocation5 + $0xe0c] ss:$48 sps:$4 sm:$0xff]  }
 0x2f1   :  { %5470 = vmatpush1.bf16.msra.mxu0 %v11349_v61  ;;  %5634 = vmatpush1.bf16.msra.mxu1 %v11352_v62  ;;  %v11433_v61 = vld [vmem:[#allocation5 + $0xe00] ss:$48 sps:$4 sm:$0xff]   ;;  %v11436_v62 = vld [vmem:[#allocation5 + $0xe08] ss:$48 sps:$4 sm:$0xff]  }
 0x2f2   :  { %5471 = vmatprep.subr.bf16.mxu0 %v11357_v63  ;;  %5635 = vmatprep.subr.bf16.mxu1 %v11360_v0  ;;  %v11441_v63 = vld [vmem:[#allocation5 + $0xe64] ss:$48 sps:$4 sm:$0xff]   ;;  %v11444_v0 = vld [vmem:[#allocation5 + $0xe6c] ss:$48 sps:$4 sm:$0xff]  }
 0x2f5   :  { %5472 = vmatpush1.bf16.msra.mxu0 %v11355_v1  ;;  %5636 = vmatpush1.bf16.msra.mxu1 %v11358_v2  ;;  %v11439_v1 = vld [vmem:[#allocation5 + $0xe60] ss:$48 sps:$4 sm:$0xff]   ;;  %v11442_v2 = vld [vmem:[#allocation5 + $0xe68] ss:$48 sps:$4 sm:$0xff]  }
 0x2f6   :  { %5473 = vmatprep.subr.bf16.mxu0 %v11363_v3  ;;  %5637 = vmatprep.subr.bf16.mxu1 %v11366_v4  ;;  %v11447_v3 = vld [vmem:[#allocation5 + $0xec4] ss:$48 sps:$4 sm:$0xff]   ;;  %v11450_v4 = vld [vmem:[#allocation5 + $0xecc] ss:$48 sps:$4 sm:$0xff]  }
 0x2f9   :  { %5474 = vmatpush1.bf16.msra.mxu0 %v11361_v6  ;;  %5638 = vmatpush1.bf16.msra.mxu1 %v11364_v7  ;;  %v11445_v6 = vld [vmem:[#allocation5 + $0xec0] ss:$48 sps:$4 sm:$0xff]   ;;  %v11448_v7 = vld [vmem:[#allocation5 + $0xec8] ss:$48 sps:$4 sm:$0xff]  }
 0x2fa   :  { %5475 = vmatprep.subr.bf16.mxu0 %v11369_v8  ;;  %5639 = vmatprep.subr.bf16.mxu1 %v11372_v9  ;;  %v11453_v8 = vld [vmem:[#allocation5 + $0xf24] ss:$48 sps:$4 sm:$0xff]   ;;  %v11456_v9 = vld [vmem:[#allocation5 + $0xf2c] ss:$48 sps:$4 sm:$0xff]  }
 0x2fd   :  { %5476 = vmatpush1.bf16.msra.mxu0 %v11367_v10  ;;  %5640 = vmatpush1.bf16.msra.mxu1 %v11370_v11  ;;  %v11451_v10 = vld [vmem:[#allocation5 + $0xf20] ss:$48 sps:$4 sm:$0xff]   ;;  %v11454_v11 = vld [vmem:[#allocation5 + $0xf28] ss:$48 sps:$4 sm:$0xff]  }
 0x2fe   :  { %5477 = vmatprep.subr.bf16.mxu0 %v11375_v12  ;;  %5641 = vmatprep.subr.bf16.mxu1 %v11378_v14  ;;  %v11459_v12 = vld [vmem:[#allocation5 + $0xf84] ss:$48 sps:$4 sm:$0xff]   ;;  %v11462_v14 = vld [vmem:[#allocation5 + $0xf8c] ss:$48 sps:$4 sm:$0xff]  }
 0x301   :  { %5478 = vmatpush1.bf16.msra.mxu0 %v11373_v15  ;;  %5642 = vmatpush1.bf16.msra.mxu1 %v11376_v16  ;;  %v11457_v15 = vld [vmem:[#allocation5 + $0xf80] ss:$48 sps:$4 sm:$0xff]   ;;  %v11460_v16 = vld [vmem:[#allocation5 + $0xf88] ss:$48 sps:$4 sm:$0xff]  }
 0x302   :  { %5479 = vmatprep.subr.bf16.mxu0 %v11381_v18  ;;  %5643 = vmatprep.subr.bf16.mxu1 %v11384_v19  ;;  %v11465_v18 = vld [vmem:[#allocation5 + $0xfe4] ss:$48 sps:$4 sm:$0xff]   ;;  %v11468_v19 = vld [vmem:[#allocation5 + $0xfec] ss:$48 sps:$4 sm:$0xff]  }
 0x305   :  { %5480 = vmatpush1.bf16.msra.mxu0 %v11379_v20  ;;  %5644 = vmatpush1.bf16.msra.mxu1 %v11382_v28  ;;  %v11463_v20 = vld [vmem:[#allocation5 + $0xfe0] ss:$48 sps:$4 sm:$0xff]   ;;  %v11466_v28 = vld [vmem:[#allocation5 + $0xfe8] ss:$48 sps:$4 sm:$0xff]  }
 0x306   :  { %5481 = vmatprep.subr.bf16.mxu0 %v11387_v29  ;;  %5645 = vmatprep.subr.bf16.mxu1 %v11390_v30  ;;  %v11471_v29 = vld [vmem:[#allocation5 + $0x1044] ss:$48 sps:$4 sm:$0xff]   ;;  %v11474_v30 = vld [vmem:[#allocation5 + $0x104c] ss:$48 sps:$4 sm:$0xff]  }
 0x309   :  { %5482 = vmatpush1.bf16.msra.mxu0 %v11385_v33  ;;  %5646 = vmatpush1.bf16.msra.mxu1 %v11388_v34  ;;  %v11469_v33 = vld [vmem:[#allocation5 + $0x1040] ss:$48 sps:$4 sm:$0xff]   ;;  %v11472_v34 = vld [vmem:[#allocation5 + $0x1048] ss:$48 sps:$4 sm:$0xff]  }
 0x30a   :  { %5483 = vmatprep.subr.bf16.mxu0 %v11393_v35  ;;  %5647 = vmatprep.subr.bf16.mxu1 %v11396_v36  ;;  %v11477_v35 = vld [vmem:[#allocation5 + $0x10a4] ss:$48 sps:$4 sm:$0xff]   ;;  %v11480_v36 = vld [vmem:[#allocation5 + $0x10ac] ss:$48 sps:$4 sm:$0xff]  }
 0x30d   :  { %5484 = vmatpush1.bf16.msra.mxu0 %v11391_v37  ;;  %5648 = vmatpush1.bf16.msra.mxu1 %v11394_v38  ;;  %v11475_v37 = vld [vmem:[#allocation5 + $0x10a0] ss:$48 sps:$4 sm:$0xff]   ;;  %v11478_v38 = vld [vmem:[#allocation5 + $0x10a8] ss:$48 sps:$4 sm:$0xff]  }
 0x30e   :  { %5485 = vmatprep.subr.bf16.mxu0 %v11399_v39  ;;  %5649 = vmatprep.subr.bf16.mxu1 %v11402_v48  ;;  %v11483_v39 = vld [vmem:[#allocation5 + $0x1104] ss:$48 sps:$4 sm:$0xff]   ;;  %v11486_v48 = vld [vmem:[#allocation5 + $0x110c] ss:$48 sps:$4 sm:$0xff]  }
 0x311   :  { %5486 = vmatpush1.bf16.msra.mxu0 %v11397_v40  ;;  %5650 = vmatpush1.bf16.msra.mxu1 %v11400_v41  ;;  %v11481_v40 = vld [vmem:[#allocation5 + $0x1100] ss:$48 sps:$4 sm:$0xff]   ;;  %v11484_v41 = vld [vmem:[#allocation5 + $0x1108] ss:$48 sps:$4 sm:$0xff]  }
 0x312   :  { %5496 = vmatprep.subr.bf16.mxu0 %v11405_v42  ;;  %5660 = vmatprep.subr.bf16.mxu1 %v11408_v43  ;;  %v11489_v42 = vld [vmem:[#allocation5 + $0x1164] ss:$48 sps:$4 sm:$0xff]   ;;  %v11492_v43 = vld [vmem:[#allocation5 + $0x116c] ss:$48 sps:$4 sm:$0xff]  }
 0x314   :  { %5488 = vmatmul.mubr.bf16.vlgmr.msra.gmra.mrb[8].mxu0 %v12132_v13  ;;  %5652 = vmatmul.mubr.bf16.vlgmr.msra.gmra.mrb[8].mxu1 %v12132_v13  ;;  %v11426_v13 = vld [vmem:[#allocation5 + $0xd4c] ss:$48 sps:$4 sm:$0xff]  }
 0x315   :  { %5497 = vmatpush1.bf16.msra.mxu0 %v11403_v44  ;;  %5661 = vmatpush1.bf16.msra.mxu1 %v11406_v5  ;;  %v11487_v44 = vld [vmem:[#allocation5 + $0x1160] ss:$48 sps:$4 sm:$0xff]   ;;  %v11490_v5 = vld [vmem:[#allocation5 + $0x1168] ss:$48 sps:$4 sm:$0xff]  }
 0x316   :  { %5498 = vmatprep.subr.bf16.mxu0 %v11411_v45  ;;  %5662 = vmatprep.subr.bf16.mxu1 %v11414_v46  ;;  %v11495_v45 = vld [vmem:[#allocation5 + $0x11c4] ss:$48 sps:$4 sm:$0xff]   ;;  %v11498_v46 = vld [vmem:[#allocation5 + $0x11cc] ss:$48 sps:$4 sm:$0xff]  }
 0x317   :  { %5528 = vmatprep.mubr.bf16.mxu0 %v12134_v17  ;;  %5692 = vmatprep.mubr.bf16.mxu1 %v12134_v17  ;;  %v11430_v17 = vld [vmem:[#allocation5 + $0xda8] ss:$48 sps:$4 sm:$0xff]  }
 0x319   :  { %5499 = vmatpush1.bf16.msra.mxu0 %v11409_v47  ;;  %5663 = vmatpush1.bf16.msra.mxu1 %v11412_v49  ;;  %v11493_v47 = vld [vmem:[#allocation5 + $0x11c0] ss:$48 sps:$4 sm:$0xff]   ;;  %v11496_v49 = vld [vmem:[#allocation5 + $0x11c8] ss:$48 sps:$4 sm:$0xff]  }
 0x31a   :  { %5500 = vmatprep.subr.bf16.mxu0 %v11417_v50  ;;  %5664 = vmatprep.subr.bf16.mxu1 %v11420_v32  ;;  %v11501_v50 = vld [vmem:[#allocation5 + $0x1224] ss:$48 sps:$4 sm:$0xff]   ;;  %v11504_v32 = vld [vmem:[#allocation5 + $0x122c] ss:$48 sps:$4 sm:$0xff]  }
 0x31d   :  { %5501 = vmatpush1.bf16.msra.mxu0 %v11415_v51  ;;  %5665 = vmatpush1.bf16.msra.mxu1 %v11418_v52  ;;  %v11499_v51 = vld [vmem:[#allocation5 + $0x1220] ss:$48 sps:$4 sm:$0xff]   ;;  %v11502_v52 = vld [vmem:[#allocation5 + $0x1228] ss:$48 sps:$4 sm:$0xff]  }
 0x31e   :  { %5502 = vmatprep.subr.bf16.mxu0 %v11423_v53  ;;  %5666 = vmatprep.subr.bf16.mxu1 %v11426_v13  ;;  %v11507_v53 = vld [vmem:[#allocation5 + $0x1284] ss:$48 sps:$4 sm:$0xff]   ;;  %v11510_v13 = vld [vmem:[#allocation5 + $0x128c] ss:$48 sps:$4 sm:$0xff]  }
 0x321   :  { %5503 = vmatpush1.bf16.msra.mxu0 %v11421_v54  ;;  %5667 = vmatpush1.bf16.msra.mxu1 %v11424_v55  ;;  %v11505_v54 = vld [vmem:[#allocation5 + $0x1280] ss:$48 sps:$4 sm:$0xff]   ;;  %v11508_v55 = vld [vmem:[#allocation5 + $0x1288] ss:$48 sps:$4 sm:$0xff]  }
 0x322   :  { %5504 = vmatprep.subr.bf16.mxu0 %v11429_v56  ;;  %5668 = vmatprep.subr.bf16.mxu1 %v11432_v57  ;;  %v11513_v56 = vld [vmem:[#allocation5 + $0x12e4] ss:$48 sps:$4 sm:$0xff]   ;;  %v11516_v57 = vld [vmem:[#allocation5 + $0x12ec] ss:$48 sps:$4 sm:$0xff]  }
 0x325   :  { %5505 = vmatpush1.bf16.msra.mxu0 %v11427_v58  ;;  %5669 = vmatpush1.bf16.msra.mxu1 %v11430_v17  ;;  %v11511_v58 = vld [vmem:[#allocation5 + $0x12e0] ss:$48 sps:$4 sm:$0xff]   ;;  %v11514_v17 = vld [vmem:[#allocation5 + $0x12e8] ss:$48 sps:$4 sm:$0xff]  }
 0x326   :  { %5506 = vmatprep.subr.bf16.mxu0 %v11435_v59  ;;  %5670 = vmatprep.subr.bf16.mxu1 %v11438_v60  ;;  %v11519_v59 = vld [vmem:[#allocation5 + $0x1344] ss:$48 sps:$4 sm:$0xff]   ;;  %v11517_v60 = vld [vmem:[#allocation5 + $0x1340] ss:$48 sps:$4 sm:$0xff]  }
 0x329   :  { %5507 = vmatpush1.bf16.msra.mxu0 %v11433_v61  ;;  %5671 = vmatpush1.bf16.msra.mxu1 %v11436_v62  ;;  %v11520_v61 = vld [vmem:[#allocation5 + $0x1348] ss:$48 sps:$4 sm:$0xff]   ;;  %v11525_v62 = vld [vmem:[#allocation5 + $0x13a4] ss:$48 sps:$4 sm:$0xff]  }
 0x32a   :  { %5508 = vmatprep.subr.bf16.mxu0 %v11441_v63  ;;  %5672 = vmatprep.subr.bf16.mxu1 %v11444_v0  ;;  %v11528_v63 = vld [vmem:[#allocation5 + $0x13ac] ss:$48 sps:$4 sm:$0xff]   ;;  %v11523_v0 = vld [vmem:[#allocation5 + $0x13a0] ss:$48 sps:$4 sm:$0xff]  }
 0x32d   :  { %5509 = vmatpush1.bf16.msra.mxu0 %v11439_v1  ;;  %5673 = vmatpush1.bf16.msra.mxu1 %v11442_v2  ;;  %v11531_v1 = vld [vmem:[#allocation5 + $0x1404] ss:$48 sps:$4 sm:$0xff]   ;;  %v11534_v2 = vld [vmem:[#allocation5 + $0x140c] ss:$48 sps:$4 sm:$0xff]  }
 0x32e   :  { %5510 = vmatprep.subr.bf16.mxu0 %v11447_v3  ;;  %5674 = vmatprep.subr.bf16.mxu1 %v11450_v4  ;;  %v11529_v3 = vld [vmem:[#allocation5 + $0x1400] ss:$48 sps:$4 sm:$0xff]   ;;  %v11532_v4 = vld [vmem:[#allocation5 + $0x1408] ss:$48 sps:$4 sm:$0xff]  }
 0x331   :  { %5511 = vmatpush1.bf16.msra.mxu0 %v11445_v6  ;;  %5675 = vmatpush1.bf16.msra.mxu1 %v11448_v7  ;;  %v11537_v6 = vld [vmem:[#allocation5 + $0x1464] ss:$48 sps:$4 sm:$0xff]   ;;  %v11540_v7 = vld [vmem:[#allocation5 + $0x146c] ss:$48 sps:$4 sm:$0xff]  }
 0x332   :  { %5512 = vmatprep.subr.bf16.mxu0 %v11453_v8  ;;  %5676 = vmatprep.subr.bf16.mxu1 %v11456_v9 }
 0x335   :  { %5513 = vmatpush1.bf16.msra.mxu0 %v11451_v10  ;;  %5677 = vmatpush1.bf16.msra.mxu1 %v11454_v11 }
 0x336   :  { %5514 = vmatprep.subr.bf16.mxu0 %v11459_v12  ;;  %5678 = vmatprep.subr.bf16.mxu1 %v11462_v14 }
 0x339   :  { %5515 = vmatpush1.bf16.msra.mxu0 %v11457_v15  ;;  %5679 = vmatpush1.bf16.msra.mxu1 %v11460_v16 }
 0x33a   :  { %5516 = vmatprep.subr.bf16.mxu0 %v11465_v18  ;;  %5680 = vmatprep.subr.bf16.mxu1 %v11468_v19  ;;  %v11535_v18 = vld [vmem:[#allocation5 + $0x1460] ss:$48 sps:$4 sm:$0xff]   ;;  %v11538_v19 = vld [vmem:[#allocation5 + $0x1468] ss:$48 sps:$4 sm:$0xff]  }
 0x33d   :  { %5517 = vmatpush1.bf16.msra.mxu0 %v11463_v20  ;;  %5681 = vmatpush1.bf16.msra.mxu1 %v11466_v28 }
 0x33e   :  { %5518 = vmatprep.subr.bf16.mxu0 %v11471_v29  ;;  %5682 = vmatprep.subr.bf16.mxu1 %v11474_v30  ;;  %v11543_v29 = vld [vmem:[#allocation5 + $0x14c4] ss:$48 sps:$4 sm:$0xff]   ;;  %v11546_v30 = vld [vmem:[#allocation5 + $0x14cc] ss:$48 sps:$4 sm:$0xff]  }
 0x341   :  { %5519 = vmatpush1.bf16.msra.mxu0 %v11469_v33  ;;  %5683 = vmatpush1.bf16.msra.mxu1 %v11472_v34  ;;  %v11541_v33 = vld [vmem:[#allocation5 + $0x14c0] ss:$48 sps:$4 sm:$0xff]   ;;  %v11544_v34 = vld [vmem:[#allocation5 + $0x14c8] ss:$48 sps:$4 sm:$0xff]  }
 0x342   :  { %5520 = vmatprep.subr.bf16.mxu0 %v11477_v35  ;;  %5684 = vmatprep.subr.bf16.mxu1 %v11480_v36  ;;  %v11549_v35 = vld [vmem:[#allocation5 + $0x1524] ss:$48 sps:$4 sm:$0xff]   ;;  %v11552_v36 = vld [vmem:[#allocation5 + $0x152c] ss:$48 sps:$4 sm:$0xff]  }
 0x345   :  { %5521 = vmatpush1.bf16.msra.mxu0 %v11475_v37  ;;  %5685 = vmatpush1.bf16.msra.mxu1 %v11478_v38  ;;  %v11547_v37 = vld [vmem:[#allocation5 + $0x1520] ss:$48 sps:$4 sm:$0xff]   ;;  %v11550_v38 = vld [vmem:[#allocation5 + $0x1528] ss:$48 sps:$4 sm:$0xff]  }
 0x346   :  { %5522 = vmatprep.subr.bf16.mxu0 %v11483_v39  ;;  %5686 = vmatprep.subr.bf16.mxu1 %v11486_v48  ;;  %v11555_v39 = vld [vmem:[#allocation5 + $0x1584] ss:$48 sps:$4 sm:$0xff]   ;;  %v11558_v48 = vld [vmem:[#allocation5 + $0x158c] ss:$48 sps:$4 sm:$0xff]  }
 0x349   :  { %5523 = vmatpush1.bf16.msra.mxu0 %v11481_v40  ;;  %5687 = vmatpush1.bf16.msra.mxu1 %v11484_v41  ;;  %v11553_v40 = vld [vmem:[#allocation5 + $0x1580] ss:$48 sps:$4 sm:$0xff]   ;;  %v11556_v41 = vld [vmem:[#allocation5 + $0x1588] ss:$48 sps:$4 sm:$0xff]  }
 0x34a   :  { %5524 = vmatprep.subr.bf16.mxu0 %v11489_v42  ;;  %5688 = vmatprep.subr.bf16.mxu1 %v11492_v43  ;;  %v11561_v42 = vld [vmem:[#allocation5 + $0x15e4] ss:$48 sps:$4 sm:$0xff]   ;;  %v11564_v43 = vld [vmem:[#allocation5 + $0x15ec] ss:$48 sps:$4 sm:$0xff]  }
 0x34d   :  { %5525 = vmatpush1.bf16.msra.mxu0 %v11487_v44  ;;  %5689 = vmatpush1.bf16.msra.mxu1 %v11490_v5  ;;  %v11559_v44 = vld [vmem:[#allocation5 + $0x15e0] ss:$48 sps:$4 sm:$0xff]   ;;  %v11562_v5 = vld [vmem:[#allocation5 + $0x15e8] ss:$48 sps:$4 sm:$0xff]  }
 0x34e   :  { %5526 = vmatprep.subr.bf16.mxu0 %v11495_v45  ;;  %5690 = vmatprep.subr.bf16.mxu1 %v11498_v46  ;;  %v11567_v45 = vld [vmem:[#allocation5 + $0x1644] ss:$48 sps:$4 sm:$0xff]   ;;  %v11570_v46 = vld [vmem:[#allocation5 + $0x164c] ss:$48 sps:$4 sm:$0xff]  }
 0x351   :  { %5527 = vmatpush1.bf16.msra.mxu0 %v11493_v47  ;;  %5691 = vmatpush1.bf16.msra.mxu1 %v11496_v49  ;;  %v11565_v47 = vld [vmem:[#allocation5 + $0x1640] ss:$48 sps:$4 sm:$0xff]   ;;  %v11568_v49 = vld [vmem:[#allocation5 + $0x1648] ss:$48 sps:$4 sm:$0xff]  }
 0x352   :  { %5537 = vmatprep.subr.bf16.mxu0 %v11501_v50  ;;  %5701 = vmatprep.subr.bf16.mxu1 %v11504_v32  ;;  %v11573_v50 = vld [vmem:[#allocation5 + $0x16a4] ss:$48 sps:$4 sm:$0xff]   ;;  %v11576_v32 = vld [vmem:[#allocation5 + $0x16ac] ss:$48 sps:$4 sm:$0xff]  }
 0x354   :  { %5529 = vmatmul.mubr.bf16.vlgmr.msra.gmra.mrb[8].mxu0 %v12140_v22  ;;  %5693 = vmatmul.mubr.bf16.vlgmr.msra.gmra.mrb[8].mxu1 %v12140_v22  ;;  %v11522_v22 = vld [vmem:[#allocation5 + $0x134c] ss:$48 sps:$4 sm:$0xff]  }
 0x355   :  { %5538 = vmatpush1.bf16.msra.mxu0 %v11499_v51  ;;  %5702 = vmatpush1.bf16.msra.mxu1 %v11502_v52  ;;  %v11571_v51 = vld [vmem:[#allocation5 + $0x16a0] ss:$48 sps:$4 sm:$0xff]   ;;  %v11574_v52 = vld [vmem:[#allocation5 + $0x16a8] ss:$48 sps:$4 sm:$0xff]  }
 0x356   :  { %5539 = vmatprep.subr.bf16.mxu0 %v11507_v53  ;;  %5703 = vmatprep.subr.bf16.mxu1 %v11510_v13  ;;  %v11579_v53 = vld [vmem:[#allocation5 + $0x1704] ss:$48 sps:$4 sm:$0xff]   ;;  %v11582_v13 = vld [vmem:[#allocation5 + $0x170c] ss:$48 sps:$4 sm:$0xff]  }
 0x357   :  { %5569 = vmatprep.mubr.bf16.mxu0 %v12142_v26  ;;  %5733 = vmatprep.mubr.bf16.mxu1 %v12142_v26  ;;  %v11526_v26 = vld [vmem:[#allocation5 + $0x13a8] ss:$48 sps:$4 sm:$0xff]  }
 0x359   :  { %5540 = vmatpush1.bf16.msra.mxu0 %v11505_v54  ;;  %5704 = vmatpush1.bf16.msra.mxu1 %v11508_v55  ;;  %v11577_v54 = vld [vmem:[#allocation5 + $0x1700] ss:$48 sps:$4 sm:$0xff]   ;;  %v11580_v55 = vld [vmem:[#allocation5 + $0x1708] ss:$48 sps:$4 sm:$0xff]  }
 0x35a   :  { %5541 = vmatprep.subr.bf16.mxu0 %v11513_v56  ;;  %5705 = vmatprep.subr.bf16.mxu1 %v11516_v57  ;;  %v11585_v56 = vld [vmem:[#allocation5 + $0x1764] ss:$48 sps:$4 sm:$0xff]   ;;  %v11588_v57 = vld [vmem:[#allocation5 + $0x176c] ss:$48 sps:$4 sm:$0xff]  }
 0x35d   :  { %5542 = vmatpush1.bf16.msra.mxu0 %v11511_v58  ;;  %5706 = vmatpush1.bf16.msra.mxu1 %v11514_v17  ;;  %v11583_v58 = vld [vmem:[#allocation5 + $0x1760] ss:$48 sps:$4 sm:$0xff]   ;;  %v11586_v17 = vld [vmem:[#allocation5 + $0x1768] ss:$48 sps:$4 sm:$0xff]  }
 0x35e   :  { %5543 = vmatprep.subr.bf16.mxu0 %v11519_v59  ;;  %5707 = vmatprep.subr.bf16.mxu1 %v11522_v22  ;;  %v11591_v59 = vld [vmem:[#allocation5 + $0x17c4] ss:$48 sps:$4 sm:$0xff]   ;;  %v11594_v22 = vld [vmem:[#allocation5 + $0x17cc] ss:$48 sps:$4 sm:$0xff]  }
 0x361   :  { %5544 = vmatpush1.bf16.msra.mxu0 %v11517_v60  ;;  %5708 = vmatpush1.bf16.msra.mxu1 %v11520_v61  ;;  %v11589_v60 = vld [vmem:[#allocation5 + $0x17c0] ss:$48 sps:$4 sm:$0xff]   ;;  %v11592_v61 = vld [vmem:[#allocation5 + $0x17c8] ss:$48 sps:$4 sm:$0xff]  }
 0x362   :  { %5545 = vmatprep.subr.bf16.mxu0 %v11525_v62  ;;  %5709 = vmatprep.subr.bf16.mxu1 %v11528_v63  ;;  %v11597_v62 = vld [vmem:[#allocation8 + $0x4] ss:$16 sps:$4 sm:$0xff]   ;;  %v11600_v63 = vld [vmem:[#allocation8 + $0xc] ss:$16 sps:$4 sm:$0xff]  }
 0x365   :  { %5546 = vmatpush1.bf16.msra.mxu0 %v11523_v0  ;;  %5710 = vmatpush1.bf16.msra.mxu1 %v11526_v26  ;;  %v11595_v0 = vld [vmem:[#allocation8] ss:$16 sps:$4 sm:$0xff]   ;;  %v11598_v26 = vld [vmem:[#allocation8 + $0x8] ss:$16 sps:$4 sm:$0xff]  }
 0x366   :  { %5547 = vmatprep.subr.bf16.mxu0 %v11531_v1  ;;  %5711 = vmatprep.subr.bf16.mxu1 %v11534_v2  ;;  %v11603_v1 = vld [vmem:[#allocation8 + $0x24] ss:$16 sps:$4 sm:$0xff]   ;;  %v11606_v2 = vld [vmem:[#allocation8 + $0x2c] ss:$16 sps:$4 sm:$0xff]  }
 0x367   :  { %v12192_v8 = vpop.f32.mrb[4].mxu0  ;;  %v12194_v9 = vpop.f32.mrb[4].mxu1 }
 0x368   :  { %v5743_v10 = vmax.f32 %v12170_v24, %v12192_v8  ;;  %v12198_v11 = vpop.f32.mrb[5].mxu0  ;;  %v12200_v12 = vpop.f32.mrb[5].mxu1  ;;  %v11699_v8 = vld [vmem:[#allocation8 + $0x224] ss:$16 sps:$4 sm:$0xff]  }
 0x369   :  { %v5744_v14 = vmax.f32 %v12168_v23, %v12198_v11  ;;  %v5247_v15 = vpop.f32.mrb[6].mxu0  ;;  %v5411_v16 = vpop.f32.mrb[6].mxu1  ;;  %5548 = vmatpush1.bf16.msra.mxu0 %v11529_v3  ;;  %5712 = vmatpush1.bf16.msra.mxu1 %v11532_v4  ;;  %v11601_v3 = vld [vmem:[#allocation8 + $0x20] ss:$16 sps:$4 sm:$0xff]   ;;  %v11604_v4 = vld [vmem:[#allocation8 + $0x28] ss:$16 sps:$4 sm:$0xff]  }
 0x36a   :  { %v5248_v20 = vpop.f32.mrb[7].mxu0  ;;  %v5412_v28 = vpop.f32.mrb[7].mxu1  ;;  %5549 = vmatprep.subr.bf16.mxu0 %v11537_v6  ;;  %5713 = vmatprep.subr.bf16.mxu1 %v11540_v7  ;;  %v11609_v6 = vld [vmem:[#allocation8 + $0x44] ss:$16 sps:$4 sm:$0xff]   ;;  %v11612_v7 = vld [vmem:[#allocation8 + $0x4c] ss:$16 sps:$4 sm:$0xff]  }
 0x36b   :  { %v11607_v15 = vld [vmem:[#allocation8 + $0x40] ss:$16 sps:$4 sm:$0xff]   ;;  %v11610_v16 = vld [vmem:[#allocation8 + $0x48] ss:$16 sps:$4 sm:$0xff]   ;;  %v11621_v28 = vld [vmem:[#allocation8 + $0x84] ss:$16 sps:$4 sm:$0xff]  }
 0x36c   :  { %v11613_v20 = vld [vmem:[#allocation8 + $0x60] ss:$16 sps:$4 sm:$0xff]   ;;  %v11700_v23 = vld [vmem:[#allocation8 + $0x228] ss:$16 sps:$4 sm:$0xff]   ;;  %v11961_v11 = vmov 0  }
 0x36d   :  { %5550 = vmatpush1.bf16.msra.mxu0 %v11535_v18  ;;  %5714 = vmatpush1.bf16.msra.mxu1 %v11538_v19  ;;  %v11615_v18 = vld [vmem:[#allocation8 + $0x64] ss:$16 sps:$4 sm:$0xff]   ;;  %v11618_v19 = vld [vmem:[#allocation8 + $0x6c] ss:$16 sps:$4 sm:$0xff]  }
 0x36e   :  { %5551 = vmatprep.subr.bf16.mxu0 %v11543_v29  ;;  %5715 = vmatprep.subr.bf16.mxu1 %v11546_v30  ;;  %v11624_v29 = vld [vmem:[#allocation8 + $0x8c] ss:$16 sps:$4 sm:$0xff]   ;;  %v11619_v30 = vld [vmem:[#allocation8 + $0x80] ss:$16 sps:$4 sm:$0xff]  }
 0x371   :  { %5552 = vmatpush1.bf16.msra.mxu0 %v11541_v33  ;;  %5716 = vmatpush1.bf16.msra.mxu1 %v11544_v34  ;;  %v11622_v33 = vld [vmem:[#allocation8 + $0x88] ss:$16 sps:$4 sm:$0xff]   ;;  %v11627_v34 = vld [vmem:[#allocation8 + $0xa4] ss:$16 sps:$4 sm:$0xff]  }
 0x372   :  { %5553 = vmatprep.subr.bf16.mxu0 %v11549_v35  ;;  %5717 = vmatprep.subr.bf16.mxu1 %v11552_v36  ;;  %v11630_v35 = vld [vmem:[#allocation8 + $0xac] ss:$16 sps:$4 sm:$0xff]   ;;  %v11625_v36 = vld [vmem:[#allocation8 + $0xa0] ss:$16 sps:$4 sm:$0xff]  }
 0x375   :  { %5554 = vmatpush1.bf16.msra.mxu0 %v11547_v37  ;;  %5718 = vmatpush1.bf16.msra.mxu1 %v11550_v38  ;;  %v11628_v37 = vld [vmem:[#allocation8 + $0xa8] ss:$16 sps:$4 sm:$0xff]   ;;  %v11633_v38 = vld [vmem:[#allocation8 + $0xc4] ss:$16 sps:$4 sm:$0xff]  }
 0x376   :  { %5555 = vmatprep.subr.bf16.mxu0 %v11555_v39  ;;  %5719 = vmatprep.subr.bf16.mxu1 %v11558_v48  ;;  %v11636_v39 = vld [vmem:[#allocation8 + $0xcc] ss:$16 sps:$4 sm:$0xff]   ;;  %v11631_v48 = vld [vmem:[#allocation8 + $0xc0] ss:$16 sps:$4 sm:$0xff]  }
 0x379   :  { %5556 = vmatpush1.bf16.msra.mxu0 %v11553_v40  ;;  %5720 = vmatpush1.bf16.msra.mxu1 %v11556_v41  ;;  %v11634_v40 = vld [vmem:[#allocation8 + $0xc8] ss:$16 sps:$4 sm:$0xff]   ;;  %v11639_v41 = vld [vmem:[#allocation8 + $0xe4] ss:$16 sps:$4 sm:$0xff]  }
 0x37a   :  { %5557 = vmatprep.subr.bf16.mxu0 %v11561_v42  ;;  %5721 = vmatprep.subr.bf16.mxu1 %v11564_v43  ;;  %v11642_v42 = vld [vmem:[#allocation8 + $0xec] ss:$16 sps:$4 sm:$0xff]   ;;  %v11637_v43 = vld [vmem:[#allocation8 + $0xe0] ss:$16 sps:$4 sm:$0xff]  }
 0x37d   :  { %5558 = vmatpush1.bf16.msra.mxu0 %v11559_v44  ;;  %5722 = vmatpush1.bf16.msra.mxu1 %v11562_v5  ;;  %v11640_v44 = vld [vmem:[#allocation8 + $0xe8] ss:$16 sps:$4 sm:$0xff]   ;;  %v11645_v5 = vld [vmem:[#allocation8 + $0x104] ss:$16 sps:$4 sm:$0xff]  }
 0x37e   :  { %5559 = vmatprep.subr.bf16.mxu0 %v11567_v45  ;;  %5723 = vmatprep.subr.bf16.mxu1 %v11570_v46  ;;  %v11648_v45 = vld [vmem:[#allocation8 + $0x10c] ss:$16 sps:$4 sm:$0xff]   ;;  %v11643_v46 = vld [vmem:[#allocation8 + $0x100] ss:$16 sps:$4 sm:$0xff]  }
 0x381   :  { %5560 = vmatpush1.bf16.msra.mxu0 %v11565_v47  ;;  %5724 = vmatpush1.bf16.msra.mxu1 %v11568_v49  ;;  %v11646_v47 = vld [vmem:[#allocation8 + $0x108] ss:$16 sps:$4 sm:$0xff]   ;;  %v11651_v49 = vld [vmem:[#allocation8 + $0x124] ss:$16 sps:$4 sm:$0xff]  }
 0x382   :  { %5561 = vmatprep.subr.bf16.mxu0 %v11573_v50  ;;  %5725 = vmatprep.subr.bf16.mxu1 %v11576_v32  ;;  %v11654_v50 = vld [vmem:[#allocation8 + $0x12c] ss:$16 sps:$4 sm:$0xff]   ;;  %v11649_v32 = vld [vmem:[#allocation8 + $0x120] ss:$16 sps:$4 sm:$0xff]  }
 0x385   :  { %5562 = vmatpush1.bf16.msra.mxu0 %v11571_v51  ;;  %5726 = vmatpush1.bf16.msra.mxu1 %v11574_v52  ;;  %v11652_v51 = vld [vmem:[#allocation8 + $0x128] ss:$16 sps:$4 sm:$0xff]   ;;  %v11657_v52 = vld [vmem:[#allocation8 + $0x144] ss:$16 sps:$4 sm:$0xff]  }
 0x386   :  { %5563 = vmatprep.subr.bf16.mxu0 %v11579_v53  ;;  %5727 = vmatprep.subr.bf16.mxu1 %v11582_v13  ;;  %v11660_v53 = vld [vmem:[#allocation8 + $0x14c] ss:$16 sps:$4 sm:$0xff]   ;;  %v11655_v13 = vld [vmem:[#allocation8 + $0x140] ss:$16 sps:$4 sm:$0xff]  }
 0x389   :  { %5564 = vmatpush1.bf16.msra.mxu0 %v11577_v54  ;;  %5728 = vmatpush1.bf16.msra.mxu1 %v11580_v55  ;;  %v11658_v54 = vld [vmem:[#allocation8 + $0x148] ss:$16 sps:$4 sm:$0xff]   ;;  %v11663_v55 = vld [vmem:[#allocation8 + $0x164] ss:$16 sps:$4 sm:$0xff]  }
 0x38a   :  { %5565 = vmatprep.subr.bf16.mxu0 %v11585_v56  ;;  %5729 = vmatprep.subr.bf16.mxu1 %v11588_v57  ;;  %v11666_v56 = vld [vmem:[#allocation8 + $0x16c] ss:$16 sps:$4 sm:$0xff]   ;;  %v11661_v57 = vld [vmem:[#allocation8 + $0x160] ss:$16 sps:$4 sm:$0xff]  }
 0x38d   :  { %5566 = vmatpush1.bf16.msra.mxu0 %v11583_v58  ;;  %5730 = vmatpush1.bf16.msra.mxu1 %v11586_v17  ;;  %v11664_v58 = vld [vmem:[#allocation8 + $0x168] ss:$16 sps:$4 sm:$0xff]   ;;  %v11669_v17 = vld [vmem:[#allocation8 + $0x184] ss:$16 sps:$4 sm:$0xff]  }
 0x38e   :  { %5567 = vmatprep.subr.bf16.mxu0 %v11591_v59  ;;  %5731 = vmatprep.subr.bf16.mxu1 %v11594_v22  ;;  %v11672_v59 = vld [vmem:[#allocation8 + $0x18c] ss:$16 sps:$4 sm:$0xff]   ;;  %v11667_v22 = vld [vmem:[#allocation8 + $0x180] ss:$16 sps:$4 sm:$0xff]  }
 0x391   :  { %5568 = vmatpush1.bf16.msra.mxu0 %v11589_v60  ;;  %5732 = vmatpush1.bf16.msra.mxu1 %v11592_v61  ;;  %v11670_v60 = vld [vmem:[#allocation8 + $0x188] ss:$16 sps:$4 sm:$0xff]   ;;  %v11675_v61 = vld [vmem:[#allocation8 + $0x1a4] ss:$16 sps:$4 sm:$0xff]  }
 0x392   :  { %6353 = vmatprep.subr.bf16.mxu0 %v11597_v62  ;;  %6435 = vmatprep.subr.bf16.mxu1 %v11600_v63  ;;  %v11678_v62 = vld [vmem:[#allocation8 + $0x1ac] ss:$16 sps:$4 sm:$0xff]   ;;  %v11673_v63 = vld [vmem:[#allocation8 + $0x1a0] ss:$16 sps:$4 sm:$0xff]  }
 0x394   :  { %5570 = vmatmul.mubr.bf16.vlgmr.msra.gmra.mrb[8].mxu0 %v12148_v31  ;;  %5734 = vmatmul.mubr.bf16.vlgmr.msra.gmra.mrb[8].mxu1 %v12148_v31  ;;  %v11616_v31 = vld [vmem:[#allocation8 + $0x68] ss:$16 sps:$4 sm:$0xff]  }
 0x395   :  { %6354 = vmatpush1.bf16.msra.mxu0 %v11595_v0  ;;  %6436 = vmatpush1.bf16.msra.mxu1 %v11598_v26  ;;  %v11676_v0 = vld [vmem:[#allocation8 + $0x1a8] ss:$16 sps:$4 sm:$0xff]   ;;  %v11681_v26 = vld [vmem:[#allocation8 + $0x1c4] ss:$16 sps:$4 sm:$0xff]  }
 0x396   :  { %6355 = vmatprep.subr.bf16.mxu0 %v11603_v1  ;;  %6437 = vmatprep.subr.bf16.mxu1 %v11606_v2  ;;  %v11684_v1 = vld [vmem:[#allocation8 + $0x1cc] ss:$16 sps:$4 sm:$0xff]   ;;  %v11679_v2 = vld [vmem:[#allocation8 + $0x1c0] ss:$16 sps:$4 sm:$0xff]  }
 0x399   :  { %6356 = vmatpush1.bf16.msra.mxu0 %v11601_v3  ;;  %6438 = vmatpush1.bf16.msra.mxu1 %v11604_v4  ;;  %v11682_v3 = vld [vmem:[#allocation8 + $0x1c8] ss:$16 sps:$4 sm:$0xff]   ;;  %v11687_v4 = vld [vmem:[#allocation8 + $0x1e4] ss:$16 sps:$4 sm:$0xff]  }
 0x39a   :  { %6357 = vmatprep.subr.bf16.mxu0 %v11609_v6  ;;  %6439 = vmatprep.subr.bf16.mxu1 %v11612_v7  ;;  %v11690_v6 = vld [vmem:[#allocation8 + $0x1ec] ss:$16 sps:$4 sm:$0xff]   ;;  %v11685_v7 = vld [vmem:[#allocation8 + $0x1e0] ss:$16 sps:$4 sm:$0xff]  }
 0x39d   :  { %6358 = vmatpush1.bf16.msra.mxu0 %v11607_v15  ;;  %6440 = vmatpush1.bf16.msra.mxu1 %v11610_v16  ;;  %v11688_v15 = vld [vmem:[#allocation8 + $0x1e8] ss:$16 sps:$4 sm:$0xff]   ;;  %v11693_v16 = vld [vmem:[#allocation8 + $0x204] ss:$16 sps:$4 sm:$0xff]  }
 0x39e   :  { %6359 = vmatprep.subr.bf16.mxu0 %v11615_v18  ;;  %6441 = vmatprep.subr.bf16.mxu1 %v11618_v19  ;;  %v11696_v18 = vld [vmem:[#allocation8 + $0x20c] ss:$16 sps:$4 sm:$0xff]   ;;  %v5753_v19 = vlaneseq }
 0x3a1   :  { %6360 = vmatpush1.bf16.msra.mxu0 %v11613_v20  ;;  %6442 = vmatpush1.bf16.msra.mxu1 %v11616_v31  ;;  %v12206_v20 = vshrl.u32 %v5753_v19, 7 }
 0x3a2   :  { %6361 = vmatprep.subr.bf16.mxu0 %v11621_v28  ;;  %6443 = vmatprep.subr.bf16.mxu1 %v11624_v29  ;;  %v12211_v28 = vld [vmem:[#allocation7] sm:$0x7] }
 0x3a3   :  { %v12209_v31 = vsub.s32 1, %v12206_v20  ;;  %v12214_v29 = vsub.s32 0, %v12206_v20 }
 0x3a5   :  { %6362 = vmatpush1.bf16.msra.mxu0 %v11619_v30  ;;  %6444 = vmatpush1.bf16.msra.mxu1 %v11622_v33 }
 0x3a6   :  { %6363 = vmatprep.subr.bf16.mxu0 %v11627_v34  ;;  %6445 = vmatprep.subr.bf16.mxu1 %v11630_v35  ;;  %v5760_v35 = vrot.slane %v12211_v28, %v12209_v31 }
 0x3a9   :  { %6364 = vmatpush1.bf16.msra.mxu0 %v11625_v36  ;;  %6446 = vmatpush1.bf16.msra.mxu1 %v11628_v37 }
 0x3aa   :  { %6365 = vmatprep.subr.bf16.mxu0 %v11633_v38  ;;  %6447 = vmatprep.subr.bf16.mxu1 %v11636_v39  ;;  %v5756_v39 = vrot.slane %v12211_v28, %v12214_v29 }
 0x3ad   :  { %6366 = vmatpush1.bf16.msra.mxu0 %v11631_v48  ;;  %6448 = vmatpush1.bf16.msra.mxu1 %v11634_v40 }
 0x3ae   :  { %6367 = vmatprep.subr.bf16.mxu0 %v11639_v41  ;;  %6449 = vmatprep.subr.bf16.mxu1 %v11642_v42 }
 0x3b1   :  { %6368 = vmatpush1.bf16.msra.mxu0 %v11637_v43  ;;  %6450 = vmatpush1.bf16.msra.mxu1 %v11640_v44 }
 0x3b2   :  { %6369 = vmatprep.subr.bf16.mxu0 %v11645_v5  ;;  %6451 = vmatprep.subr.bf16.mxu1 %v11648_v45 }
 0x3b5   :  { %6370 = vmatpush1.bf16.msra.mxu0 %v11643_v46  ;;  %6452 = vmatpush1.bf16.msra.mxu1 %v11646_v47 }
 0x3b6   :  { %6371 = vmatprep.subr.bf16.mxu0 %v11651_v49  ;;  %6453 = vmatprep.subr.bf16.mxu1 %v11654_v50  ;;  %v11691_v50 = vld [vmem:[#allocation8 + $0x200] ss:$16 sps:$4 sm:$0xff]  }
 0x3b9   :  { %6372 = vmatpush1.bf16.msra.mxu0 %v11649_v32  ;;  %6454 = vmatpush1.bf16.msra.mxu1 %v11652_v51  ;;  %v11694_v32 = vld [vmem:[#allocation8 + $0x208] ss:$16 sps:$4 sm:$0xff]  }
 0x3ba   :  { %6373 = vmatprep.subr.bf16.mxu0 %v11657_v52  ;;  %6455 = vmatprep.subr.bf16.mxu1 %v11660_v53  ;;  %v11706_v51 = vld [vmem:[#allocation8 + $0x248] ss:$16 sps:$4 sm:$0xff]   ;;  %v11711_v52 = vld [vmem:[#allocation8 + $0x264] ss:$16 sps:$4 sm:$0xff]   ;;  %v11714_v53 = vld [vmem:[#allocation8 + $0x26c] ss:$16 sps:$4 sm:$0xff]  }
 0x3bd   :  { %6374 = vmatpush1.bf16.msra.mxu0 %v11655_v13  ;;  %6456 = vmatpush1.bf16.msra.mxu1 %v11658_v54  ;;  %v11709_v13 = vld [vmem:[#allocation8 + $0x260] ss:$16 sps:$4 sm:$0xff]   ;;  %v11712_v54 = vld [vmem:[#allocation8 + $0x268] ss:$16 sps:$4 sm:$0xff]  }
 0x3be   :  { %6375 = vmatprep.subr.bf16.mxu0 %v11663_v55  ;;  %6457 = vmatprep.subr.bf16.mxu1 %v11666_v56  ;;  %v11717_v55 = vld [vmem:[#allocation8 + $0x284] ss:$16 sps:$4 sm:$0xff]   ;;  %v11720_v56 = vld [vmem:[#allocation8 + $0x28c] ss:$16 sps:$4 sm:$0xff]  }
 0x3c1   :  { %6376 = vmatpush1.bf16.msra.mxu0 %v11661_v57  ;;  %6458 = vmatpush1.bf16.msra.mxu1 %v11664_v58  ;;  %v11715_v57 = vld [vmem:[#allocation8 + $0x280] ss:$16 sps:$4 sm:$0xff]   ;;  %v11718_v58 = vld [vmem:[#allocation8 + $0x288] ss:$16 sps:$4 sm:$0xff]  }
 0x3c2   :  { %6377 = vmatprep.subr.bf16.mxu0 %v11669_v17  ;;  %6459 = vmatprep.subr.bf16.mxu1 %v11672_v59  ;;  %v5763_v17 = vsub.s32 2, %v12206_v20  ;;  %v11723_v59 = vld [vmem:[#allocation8 + $0x2a4] ss:$16 sps:$4 sm:$0xff]  }
 0x3c5   :  { %6378 = vmatpush1.bf16.msra.mxu0 %v11667_v22  ;;  %6460 = vmatpush1.bf16.msra.mxu1 %v11670_v60  ;;  %v11726_v22 = vld [vmem:[#allocation8 + $0x2ac] ss:$16 sps:$4 sm:$0xff]   ;;  %v11721_v60 = vld [vmem:[#allocation8 + $0x2a0] ss:$16 sps:$4 sm:$0xff]  }
 0x3c6   :  { %6379 = vmatprep.subr.bf16.mxu0 %v11675_v61  ;;  %6461 = vmatprep.subr.bf16.mxu1 %v11678_v62  ;;  %v11724_v61 = vld [vmem:[#allocation8 + $0x2a8] ss:$16 sps:$4 sm:$0xff]   ;;  %v5764_v62 = vrot.slane %v12211_v28, %v5763_v17 }
 0x3c9   :  { %6380 = vmatpush1.bf16.msra.mxu0 %v11673_v63  ;;  %6462 = vmatpush1.bf16.msra.mxu1 %v11676_v0  ;;  %v11729_v63 = vld [vmem:[#allocation8 + $0x2c4] ss:$16 sps:$4 sm:$0xff]   ;;  %v11732_v0 = vld [vmem:[#allocation8 + $0x2cc] ss:$16 sps:$4 sm:$0xff]  }
 0x3ca   :  { %6381 = vmatprep.subr.bf16.mxu0 %v11681_v26  ;;  %6463 = vmatprep.subr.bf16.mxu1 %v11684_v1  ;;  %v11727_v26 = vld [vmem:[#allocation8 + $0x2c0] ss:$16 sps:$4 sm:$0xff]   ;;  %v11730_v1 = vld [vmem:[#allocation8 + $0x2c8] ss:$16 sps:$4 sm:$0xff]  }
 0x3cd   :  { %6382 = vmatpush1.bf16.msra.mxu0 %v11679_v2  ;;  %6464 = vmatpush1.bf16.msra.mxu1 %v11682_v3  ;;  %v11735_v3 = vld [vmem:[#allocation8 + $0x2e4] ss:$16 sps:$4 sm:$0xff]  }
 0x3ce   :  { %6383 = vmatprep.subr.bf16.mxu0 %v11687_v4  ;;  %6465 = vmatprep.subr.bf16.mxu1 %v11690_v6  ;;  %v11738_v4 = vld [vmem:[#allocation8 + $0x2ec] ss:$16 sps:$4 sm:$0xff]   ;;  %v11733_v6 = vld [vmem:[#allocation8 + $0x2e0] ss:$16 sps:$4 sm:$0xff]  }
 0x3d1   :  { %6384 = vmatpush1.bf16.msra.mxu0 %v11685_v7  ;;  %6466 = vmatpush1.bf16.msra.mxu1 %v11688_v15  ;;  %v11736_v7 = vld [vmem:[#allocation8 + $0x2e8] ss:$16 sps:$4 sm:$0xff]  }
 0x3d2   :  { %6394 = vmatprep.subr.bf16.mxu0 %v11693_v16  ;;  %6476 = vmatprep.subr.bf16.mxu1 %v11696_v18  ;;  %v6529_v16 = vld [vmem:[%s13353_s6] sm:$0xff]  ;;  %v6530_v18 = vld [vmem:[%s13353_s6 + $0x8] sm:$0xff] }
 0x3d3   :  { %v10286_v19 = vpack.c.bf16 %v6530_v18, %v6529_v16 }
 0x467   :  { %v5571_v30 = vpop.f32.mrb[8].mxu0  ;;  %v5735_v33 = vpop.f32.mrb[8].mxu1 }
 0x468   :  { %v5746_v34 = vmax.f32 %v12200_v12, %v5735_v33  ;;  %v5573_v36 = vpop.f32.mrb[9].mxu0  ;;  %v5737_v37 = vpop.f32.mrb[9].mxu1  ;;  %v6531_v33 = vld [vmem:[%s13353_s6 + $0x10] sm:$0xff] }
 0x469   :  { %v5745_v38 = vmax.f32 %v12194_v9, %v5573_v36  ;;  %v5747_v48 = vmax.f32 %v5571_v30, %v5737_v37  ;;  %v5575_v40 = vpop.f32.mrb[10].mxu0  ;;  %v5739_v41 = vpop.f32.mrb[10].mxu1  ;;  %v11962_v30 = vmov 0.0|0.0   ;;  %v6533_v36 = vld [vmem:[%s13353_s6 + $0x20] sm:$0xff]  ;;  %v6534_v37 = vld [vmem:[%s13353_s6 + $0x28] sm:$0xff] }
 0x46a   :  { %v5749_v42 = vmax.f32 %v5743_v10, %v5746_v34  ;;  %v5576_v43 = vpop.f32.mrb[11].mxu0  ;;  %v5740_v44 = vpop.f32.mrb[11].mxu1  ;;  %v11702_v10 = vld [vmem:[#allocation8 + $0x22c] ss:$16 sps:$4 sm:$0xff]   ;;  %v6532_v34 = vld [vmem:[%s13353_s6 + $0x18] sm:$0xff] }
 0x46b   :  { %v5748_v12 = vmax.f32 %v5742_v27, %v5745_v38  ;;  %v12231_v9 = vmax.f32 %v5744_v14, %v5747_v48  ;;  %v11708_v27 = vld [vmem:[#allocation8 + $0x24c] ss:$16 sps:$4 sm:$0xff]   ;;  %v11703_v14 = vld [vmem:[#allocation8 + $0x240] ss:$16 sps:$4 sm:$0xff]   ;;  %v10292_v38 = vpack.c.bf16 %v6534_v37, %v6533_v36  ;;  %v6536_v48 = vld [vmem:[%s13353_s6 + $0x38] sm:$0xff] }
 0x46c   :  { %v5769_v5 = vadd.f32 %v5760_v35, %v5749_v42  ;;  %v10289_v35 = vpack.c.bf16 %v6532_v34, %v6531_v33  ;;  %v6537_v41 = vld [vmem:[%s13353_s6 + $0x40] sm:$0xff]  ;;  %v6538_v42 = vld [vmem:[%s13353_s6 + $0x48] sm:$0xff]  ;;  %v6539_v44 = vld [vmem:[%s13353_s6 + $0x50] sm:$0xff] }
 0x46d   :  { %v5768_v45 = vadd.f32 %v5756_v39, %v5748_v12  ;;  %v5770_v2 = vadd.f32 %v5764_v62, %v12231_v9  ;;  %v6535_v39 = vld [vmem:[%s13353_s6 + $0x30] sm:$0xff]  ;;  %v10298_v43 = vpack.c.bf16 %v6538_v42, %v6537_v41  ;;  %v6540_v12 = vld [vmem:[%s13353_s6 + $0x58] sm:$0xff] }
 0x46e   :  { %v5772_v46 = vmax.f32 %v5769_v5, 0.0  ;;  %v10295_v40 = vpack.c.bf16 %v6536_v48, %v6535_v39  ;;  %v10301_v9 = vpack.c.bf16 %v6540_v12, %v6539_v44  ;;  %v6541_v5 = vld [vmem:[%s13353_s6 + $0x60] sm:$0xff]  ;;  %v6625_v62 = vld [vmem:[#allocation13 + $0x10] sm:$0x3f] }
 0x46f   :  { %v5771_v47 = vmax.f32 %v5768_v45, 0.0  ;;  %v5773_v15 = vmax.f32 %v5770_v2, 0.0  ;;  %v6542_v45 = vld [vmem:[%s13353_s6 + $0x68] sm:$0xff] }
 0x470   :  { %v5775_v49 = vpack.c.bf16 %v5772_v46, %v5772_v46  ;;  %v10304_v46 = vpack.c.bf16 %v6542_v45, %v6541_v5 }
 0x471   :  { %v5774_v24 = vpack.c.bf16 %v5771_v47, %v5771_v47  ;;  %v5776_v28 = vpack.c.bf16 %v5773_v15, %v5773_v15  ;;  %v6543_v47 = vld [vmem:[%s13353_s6 + $0x70] sm:$0xff] }
 0x472   :  { %6385 = vmatprep.mubr.bf16.mxu0 %v5775_v49  ;;  %6467 = vmatprep.mubr.bf16.mxu1 %v5775_v49  ;;  %v6544_v49 = vld [vmem:[%s13353_s6 + $0x78] sm:$0xff] }
 0x473   :  { %6386 = vmatmul.mubr.bf16.vlgmr.msra.gmra.mrb[12].mxu0 %v5774_v24  ;;  %6468 = vmatmul.mubr.bf16.vlgmr.msra.gmra.mrb[12].mxu1 %v5774_v24  ;;  %v6624_v24 = vld [vmem:[#allocation13 + $0x8] sm:$0x3f] }
 0x474   :  { %6395 = vmatpush1.bf16.msra.mxu0 %v11691_v50  ;;  %6477 = vmatpush1.bf16.msra.mxu1 %v11694_v32  ;;  %v10307_v50 = vpack.c.bf16 %v6544_v49, %v6543_v47  ;;  %v11964_v32 = vmov 0.0  }
 0x475   :  { %6396 = vmatprep.subr.bf16.mxu0 %v11699_v8  ;;  %6478 = vmatprep.subr.bf16.mxu1 %v11702_v10  ;;  %v6623_v8 = vld [vmem:[#allocation13] sm:$0x3f] }
 0x476   :  { %6426 = vmatprep.mubr.bf16.mxu0 %v11961_v11  ;;  %6508 = vmatprep.mubr.bf16.mxu1 %v11961_v11 }
 0x478   :  { %6397 = vmatpush1.bf16.msra.mxu0 %v11697_v21  ;;  %6479 = vmatpush1.bf16.msra.mxu1 %v11700_v23 }
 0x479   :  { %6398 = vmatprep.subr.bf16.mxu0 %v11705_v25  ;;  %6480 = vmatprep.subr.bf16.mxu1 %v11708_v27 }
 0x47c   :  { %6399 = vmatpush1.bf16.msra.mxu0 %v11703_v14  ;;  %6481 = vmatpush1.bf16.msra.mxu1 %v11706_v51 }
 0x47d   :  { %6400 = vmatprep.subr.bf16.mxu0 %v11711_v52  ;;  %6482 = vmatprep.subr.bf16.mxu1 %v11714_v53  ;;  %v10157_v52 = vld [vmem:[#allocation10] ss:$0 sm:$0xff] }
 0x480   :  { %6401 = vmatpush1.bf16.msra.mxu0 %v11709_v13  ;;  %6483 = vmatpush1.bf16.msra.mxu1 %v11712_v54 }
 0x481   :  { %6402 = vmatprep.subr.bf16.mxu0 %v11717_v55  ;;  %6484 = vmatprep.subr.bf16.mxu1 %v11720_v56 }
 0x484   :  { %6403 = vmatpush1.bf16.msra.mxu0 %v11715_v57  ;;  %6485 = vmatpush1.bf16.msra.mxu1 %v11718_v58  ;;  %v6626_v57 = vld [vmem:[#allocation13 + $0x18] sm:$0x3f]  ;;  %v10158_v58 = vld [vmem:[#allocation11] ss:$0 sm:$0xff] }
 0x485   :  { %6404 = vmatprep.subr.bf16.mxu0 %v11723_v59  ;;  %6486 = vmatprep.subr.bf16.mxu1 %v11726_v22 }
 0x488   :  { %6405 = vmatpush1.bf16.msra.mxu0 %v11721_v60  ;;  %6487 = vmatpush1.bf16.msra.mxu1 %v11724_v61 }
 0x489   :  { %6406 = vmatprep.subr.bf16.mxu0 %v11729_v63  ;;  %6488 = vmatprep.subr.bf16.mxu1 %v11732_v0  ;;  %v6627_v63 = vld [vmem:[#allocation14] sm:$0xf] }
 0x48a   :  { %v6632_v0 = vrot.slane %v6627_v63, %v12214_v29  ;;  %v6640_v15 = vrot.slane %v6627_v63, %v5763_v17 }
 0x48c   :  { %6407 = vmatpush1.bf16.msra.mxu0 %v11727_v26  ;;  %6489 = vmatpush1.bf16.msra.mxu1 %v11730_v1  ;;  %v6636_v26 = vrot.slane %v6627_v63, %v12209_v31  ;;  %v6643_v1 = vsub.s32 3, %v12206_v20 }
 0x48d   :  { %6408 = vmatprep.subr.bf16.mxu0 %v11735_v3  ;;  %6490 = vmatprep.subr.bf16.mxu1 %v11738_v4  ;;  %v11965_v3 = vmov 1966171168  }
 0x48e   :  { %v6830_v4 = vunpack.c.l.s4 %v11965_v3  ;;  %v6644_v18 = vrot.slane %v6627_v63, %v6643_v1 }
 0x490   :  { %6409 = vmatpush1.bf16.msra.mxu0 %v11733_v6  ;;  %6491 = vmatpush1.bf16.msra.mxu1 %v11736_v7 }
 0x491   :  { %10285 = vmatprep.subr.bf16.mxu0 %v11962_v30  ;;  %10159 = vmatprep.subr.msk.mxu1 %vm6653_vm1, %v6624_v24  ;;  %v12310_v24 = vcvt.s32.f32 %v12206_v20 }
 0x493   :  { %6427 = vmatmul.mubr.bf16.vlgmr.msra.gmra.mrb[12].mxu0 %v5776_v28  ;;  %6509 = vmatmul.mubr.bf16.vlgmr.msra.gmra.mrb[12].mxu1 %v5776_v28 }
 0x494   :  { %10287 = vmatpush3.bf16.msra.mxu0 %v10286_v19  ;;  %10282 = vmatprep.mubr.msk.f32.mxu0 %vm11963_vm0, %v11964_v32 }
 0x495   :  { %10288 = vmatprep.subr.bf16.mxu0 %v11962_v30  ;;  %6730 = vmatprep.mubr.f32.mxu1 %v11964_v32 }
 0x496   :  { %10160 = vmatpush1.msk.msra.mxu1 %vm6653_vm1, %v6623_v8 }
 0x497   :  { %10162 = vmatprep.subr.msk.mxu1 %vm6653_vm1, %v6626_v57 }
 0x498   :  { %10290 = vmatpush3.bf16.msra.mxu0 %v10289_v35 }
 0x499   :  { %10291 = vmatprep.subr.bf16.mxu0 %v11962_v30 }
 0x49c   :  { %10293 = vmatpush3.bf16.msra.mxu0 %v10292_v38 }
 0x49d   :  { %10294 = vmatprep.subr.bf16.mxu0 %v11962_v30 }
 0x4a0   :  { %10296 = vmatpush3.bf16.msra.mxu0 %v10295_v40 }
 0x4a1   :  { %10297 = vmatprep.subr.bf16.mxu0 %v11962_v30 }
 0x4a4   :  { %10299 = vmatpush3.bf16.msra.mxu0 %v10298_v43 }
 0x4a5   :  { %10300 = vmatprep.subr.bf16.mxu0 %v11962_v30 }
 0x4a8   :  { %10302 = vmatpush3.bf16.msra.mxu0 %v10301_v9  ;;  %v6822_v9 = vadd.s32 8, %v12206_v20 }
 0x4a9   :  { %10303 = vmatprep.subr.bf16.mxu0 %v11962_v30 }
 0x4aa   :  { %v12312_v8 = vcvt.s32.f32 %v6822_v9 }
 0x4ac   :  { %10305 = vmatpush3.bf16.msra.mxu0 %v10304_v46 }
 0x4ad   :  { %10306 = vmatprep.subr.bf16.mxu0 %v11962_v30  ;;  %v6831_v30 = vunpack.c.0.s8 %v6830_v4 }
 0x4af   :  { %v12301_v41 = vsub.s32 %v6831_v30, %v12206_v20 }
 0x4b0   :  { %10308 = vmatpush3.bf16.msra.mxu0 %v10307_v50 }
 0x566   :  { %v6428_v10 = vpop.f32.mrb[12].mxu0  ;;  %v6510_v21 = vpop.f32.mrb[12].mxu1 }
 0x567   :  { %v6430_v23 = vpop.f32.mrb[13].mxu0  ;;  %v6512_v25 = vpop.f32.mrb[13].mxu1 }
 0x568   :  { %v6517_v27 = vmax.f32 %v6428_v10, %v6430_v23  ;;  %v6518_v11 = vmax.f32 %v6510_v21, %v6512_v25  ;;  %v6432_v14 = vpop.f32.mrb[14].mxu0  ;;  %v6514_v51 = vpop.f32.mrb[14].mxu1 }
 0x569   :  { %v6433_v53 = vpop.f32.mrb[15].mxu0  ;;  %v6515_v13 = vpop.f32.mrb[15].mxu1 }
 0x56a   :  { %v6519_v54 = vmax.f32 %v6517_v27, %v6518_v11 }
 0x56c   :  { %v6527_v55 = vadd.f32 %v10157_v52, %v6519_v54 }
 0x56e   :  { %v6528_v56 = vmax.f32 %v6527_v55, 0.0 }
 0x570   :  { %10283 = vmatmul.mubr.f32.vlgmr.msra.gmra.mrb[16].mxu0 %v6528_v56 }
 0x571   :  { %7635 = vmatprep.mubr.f32.mxu0 %v11964_v32 }
 0x643   :  { %v6618_v59 = vpop.f32.mrb[16].mxu0 }
 0x644   :  { %v6619_v22 = vadd.f32 %v10158_v58, %v6618_v59  ;;  %v10284_v60 = vpop.f32.mrb[17].mxu0 }
 0x646   :  { %v6622_v61 = vmax.f32 %v6619_v22, 0.0 }
 0x648   :  { %10161 = vmatmul.mubr.msk.f32.vlgmr.msra.gmra.mrb[16].mxu1 %vm6649_vm2, %v6622_v61 }
 0x649   :  { %10163 = vmatpush1.msk.msra.mxu1 %vm6653_vm1, %v6625_v62  ;;  %6801 = vmatprep.mubr.f32.mxu1 %v11964_v32 }
 0x64c   :  { %10164 = vmatmul.mubr.msk.f32.vlgmr.msra.gmra.mrb[18].mxu1 %vm6649_vm2, %v6622_v61 }
 0x64d   :  { %7498 = vmatprep.mubr.f32.mxu1 %v11964_v32 }
 0x71b   :  { %v6732_v2 = vpop.f32.mrb[16].mxu1 }
 0x71c   :  { %v6733_v6 = vadd.f32 %v6732_v2, %v6632_v0  ;;  %v6734_v7 = vpop.f32.mrb[17].mxu1 }
 0x71d   :  { %v6735_v16 = vadd.f32 %v6734_v7, %v6636_v26 }
 0x71e   :  { %v6808_v19 = vadd.f32 1.0, %v6733_v6 }
 0x71f   :  { %v6809_v28 = vadd.f32 1.0, %v6735_v16  ;;  %v6803_v33 = vpop.f32.mrb[18].mxu1 }
 0x720   :  { %v6810_v34 = vmul.f32 8.0, %v6808_v19  ;;  %v6804_v35 = vadd.f32 %v6803_v33, %v6640_v15  ;;  %v6805_v36 = vpop.f32.mrb[19].mxu1 }
 0x721   :  { %v6811_v37 = vmul.f32 8.0, %v6809_v28  ;;  %v6806_v38 = vadd.f32 %v6805_v36, %v6644_v18 }
 0x722   :  { %v10165_v39 = vadd.f32 -0.5, %v6810_v34  ;;  %v6814_v48 = vadd.f32 1.0, %v6804_v35 }
 0x723   :  { %v10166_v40 = vadd.f32 -0.5, %v6811_v37  ;;  %v6815_v42 = vadd.f32 1.0, %v6806_v38 }
 0x724   :  { %v6816_v43 = vmul.f32 8.0, %v6814_v48 }
 0x725   :  { %v6827_v17 = vcombine.low %v10165_v39, %v10166_v40  ;;  %v6828_v44 = vcombine.high %v10165_v39, %v10166_v40  ;;  %v6817_v12 = vmul.f32 8.0, %v6815_v42 }
 0x726   :  { %v10167_v5 = vadd.f32 -0.5, %v6816_v43 }
 0x727   :  { %v6835_v45 = vrot.slane %v6827_v17, %v12301_v41  ;;  %v10168_v46 = vadd.f32 -0.5, %v6817_v12  ;;  %v12306_v47 = vrot.slane %v6828_v44, %v12301_v41 }
 0x729   :  { %v6843_v49 = vcombine.high %v6835_v45, %v6835_v45  ;;  %v6851_v50 = vrot.slane %v6835_v45, %v12301_v41  ;;  %v7087_v10 = vcombine.low %v10167_v5, %v10168_v46  ;;  %v7088_v21 = vcombine.high %v10167_v5, %v10168_v46 }
 0x72a   :  { %v6844_v27 = vcombine.high %v12306_v47, %v12306_v47 }
 0x72b   :  { %v6865_v23 = vrot.slane %v6843_v49, %v12301_v41  ;;  %v6880_v25 = vrot.slane %v6851_v50, %v12214_v29  ;;  %v7095_v11 = vrot.slane %v7087_v10, %v12301_v41  ;;  %v7102_v14 = vrot.slane %v7088_v21, %v12301_v41 }
 0x72c   :  { %v6884_v51 = vrot.slane %v6851_v50, %v12209_v31  ;;  %v12334_v61 = vrot.slane %v6844_v27, %v12301_v41  ;;  %v12342_v0 = vcombine.high %v6851_v50, %v6851_v50  ;;  %v7345_v27 = vld [vmem:[%s13348_s1] sm:$0xff] }
 0x72d   :  { %v6957_v20 = vsub.f32 %v12310_v24, %v6880_v25  ;;  %v6959_v52 = vsub.f32 %v12312_v8, %v6880_v25  ;;  %v6892_v53 = vrot.slane %v6865_v23, %v12209_v31  ;;  %v6888_v13 = vrot.slane %v6865_v23, %v12214_v29 }
 0x72e   :  { %v7103_v54 = vcombine.high %v7095_v11, %v7095_v11  ;;  %v7104_v55 = vcombine.high %v7102_v14, %v7102_v14  ;;  %v12326_v56 = vrot.slane %v7095_v11, %v12301_v41  ;;  %v12329_v57 = vrot.slane %v7102_v14, %v12301_v41 }
 0x72f   :  { %v6958_v58 = vsub.f32 %v12310_v24, %v6884_v51  ;;  %v6960_v59 = vsub.f32 %v12312_v8, %v6884_v51  ;;  %v6989_v22 = vand.u32 2147483647, %v6957_v20  ;;  %v6991_v60 = vand.u32 2147483647, %v6959_v52 }
 0x730   :  { %v12337_v62 = vrot.slane %v7103_v54, %v12301_v41  ;;  %v12340_v63 = vrot.slane %v7104_v55, %v12301_v41  ;;  %v6962_v4 = vsub.f32 %v12310_v24, %v6892_v53  ;;  %v6964_v6 = vsub.f32 %v12312_v8, %v6892_v53 }
 0x731   :  { %v6990_v26 = vand.u32 2147483647, %v6958_v58  ;;  %v6992_v1 = vand.u32 2147483647, %v6960_v59  ;;  %v7021_v2 = vsub.f32 1.0, %v6989_v22  ;;  %v7023_v3 = vsub.f32 1.0, %v6991_v60 }
 0x732   :  { %v6961_v7 = vsub.f32 %v12310_v24, %v6888_v13  ;;  %v6963_v15 = vsub.f32 %v12312_v8, %v6888_v13  ;;  %v6994_v30 = vand.u32 2147483647, %v6962_v4  ;;  %v6996_v33 = vand.u32 2147483647, %v6964_v6  ;;  %v7353_v60 = vld [vmem:[%s13348_s1 + $0x40] sm:$0xff]  ;;  %v7346_v6 = vld [vmem:[%s13348_s1 + $0x8] sm:$0xff] }
 0x733   :  { %v7022_v16 = vsub.f32 1.0, %v6990_v26  ;;  %v7024_v18 = vsub.f32 1.0, %v6992_v1  ;;  %v7053_v19 = vmax.f32 %v7021_v2, 0.0  ;;  %v7055_v28 = vmax.f32 %v7023_v3, 0.0 }
 0x734   :  { %v6993_v34 = vand.u32 2147483647, %v6961_v7  ;;  %v6875_v35 = vcombine.high %v6865_v23, %v6865_v23  ;;  %v6995_v39 = vand.u32 2147483647, %v6963_v15  ;;  %v7026_v48 = vsub.f32 1.0, %v6994_v30 }
 0x735   :  { %v7054_v36 = vmax.f32 %v7022_v16, 0.0  ;;  %v7056_v37 = vmax.f32 %v7024_v18, 0.0  ;;  %v10311_v38 = vpack.c.bf16 %v7055_v28, %v7053_v19  ;;  %v7028_v40 = vsub.f32 1.0, %v6996_v33 }
 0x736   :  { %v7025_v42 = vsub.f32 1.0, %v6993_v34  ;;  %v6908_v43 = vrot.slane %v6875_v35, %v12209_v31  ;;  %v7027_v44 = vsub.f32 1.0, %v6995_v39  ;;  %v6900_v12 = vrot.slane %v12342_v0, %v12209_v31  ;;  %v7354_v39 = vld [vmem:[%s13348_s1 + $0x48] sm:$0xff] }
 0x737   :  { %v10309_v17 = vpack.c.bf16 %v7056_v37, %v7054_v36  ;;  %v6904_v9 = vrot.slane %v6875_v35, %v12214_v29  ;;  %v7058_v5 = vmax.f32 %v7026_v48, 0.0  ;;  %v7060_v45 = vmax.f32 %v7028_v40, 0.0  ;;  %v7347_v48 = vld [vmem:[%s13348_s1 + $0x10] sm:$0xff] }
 0x738   :  { %v7057_v46 = vmax.f32 %v7025_v42, 0.0  ;;  %v6970_v49 = vsub.f32 %v12310_v24, %v6908_v43  ;;  %v7059_v50 = vmax.f32 %v7027_v44, 0.0  ;;  %v6972_v10 = vsub.f32 %v12312_v8, %v6908_v43 }
 0x739   :  { %10310 = vmatprep.subr.bf16.mxu1 %v10309_v17  ;;  %v6966_v21 = vsub.f32 %v12310_v24, %v6900_v12  ;;  %v6968_v23 = vsub.f32 %v12312_v8, %v6900_v12  ;;  %v10313_v25 = vpack.c.bf16 %v7060_v45, %v7058_v5  ;;  %v6969_v14 = vsub.f32 %v12310_v24, %v6904_v9  ;;  %v7355_v5 = vld [vmem:[%s13348_s1 + $0x50] sm:$0xff]  ;;  %v7348_v45 = vld [vmem:[%s13348_s1 + $0x18] sm:$0xff] }
 0x73a   :  { %10312 = vmatpush1.bf16.msra.mxu1 %v10311_v38  ;;  %v7002_v11 = vand.u32 2147483647, %v6970_v49  ;;  %v6971_v51 = vsub.f32 %v12312_v8, %v6904_v9  ;;  %v10315_v20 = vpack.c.bf16 %v7059_v50, %v7057_v46  ;;  %v7004_v52 = vand.u32 2147483647, %v6972_v10  ;;  %v7356_v10 = vld [vmem:[%s13348_s1 + $0x58] sm:$0xff] }
 0x73b   :  { %v6998_v53 = vand.u32 2147483647, %v6966_v21  ;;  %v7000_v13 = vand.u32 2147483647, %v6968_v23  ;;  %10314 = vmatprep.subr.bf16.mxu0 %v10313_v25  ;;  %10341 = vmatprep.subr.bf16.mxu1 %v10313_v25  ;;  %v7001_v55 = vand.u32 2147483647, %v6969_v14  ;;  %v6924_v59 = vrot.slane %v12334_v61, %v12209_v31 }
 0x73c   :  { %v7034_v54 = vsub.f32 1.0, %v7002_v11  ;;  %v7003_v58 = vand.u32 2147483647, %v6971_v51  ;;  %10316 = vmatpush1.bf16.msra.mxu0 %v10315_v20  ;;  %v7036_v22 = vsub.f32 1.0, %v7004_v52  ;;  %v12385_v40 = vcombine.high %v12334_v61, %v12334_v61 }
 0x73d   :  { %10169 = vmatmul.mubr.msk.f32.vlgmr.msra.gmra.mrb[20].mxu1 %vm7409_vm3, %v7345_v27  ;;  %v7030_v26 = vsub.f32 1.0, %v6998_v53  ;;  %v7032_v1 = vsub.f32 1.0, %v7000_v13  ;;  %v7033_v3 = vsub.f32 1.0, %v7001_v55  ;;  %v6978_v7 = vsub.f32 %v12310_v24, %v6924_v59 }
 0x73e   :  { %v7066_v2 = vmax.f32 %v7034_v54, 0.0  ;;  %10342 = vmatpush1.bf16.msra.mxu1 %v10315_v20  ;;  %7504 = vmatprep.mubr.f32.mxu1 %v11964_v32  ;;  %v7035_v4 = vsub.f32 1.0, %v7003_v58  ;;  %v7068_v15 = vmax.f32 %v7036_v22, 0.0  ;;  %v6980_v19 = vsub.f32 %v12312_v8, %v6924_v59  ;;  %v7357_v20 = vld [vmem:[%s13348_s1 + $0x60] sm:$0xff]  ;;  %v7350_v54 = vld [vmem:[%s13348_s1 + $0x28] sm:$0xff] }
 0x73f   :  { %v7062_v16 = vmax.f32 %v7030_v26, 0.0  ;;  %v7064_v18 = vmax.f32 %v7032_v1, 0.0  ;;  %10177 = vmatmul.mubr.msk.f32.vlgmr.msra.gmra.mrb[18].mxu0 %vm7409_vm3, %v7353_v60  ;;  %v7065_v28 = vmax.f32 %v7033_v3, 0.0  ;;  %v7010_v33 = vand.u32 2147483647, %v6978_v7  ;;  %v7351_v7 = vld [vmem:[%s13348_s1 + $0x30] sm:$0xff] }
 0x740   :  { %v7067_v30 = vmax.f32 %v7035_v4, 0.0  ;;  %v10321_v34 = vpack.c.bf16 %v7068_v15, %v7066_v2  ;;  %v7012_v36 = vand.u32 2147483647, %v6980_v19  ;;  %7641 = vmatprep.mubr.f32.mxu0 %v11964_v32  ;;  %v6920_v17 = vrot.slane %v12334_v61, %v12214_v29  ;;  %v7358_v2 = vld [vmem:[%s13348_s1 + $0x68] sm:$0xff] }
 0x741   :  { %v10317_v35 = vpack.c.bf16 %v7064_v18, %v7062_v16  ;;  %10170 = vmatmul.mubr.msk.f32.gmra.mrb[22].mxu1 %vm7409_vm3, %v7346_v6  ;;  %v7042_v38 = vsub.f32 1.0, %v7010_v33  ;;  %v6940_v12 = vrot.slane %v12385_v40, %v12209_v31  ;;  %v6858_v9 = vrot.slane %v12306_v47, %v12301_v41 }
 0x742   :  { %v10323_v37 = vpack.c.bf16 %v7067_v30, %v7065_v28  ;;  %7510 = vmatprep.mubr.f32.mxu1 %v11964_v32  ;;  %10322 = vmatprep.subr.bf16.mxu0 %v10321_v34  ;;  %v7044_v42 = vsub.f32 1.0, %v7012_v36  ;;  %v6977_v46 = vsub.f32 %v12310_v24, %v6920_v17  ;;  %v6979_v49 = vsub.f32 %v12312_v8, %v6920_v17 }
 0x743   :  { %10318 = vmatprep.subr.bf16.mxu1 %v10317_v35  ;;  %v7074_v43 = vmax.f32 %v7042_v38, 0.0  ;;  %10178 = vmatmul.mubr.msk.f32.gmra.mrb[20].mxu0 %vm7409_vm3, %v7354_v39  ;;  %v6896_v41 = vrot.slane %v12342_v0, %v12214_v29  ;;  %v6986_v47 = vsub.f32 %v12310_v24, %v6940_v12  ;;  %v6988_v50 = vsub.f32 %v12312_v8, %v6940_v12  ;;  %v7349_v0 = vld [vmem:[%s13348_s1 + $0x20] sm:$0xff] }
 0x744   :  { %10324 = vmatpush1.bf16.msra.mxu0 %v10323_v37  ;;  %v7076_v44 = vmax.f32 %v7044_v42, 0.0  ;;  %7647 = vmatprep.mubr.f32.mxu0 %v11964_v32  ;;  %v6916_v21 = vrot.slane %v6858_v9, %v12209_v31  ;;  %v7009_v23 = vand.u32 2147483647, %v6977_v46  ;;  %v7011_v25 = vand.u32 2147483647, %v6979_v49  ;;  %v7369_v35 = vld [vmem:[%s13348_s1 + $0xc0] sm:$0xff] }
 0x745   :  { %10171 = vmatmul.mubr.msk.f32.gmra.mrb[24].mxu1 %vm7409_vm3, %v7347_v48  ;;  %v6965_v27 = vsub.f32 %v12310_v24, %v6896_v41  ;;  %v7018_v11 = vand.u32 2147483647, %v6986_v47  ;;  %v7020_v14 = vand.u32 2147483647, %v6988_v50  ;;  %v6967_v51 = vsub.f32 %v12312_v8, %v6896_v41  ;;  %v7352_v48 = vld [vmem:[%s13348_s1 + $0x38] sm:$0xff]  ;;  %v7359_v41 = vld [vmem:[%s13348_s1 + $0x70] sm:$0xff] }
 0x746   :  { %7516 = vmatprep.mubr.f32.mxu1 %v11964_v32  ;;  %v10329_v61 = vpack.c.bf16 %v7076_v44, %v7074_v43  ;;  %v6974_v52 = vsub.f32 %v12310_v24, %v6916_v21  ;;  %v6976_v53 = vsub.f32 %v12312_v8, %v6916_v21  ;;  %v12430_v13 = vcombine.high %v6858_v9, %v6858_v9  ;;  %v7370_v44 = vld [vmem:[%s13348_s1 + $0xc8] sm:$0xff] }
 0x747   :  { %10179 = vmatmul.mubr.msk.f32.gmra.mrb[22].mxu0 %vm7409_vm3, %v7355_v5  ;;  %v6912_v55 = vrot.slane %v6858_v9, %v12214_v29  ;;  %v7041_v58 = vsub.f32 1.0, %v7009_v23  ;;  %v7043_v59 = vsub.f32 1.0, %v7011_v25  ;;  %v6997_v22 = vand.u32 2147483647, %v6965_v27  ;;  %v7360_v27 = vld [vmem:[%s13348_s1 + $0x78] sm:$0xff] }
 0x748   :  { %10330 = vmatprep.subr.bf16.mxu0 %v10329_v61  ;;  %7653 = vmatprep.mubr.f32.mxu0 %v11964_v32  ;;  %v7050_v60 = vsub.f32 1.0, %v7018_v11  ;;  %v7052_v26 = vsub.f32 1.0, %v7020_v14  ;;  %v6999_v1 = vand.u32 2147483647, %v6967_v51  ;;  %v7006_v3 = vand.u32 2147483647, %v6974_v52 }
 0x749   :  { %10172 = vmatmul.mubr.msk.f32.gmra.mrb[26].mxu1 %vm7409_vm3, %v7348_v45  ;;  %v7008_v4 = vand.u32 2147483647, %v6976_v53  ;;  %v6932_v6 = vrot.slane %v12430_v13, %v12209_v31  ;;  %v7073_v15 = vmax.f32 %v7041_v58, 0.0  ;;  %v7075_v16 = vmax.f32 %v7043_v59, 0.0  ;;  %v7372_v51 = vld [vmem:[%s13348_s1 + $0xd8] sm:$0xff]  ;;  %v7361_v53 = vld [vmem:[%s13348_s1 + $0x80] sm:$0xff] }
 0x74a   :  { %7522 = vmatprep.mubr.f32.mxu1 %v11964_v32  ;;  %v7029_v18 = vsub.f32 1.0, %v6997_v22  ;;  %v6973_v19 = vsub.f32 %v12310_v24, %v6912_v55  ;;  %v7082_v28 = vmax.f32 %v7050_v60, 0.0  ;;  %v7084_v30 = vmax.f32 %v7052_v26, 0.0  ;;  %v7373_v59 = vld [vmem:[%s13348_s1 + $0xe0] sm:$0xff]  ;;  %v7362_v22 = vld [vmem:[%s13348_s1 + $0x88] sm:$0xff] }
 0x74b   :  { %10180 = vmatmul.mubr.msk.f32.gmra.mrb[24].mxu0 %vm7409_vm3, %v7356_v10  ;;  %v7031_v33 = vsub.f32 1.0, %v6999_v1  ;;  %v6975_v34 = vsub.f32 %v12312_v8, %v6912_v55  ;;  %v7038_v36 = vsub.f32 1.0, %v7006_v3  ;;  %v7040_v37 = vsub.f32 1.0, %v7008_v4  ;;  %v7374_v26 = vld [vmem:[%s13348_s1 + $0xe8] sm:$0xff]  ;;  %v7363_v1 = vld [vmem:[%s13348_s1 + $0x90] sm:$0xff] }
 0x74c   :  { %7659 = vmatprep.mubr.f32.mxu0 %v11964_v32  ;;  %v6982_v38 = vsub.f32 %v12310_v24, %v6932_v6  ;;  %v6984_v39 = vsub.f32 %v12312_v8, %v6932_v6  ;;  %v10331_v42 = vpack.c.bf16 %v7075_v16, %v7073_v15  ;;  %v7061_v43 = vmax.f32 %v7029_v18, 0.0  ;;  %v7375_v4 = vld [vmem:[%s13348_s1 + $0xf0] sm:$0xff]  ;;  %v7364_v6 = vld [vmem:[%s13348_s1 + $0x98] sm:$0xff] }
 0x74d   :  { %10173 = vmatmul.mubr.msk.f32.gmra.mrb[28].mxu1 %vm7409_vm3, %v7349_v0  ;;  %v10337_v17 = vpack.c.bf16 %v7084_v30, %v7082_v28  ;;  %v7063_v12 = vmax.f32 %v7031_v33, 0.0  ;;  %v7005_v9 = vand.u32 2147483647, %v6973_v19  ;;  %v7007_v5 = vand.u32 2147483647, %v6975_v34  ;;  %v7371_v0 = vld [vmem:[%s13348_s1 + $0xd0] sm:$0xff] }
 0x74e   :  { %7528 = vmatprep.mubr.f32.mxu1 %v11964_v32  ;;  %v7070_v61 = vmax.f32 %v7038_v36, 0.0  ;;  %v7072_v45 = vmax.f32 %v7040_v37, 0.0  ;;  %v7014_v46 = vand.u32 2147483647, %v6982_v38  ;;  %v7016_v49 = vand.u32 2147483647, %v6984_v39 }
 0x74f   :  { %10181 = vmatmul.mubr.msk.f32.gmra.mrb[26].mxu0 %vm7409_vm3, %v7357_v20  ;;  %v10319_v47 = vpack.c.bf16 %v7063_v12, %v7061_v43  ;;  %v7037_v50 = vsub.f32 1.0, %v7005_v9  ;;  %v7039_v10 = vsub.f32 1.0, %v7007_v5  ;;  %v6928_v16 = vrot.slane %v12430_v13, %v12214_v29  ;;  %v7376_v18 = vld [vmem:[%s13348_s1 + $0xf8] sm:$0xff]  ;;  %v7365_v19 = vld [vmem:[%s13348_s1 + $0xa0] sm:$0xff]  ;;  %v7386_v39 = vld [vmem:[%s13348_s1 + $0x148] sm:$0xff] }
 0x750   :  { %7665 = vmatprep.mubr.f32.mxu0 %v11964_v32  ;;  %v10325_v21 = vpack.c.bf16 %v7072_v45, %v7070_v61  ;;  %v7046_v23 = vsub.f32 1.0, %v7014_v46  ;;  %v7048_v25 = vsub.f32 1.0, %v7016_v49  ;;  %v7385_v34 = vld [vmem:[%s13348_s1 + $0x140] sm:$0xff]  ;;  %v7388_v5 = vld [vmem:[%s13348_s1 + $0x158] sm:$0xff]  ;;  %v7378_v49 = vld [vmem:[%s13348_s1 + $0x108] sm:$0xff] }
 0x751   :  { %10174 = vmatmul.mubr.msk.f32.gmra.mrb[30].mxu1 %vm7409_vm3, %v7350_v54  ;;  %v7069_v11 = vmax.f32 %v7037_v50, 0.0  ;;  %v7071_v14 = vmax.f32 %v7039_v10, 0.0  ;;  %v6936_v54 = vrot.slane %v12385_v40, %v12214_v29  ;;  %v6981_v13 = vsub.f32 %v12310_v24, %v6928_v16  ;;  %v7377_v61 = vld [vmem:[%s13348_s1 + $0x100] sm:$0xff]  ;;  %v7391_v50 = vld [vmem:[%s13348_s1 + $0x170] sm:$0xff]  ;;  %v7380_v10 = vld [vmem:[%s13348_s1 + $0x118] sm:$0xff] }
 0x752   :  { %7534 = vmatprep.mubr.f32.mxu1 %v11964_v32  ;;  %v7078_v20 = vmax.f32 %v7046_v23, 0.0  ;;  %v7080_v52 = vmax.f32 %v7048_v25, 0.0  ;;  %v6983_v33 = vsub.f32 %v12312_v8, %v6928_v16  ;;  %v7389_v46 = vld [vmem:[%s13348_s1 + $0x160] sm:$0xff]  ;;  %v7382_v25 = vld [vmem:[%s13348_s1 + $0x128] sm:$0xff] }
 0x753   :  { %10182 = vmatmul.mubr.msk.f32.gmra.mrb[28].mxu0 %vm7409_vm3, %v7358_v2  ;;  %v10327_v55 = vpack.c.bf16 %v7071_v14, %v7069_v11  ;;  %v6985_v40 = vsub.f32 %v12310_v24, %v6936_v54  ;;  %v6987_v60 = vsub.f32 %v12312_v8, %v6936_v54  ;;  %v7013_v37 = vand.u32 2147483647, %v6981_v13  ;;  %v7401_v23 = vld [vmem:[%s13348_s1 + $0x1c0] sm:$0xff]  ;;  %v7383_v11 = vld [vmem:[%s13348_s1 + $0x130] sm:$0xff]  ;;  %v7394_v54 = vld [vmem:[%s13348_s1 + $0x188] sm:$0xff] }
 0x754   :  { %7909 = vmatprep.mubr.f32.mxu0 %v11964_v32  ;;  %v10333_v58 = vpack.c.bf16 %v7080_v52, %v7078_v20  ;;  %v7015_v38 = vand.u32 2147483647, %v6983_v33  ;;  %v7403_v14 = vld [vmem:[%s13348_s1 + $0x1d0] sm:$0xff]  ;;  %v7404_v20 = vld [vmem:[%s13348_s1 + $0x1d8] sm:$0xff]  ;;  %v7393_v52 = vld [vmem:[%s13348_s1 + $0x180] sm:$0xff] }
 0x755   :  { %10175 = vmatmul.mubr.msk.f32.gmra.mrb[32].mxu1 %vm7409_vm3, %v7351_v7  ;;  %v7017_v2 = vand.u32 2147483647, %v6985_v40  ;;  %v7019_v3 = vand.u32 2147483647, %v6987_v60  ;;  %v7408_v40 = vld [vmem:[%s13348_s1 + $0x1f8] sm:$0xff]  ;;  %v7397_v60 = vld [vmem:[%s13348_s1 + $0x1a0] sm:$0xff] }
 0x756   :  { %7540 = vmatprep.mubr.f32.mxu1 %v11964_v32  ;;  %v7047_v43 = vsub.f32 1.0, %v7015_v38 }
 0x757   :  { %10193 = vmatmul.mubr.msk.f32.vlgmr.msra.gmra.mrb[30].mxu0 %vm7409_vm3, %v7369_v35  ;;  %v7049_v7 = vsub.f32 1.0, %v7017_v2  ;;  %v7051_v15 = vsub.f32 1.0, %v7019_v3  ;;  %v7366_v35 = vld [vmem:[%s13348_s1 + $0xa8] sm:$0xff]  ;;  %v7400_v2 = vld [vmem:[%s13348_s1 + $0x1b8] sm:$0xff]  ;;  %v7140_v3 = vrot.slane %v12326_v56, %v12214_v29 }
 0x758   :  { %10332 = vmatpush1.bf16.msra.mxu0 %v10331_v42  ;;  %7915 = vmatprep.mubr.f32.mxu0 %v11964_v32  ;;  %v7045_v42 = vsub.f32 1.0, %v7013_v37  ;;  %v7079_v9 = vmax.f32 %v7047_v43, 0.0 }
 0x759   :  { %10176 = vmatmul.mubr.msk.f32.gmra.mrb[34].mxu1 %vm7409_vm3, %v7352_v48  ;;  %10338 = vmatprep.subr.bf16.mxu0 %v10337_v17  ;;  %v7081_v28 = vmax.f32 %v7049_v7, 0.0  ;;  %v7083_v30 = vmax.f32 %v7051_v15, 0.0  ;;  %v7367_v48 = vld [vmem:[%s13348_s1 + $0xb0] sm:$0xff]  ;;  %v7152_v7 = vrot.slane %v12337_v62, %v12209_v31  ;;  %v7135_v15 = vcombine.high %v12337_v62, %v12337_v62 }
 0x75a   :  { %7671 = vmatprep.mubr.f32.mxu1 %v11964_v32  ;;  %v7387_v17 = vld [vmem:[%s13348_s1 + $0x150] sm:$0xff]  ;;  %v7077_v12 = vmax.f32 %v7045_v42, 0.0 }
 0x75b   :  { %10194 = vmatmul.mubr.msk.f32.gmra.mrb[32].mxu0 %vm7409_vm3, %v7370_v44  ;;  %v10339_v36 = vpack.c.bf16 %v7083_v30, %v7081_v28  ;;  %v7368_v44 = vld [vmem:[%s13348_s1 + $0xb8] sm:$0xff]  ;;  %v7222_v28 = vsub.f32 %v12310_v24, %v7152_v7  ;;  %v7164_v33 = vrot.slane %v7135_v15, %v12214_v29  ;;  %v7224_v43 = vsub.f32 %v12312_v8, %v7152_v7 }
 0x75c   :  { %7921 = vmatprep.mubr.f32.mxu0 %v11964_v32  ;;  %v10335_v45 = vpack.c.bf16 %v7079_v9, %v7077_v12 }
 0x75d   :  { %10183 = vmatmul.mubr.msk.f32.vlgmr.msra.gmra.mrb[36].mxu1 %vm7409_vm3, %v7359_v41  ;;  %v7390_v41 = vld [vmem:[%s13348_s1 + $0x168] sm:$0xff] }
 0x75e   :  { %10320 = vmatpush1.bf16.msra.mxu1 %v10319_v47  ;;  %7677 = vmatprep.mubr.f32.mxu1 %v11964_v32  ;;  %v7379_v47 = vld [vmem:[%s13348_s1 + $0x110] sm:$0xff] }
 0x75f   :  { %10326 = vmatprep.subr.bf16.mxu1 %v10325_v21  ;;  %10195 = vmatmul.mubr.msk.f32.gmra.mrb[34].mxu0 %vm7409_vm3, %v7371_v0  ;;  %v7392_v21 = vld [vmem:[%s13348_s1 + $0x178] sm:$0xff]  ;;  %v7381_v0 = vld [vmem:[%s13348_s1 + $0x120] sm:$0xff] }
 0x760   :  { %7927 = vmatprep.mubr.f32.mxu0 %v11964_v32 }
 0x761   :  { %10184 = vmatmul.mubr.msk.f32.gmra.mrb[38].mxu1 %vm7409_vm3, %v7360_v27  ;;  %v7402_v27 = vld [vmem:[%s13348_s1 + $0x1c8] sm:$0xff] }
 0x762   :  { %7772 = vmatprep.mubr.f32.mxu1 %v11964_v32 }
 0x763   :  { %10196 = vmatmul.mubr.msk.f32.gmra.mrb[36].mxu0 %vm7409_vm3, %v7372_v51  ;;  %v7384_v51 = vld [vmem:[%s13348_s1 + $0x138] sm:$0xff] }
 0x764   :  { %7933 = vmatprep.mubr.f32.mxu0 %v11964_v32 }
 0x765   :  { %10185 = vmatmul.mubr.msk.f32.vlgmr.msra.gmra.mrb[40].mxu1 %vm7409_vm3, %v7361_v53  ;;  %v7405_v53 = vld [vmem:[%s13348_s1 + $0x1e0] sm:$0xff] }
 0x766   :  { %10328 = vmatpush1.bf16.msra.mxu1 %v10327_v55  ;;  %7778 = vmatprep.mubr.f32.mxu1 %v11964_v32  ;;  %v7406_v55 = vld [vmem:[%s13348_s1 + $0x1e8] sm:$0xff] }
 0x767   :  { %10334 = vmatprep.subr.bf16.mxu1 %v10333_v58  ;;  %10197 = vmatmul.mubr.msk.f32.gmra.mrb[38].mxu0 %vm7409_vm3, %v7373_v59  ;;  %v7395_v58 = vld [vmem:[%s13348_s1 + $0x190] sm:$0xff] }
 0x768   :  { %7939 = vmatprep.mubr.f32.mxu0 %v11964_v32  ;;  %v7407_v59 = vld [vmem:[%s13348_s1 + $0x1f0] sm:$0xff] }
 0x769   :  { %10186 = vmatmul.mubr.msk.f32.gmra.mrb[42].mxu1 %vm7409_vm3, %v7362_v22  ;;  %v7396_v22 = vld [vmem:[%s13348_s1 + $0x198] sm:$0xff] }
 0x76a   :  { %7784 = vmatprep.mubr.f32.mxu1 %v11964_v32 }
 0x76b   :  { %10198 = vmatmul.mubr.msk.f32.gmra.mrb[40].mxu0 %vm7409_vm3, %v7374_v26  ;;  %v7398_v26 = vld [vmem:[%s13348_s1 + $0x1a8] sm:$0xff] }
 0x76c   :  { %7945 = vmatprep.mubr.f32.mxu0 %v11964_v32 }
 0x76d   :  { %10187 = vmatmul.mubr.msk.f32.gmra.mrb[44].mxu1 %vm7409_vm3, %v7363_v1  ;;  %v7399_v1 = vld [vmem:[%s13348_s1 + $0x1b0] sm:$0xff]  ;;  %s11966_s1 = smov [#allocation16]  }
 0x76e   :  { %7790 = vmatprep.mubr.f32.mxu1 %v11964_v32  ;;  %s9277_s5 = sshll.u32 %s11966_s1, 4  ;;  %s9278_s5 = int_to_ptr.vmem [resolvable:$true] %s9277_s5 }
 0x76f   :  { %10199 = vmatmul.mubr.msk.f32.gmra.mrb[42].mxu0 %vm7409_vm3, %v7375_v4  ;;  %v7144_v4 = vrot.slane %v12326_v56, %v12209_v31  ;;  %s11915_s26 = scalar_lea.vmem %s9278_s5, 1024  ;;  %p11920_p9 = scmp.lt.s32.totalorder %s9278_s5, %s9278_s5 }
 0x770   :  { %7951 = vmatprep.mubr.f32.mxu0 %v11964_v32  ;;  %p11916_p8 = scmp.ne.s32.totalorder %s9278_s5, %s11915_s26  ;;  %p11921_p10 = scmp.lt.s32.totalorder %s11915_s26, %s11915_s26 }
 0x771   :  { %10188 = vmatmul.mubr.msk.f32.gmra.mrb[46].mxu1 %vm7409_vm3, %v7364_v6  ;;  %v7148_v6 = vrot.slane %v12337_v62, %v12214_v29  ;;  %v7218_v16 = vsub.f32 %v12310_v24, %v7144_v4  ;;  %v7220_v30 = vsub.f32 %v12312_v8, %v7144_v4  ;;  %v7168_v62 = vrot.slane %v7135_v15, %v12209_v31 }
 0x772   :  { %7796 = vmatprep.mubr.f32.mxu1 %v11964_v32  ;;  %p11922_p11 = por %p11921_p10, %p11920_p9 }
 0x773   :  { %10200 = vmatmul.mubr.msk.f32.gmra.mrb[44].mxu0 %vm7409_vm3, %v7376_v18  ;;  %v7219_v18 = vsub.f32 %v12312_v8, %v7140_v3  ;;  %v7230_v9 = vsub.f32 %v12310_v24, %v7168_v62 }
 0x774   :  { %8183 = vmatprep.mubr.f32.mxu0 %v11964_v32  ;;  %p11923_p12 = pnand %p11922_p11, %p11916_p8 }
 0x775   :  { %10189 = vmatmul.mubr.msk.f32.gmra.mrb[48].mxu1 %vm7409_vm3, %v7365_v19  ;;  %v7221_v19 = vsub.f32 %v12310_v24, %v7148_v6  ;;  %v7251_v37 = vand.u32 2147483647, %v7219_v18  ;;  %v7176_v18 = vrot.slane %v12329_v57, %v12209_v31 }
 0x776   :  { %7802 = vmatprep.mubr.f32.mxu1 %v11964_v32 }
 0x777   :  { %10209 = vmatmul.mubr.msk.f32.vlgmr.msra.gmra.mrb[46].mxu0 %vm7409_vm3, %v7385_v34  ;;  %v7133_v34 = vcombine.high %v12326_v56, %v12326_v56  ;;  %v7253_v38 = vand.u32 2147483647, %v7221_v19  ;;  %v7136_v19 = vcombine.high %v12340_v63, %v12340_v63 }
 0x778   :  { %10340 = vmatpush1.bf16.msra.mxu0 %v10339_v36  ;;  %8189 = vmatprep.mubr.f32.mxu0 %v11964_v32  ;;  %v7223_v36 = vsub.f32 %v12312_v8, %v7148_v6 }
 0x779   :  { %10190 = vmatmul.mubr.msk.f32.gmra.mrb[50].mxu1 %vm7409_vm3, %v7366_v35  ;;  %v7250_v35 = vand.u32 2147483647, %v7218_v16  ;;  %v7156_v56 = vrot.slane %v7133_v34, %v12214_v29 }
 0x77a   :  { %7808 = vmatprep.mubr.f32.mxu1 %v11964_v32  ;;  %v7255_v12 = vand.u32 2147483647, %v7223_v36 }
 0x77b   :  { %10210 = vmatmul.mubr.msk.f32.gmra.mrb[48].mxu0 %vm7409_vm3, %v7386_v39  ;;  %v7254_v39 = vand.u32 2147483647, %v7222_v28 }
 0x77c   :  { %8195 = vmatprep.mubr.f32.mxu0 %v11964_v32 }
 0x77d   :  { %10191 = vmatmul.mubr.msk.f32.gmra.mrb[52].mxu1 %vm7409_vm3, %v7367_v48  ;;  %v7252_v48 = vand.u32 2147483647, %v7220_v30 }
 0x77e   :  { %7814 = vmatprep.mubr.f32.mxu1 %v11964_v32 }
 0x77f   :  { %10211 = vmatmul.mubr.msk.f32.gmra.mrb[50].mxu0 %vm7409_vm3, %v7387_v17  ;;  %v7229_v17 = vsub.f32 %v12310_v24, %v7164_v33 }
 0x780   :  { %8201 = vmatprep.mubr.f32.mxu0 %v11964_v32 }
 0x781   :  { %10192 = vmatmul.mubr.msk.f32.gmra.mrb[54].mxu1 %vm7409_vm3, %v7368_v44  ;;  %v7282_v44 = vsub.f32 1.0, %v7250_v35 }
 0x782   :  { %8046 = vmatprep.mubr.f32.mxu1 %v11964_v32 }
 0x783   :  { %10212 = vmatmul.mubr.msk.f32.gmra.mrb[52].mxu0 %vm7409_vm3, %v7388_v5  ;;  %v12745_v5 = vcombine.high %v12329_v57, %v12329_v57 }
 0x784   :  { %8207 = vmatprep.mubr.f32.mxu0 %v11964_v32 }
 0x785   :  { %10201 = vmatmul.mubr.msk.f32.vlgmr.msra.gmra.mrb[56].mxu1 %vm7409_vm3, %v7377_v61  ;;  %v7283_v61 = vsub.f32 1.0, %v7251_v37 }
 0x786   :  { %10336 = vmatpush1.bf16.msra.mxu1 %v10335_v45  ;;  %8052 = vmatprep.mubr.f32.mxu1 %v11964_v32  ;;  %v7231_v45 = vsub.f32 %v12312_v8, %v7164_v33 }
 0x787   :  { %10213 = vmatmul.mubr.msk.f32.gmra.mrb[54].mxu0 %vm7409_vm3, %v7389_v46  ;;  %v7285_v46 = vsub.f32 1.0, %v7253_v38 }
 0x788   :  { %8213 = vmatprep.mubr.f32.mxu0 %v11964_v32 }
 0x789   :  { %10202 = vmatmul.mubr.msk.f32.gmra.mrb[58].mxu1 %vm7409_vm3, %v7378_v49  ;;  %v7286_v49 = vsub.f32 1.0, %v7254_v39 }
 0x78a   :  { %8058 = vmatprep.mubr.f32.mxu1 %v11964_v32 }
 0x78b   :  { %10214 = vmatmul.mubr.msk.f32.gmra.mrb[56].mxu0 %vm7409_vm3, %v7390_v41  ;;  %v7284_v41 = vsub.f32 1.0, %v7252_v48 }
 0x78c   :  { %8219 = vmatprep.mubr.f32.mxu0 %v11964_v32 }
 0x78d   :  { %10203 = vmatmul.mubr.msk.f32.gmra.mrb[60].mxu1 %vm7409_vm3, %v7379_v47  ;;  %v7232_v47 = vsub.f32 %v12312_v8, %v7168_v62 }
 0x78e   :  { %8064 = vmatprep.mubr.f32.mxu1 %v11964_v32 }
 0x78f   :  { %10215 = vmatmul.mubr.msk.f32.gmra.mrb[58].mxu0 %vm7409_vm3, %v7391_v50 }
 0x790   :  { %8225 = vmatprep.mubr.f32.mxu0 %v11964_v32 }
 0x791   :  { %10204 = vmatmul.mubr.msk.f32.gmra.mrb[62].mxu1 %vm7409_vm3, %v7380_v10  ;;  %v7256_v10 = vand.u32 2147483647, %v7224_v43  ;;  %v7196_v43 = vrot.slane %v7136_v19, %v12214_v29 }
 0x792   :  { %8070 = vmatprep.mubr.f32.mxu1 %v11964_v32 }
 0x793   :  { %10216 = vmatmul.mubr.msk.f32.gmra.mrb[60].mxu0 %vm7409_vm3, %v7392_v21  ;;  %v7261_v21 = vand.u32 2147483647, %v7229_v17 }
 0x794   :  { %8457 = vmatprep.mubr.f32.mxu0 %v11964_v32 }
 0x795   :  { %10205 = vmatmul.mubr.msk.f32.gmra.mrb[64].mxu1 %vm7409_vm3, %v7381_v0  ;;  %v7160_v0 = vrot.slane %v7133_v34, %v12209_v31 }
 0x796   :  { %8076 = vmatprep.mubr.f32.mxu1 %v11964_v32 }
 0x797   :  { %10225 = vmatmul.mubr.msk.f32.vlgmr.msra.gmra.mrb[62].mxu0 %vm7409_vm3, %v7401_v23  ;;  %v12752_v23 = vmax.f32 %v7282_v44, 0.0 }
 0x798   :  { %8463 = vmatprep.mubr.f32.mxu0 %v11964_v32 }
 0x799   :  { %10206 = vmatmul.mubr.msk.f32.gmra.mrb[66].mxu1 %vm7409_vm3, %v7382_v25  ;;  %v7287_v25 = vsub.f32 1.0, %v7255_v12 }
 0x79a   :  { %8082 = vmatprep.mubr.f32.mxu1 %v11964_v32 }
 0x79b   :  { %10226 = vmatmul.mubr.msk.f32.gmra.mrb[64].mxu0 %vm7409_vm3, %v7402_v27  ;;  %v7262_v27 = vand.u32 2147483647, %v7230_v9  ;;  %v7200_v9 = vrot.slane %v7136_v19, %v12209_v31 }
 0x79c   :  { %8469 = vmatprep.mubr.f32.mxu0 %v11964_v32 }
 0x79d   :  { %10207 = vmatmul.mubr.msk.f32.gmra.mrb[68].mxu1 %vm7409_vm3, %v7383_v11  ;;  %v7225_v11 = vsub.f32 %v12310_v24, %v7156_v56 }
 0x79e   :  { %8088 = vmatprep.mubr.f32.mxu1 %v11964_v32 }
 0x79f   :  { %10227 = vmatmul.mubr.msk.f32.gmra.mrb[66].mxu0 %vm7409_vm3, %v7403_v14  ;;  %v12755_v14 = vmax.f32 %v7283_v61, 0.0 }
 0x7a0   :  { %8475 = vmatprep.mubr.f32.mxu0 %v11964_v32 }
 0x7a1   :  { %10208 = vmatmul.mubr.msk.f32.gmra.mrb[70].mxu1 %vm7409_vm3, %v7384_v51  ;;  %v7263_v51 = vand.u32 2147483647, %v7231_v45 }
 0x7a2   :  { %8320 = vmatprep.mubr.f32.mxu1 %v11964_v32 }
 0x7a3   :  { %10228 = vmatmul.mubr.msk.f32.gmra.mrb[68].mxu0 %vm7409_vm3, %v7404_v20  ;;  %v7227_v20 = vsub.f32 %v12312_v8, %v7156_v56  ;;  %v7295_v4 = vsub.f32 1.0, %v7263_v51 }
 0x7a4   :  { %8481 = vmatprep.mubr.f32.mxu0 %v11964_v32 }
 0x7a5   :  { %10217 = vmatmul.mubr.msk.f32.vlgmr.msra.gmra.mrb[72].mxu1 %vm7409_vm3, %v7393_v52  ;;  %v7180_v52 = vrot.slane %v12340_v63, %v12214_v29  ;;  %v7259_v6 = vand.u32 2147483647, %v7227_v20  ;;  %v12788_v37 = vmax.f32 %v7295_v4, 0.0 }
 0x7a6   :  { %8326 = vmatprep.mubr.f32.mxu1 %v11964_v32 }
 0x7a7   :  { %10229 = vmatmul.mubr.msk.f32.gmra.mrb[70].mxu0 %vm7409_vm3, %v7405_v53  ;;  %v12760_v53 = vmax.f32 %v7285_v46, 0.0  ;;  %v7237_v7 = vsub.f32 %v12310_v24, %v7180_v52  ;;  %v7239_v16 = vsub.f32 %v12312_v8, %v7180_v52  ;;  %v7291_v38 = vsub.f32 1.0, %v7259_v6 }
 0x7a8   :  { %8487 = vmatprep.mubr.f32.mxu0 %v11964_v32  ;;  %v7236_v46 = vsub.f32 %v12312_v8, %v7176_v18  ;;  %v7246_v52 = vsub.f32 %v12310_v24, %v7200_v9 }
 0x7a9   :  { %10218 = vmatmul.mubr.msk.f32.gmra.mrb[74].mxu1 %vm7409_vm3, %v7394_v54  ;;  %v12762_v54 = vmax.f32 %v7286_v49, 0.0  ;;  %v7271_v48 = vand.u32 2147483647, %v7239_v16  ;;  %v12800_v49 = vmax.f32 %v7291_v38, 0.0 }
 0x7aa   :  { %8332 = vmatprep.mubr.f32.mxu1 %v11964_v32 }
 0x7ab   :  { %10230 = vmatmul.mubr.msk.f32.gmra.mrb[72].mxu0 %vm7409_vm3, %v7406_v55  ;;  %v12764_v55 = vmax.f32 %v7284_v41, 0.0 }
 0x7ac   :  { %8493 = vmatprep.mubr.f32.mxu0 %v11964_v32 }
 0x7ad   :  { %10219 = vmatmul.mubr.msk.f32.gmra.mrb[76].mxu1 %vm7409_vm3, %v7395_v58  ;;  %v7264_v58 = vand.u32 2147483647, %v7232_v47 }
 0x7ae   :  { %8338 = vmatprep.mubr.f32.mxu1 %v11964_v32 }
 0x7af   :  { %10231 = vmatmul.mubr.msk.f32.gmra.mrb[74].mxu0 %vm7409_vm3, %v7407_v59  ;;  %v7288_v59 = vsub.f32 1.0, %v7256_v10  ;;  %v7296_v15 = vsub.f32 1.0, %v7264_v58  ;;  %v7188_v10 = vrot.slane %v12745_v5, %v12214_v29 }
 0x7b0   :  { %8499 = vmatprep.mubr.f32.mxu0 %v11964_v32 }
 0x7b1   :  { %10220 = vmatmul.mubr.msk.f32.gmra.mrb[78].mxu1 %vm7409_vm3, %v7396_v22  ;;  %v7293_v22 = vsub.f32 1.0, %v7261_v21  ;;  %v12780_v28 = vmax.f32 %v7288_v59, 0.0  ;;  %v7303_v21 = vsub.f32 1.0, %v7271_v48 }
 0x7b2   :  { %8344 = vmatprep.mubr.f32.mxu1 %v11964_v32 }
 0x7b3   :  { %10232 = vmatmul.mubr.msk.f32.gmra.mrb[76].mxu0 %vm7409_vm3, %v7408_v40  ;;  %v7226_v40 = vsub.f32 %v12310_v24, %v7160_v0  ;;  %v12782_v30 = vmax.f32 %v7293_v22, 0.0  ;;  %v7268_v22 = vand.u32 2147483647, %v7236_v46 }
 0x7b5   :  { %10221 = vmatmul.mubr.msk.f32.gmra.mrb[80].mxu1 %vm7409_vm3, %v7397_v60  ;;  %v7184_v60 = vrot.slane %v12340_v63, %v12209_v31  ;;  %v12791_v63 = vmax.f32 %v7296_v15, 0.0 }
 0x7b6   :  { %8350 = vmatprep.mubr.f32.mxu1 %v11964_v32 }
 0x7b7   :  { %v7238_v33 = vsub.f32 %v12310_v24, %v7184_v60  ;;  %v7240_v62 = vsub.f32 %v12312_v8, %v7184_v60 }
 0x7b9   :  { %10222 = vmatmul.mubr.msk.f32.gmra.mrb[82].mxu1 %vm7409_vm3, %v7398_v26  ;;  %v12769_v26 = vmax.f32 %v7287_v25, 0.0  ;;  %v7270_v44 = vand.u32 2147483647, %v7238_v33  ;;  %v7272_v45 = vand.u32 2147483647, %v7240_v62  ;;  %v7245_v25 = vsub.f32 %v12310_v24, %v7196_v43 }
 0x7ba   :  { %8356 = vmatprep.mubr.f32.mxu1 %v11964_v32  ;;  %v7300_v33 = vsub.f32 1.0, %v7268_v22 }
 0x7bb   :  { %v7302_v51 = vsub.f32 1.0, %v7270_v44  ;;  %v7304_v59 = vsub.f32 1.0, %v7272_v45  ;;  %v7277_v4 = vand.u32 2147483647, %v7245_v25 }
 0x7bd   :  { %10223 = vmatmul.mubr.msk.f32.gmra.mrb[84].mxu1 %vm7409_vm3, %v7399_v1  ;;  %v7294_v1 = vsub.f32 1.0, %v7262_v27  ;;  %v7192_v27 = vrot.slane %v12745_v5, %v12209_v31  ;;  %v12817_v5 = vmax.f32 %v7303_v21, 0.0  ;;  %v12821_v15 = vmax.f32 %v7302_v51, 0.0 }
 0x7be   :  { %8362 = vmatprep.mubr.f32.mxu1 %v11964_v32  ;;  %v7217_v32 = vsub.f32 %v12310_v24, %v7140_v3  ;;  %v7228_v3 = vsub.f32 %v12312_v8, %v7160_v0 }
 0x7bf   :  { %v12785_v34 = vmax.f32 %v7294_v1, 0.0  ;;  %v7248_v1 = vsub.f32 %v12312_v8, %v7200_v9  ;;  %v7242_v6 = vsub.f32 %v12310_v24, %v7192_v27  ;;  %v7244_v44 = vsub.f32 %v12312_v8, %v7192_v27 }
 0x7c0   :  { %v7249_v13 = vand.u32 2147483647, %v7217_v32  ;;  %v7172_v32 = vrot.slane %v12329_v57, %v12214_v29  ;;  %v7260_v36 = vand.u32 2147483647, %v7228_v3  ;;  %v7269_v57 = vand.u32 2147483647, %v7237_v7 }
 0x7c1   :  { %10224 = vmatmul.mubr.msk.f32.gmra.mrb[86].mxu1 %vm7409_vm3, %v7400_v2  ;;  %v7257_v2 = vand.u32 2147483647, %v7225_v11  ;;  %v7280_v38 = vand.u32 2147483647, %v7248_v1 }
 0x7c2   :  { %v7281_v42 = vsub.f32 1.0, %v7249_v13  ;;  %v7258_v13 = vand.u32 2147483647, %v7226_v40  ;;  %v7233_v39 = vsub.f32 %v12310_v24, %v7172_v32  ;;  %v7235_v12 = vsub.f32 %v12312_v8, %v7172_v32 }
 0x7c3   :  { %v7289_v35 = vsub.f32 1.0, %v7257_v2  ;;  %v7292_v61 = vsub.f32 1.0, %v7260_v36  ;;  %v7301_v41 = vsub.f32 1.0, %v7269_v57  ;;  %v7247_v40 = vsub.f32 %v12312_v8, %v7196_v43 }
 0x7c4   :  { %v12749_v50 = vmax.f32 %v7281_v42, 0.0  ;;  %v7234_v42 = vsub.f32 %v12310_v24, %v7176_v18  ;;  %v7290_v17 = vsub.f32 1.0, %v7258_v13  ;;  %v7265_v47 = vand.u32 2147483647, %v7233_v39 }
 0x7c5   :  { %v12797_v56 = vmax.f32 %v7289_v35, 0.0  ;;  %v7267_v20 = vand.u32 2147483647, %v7235_v12  ;;  %v12810_v58 = vmax.f32 %v7292_v61, 0.0  ;;  %v12813_v29 = vmax.f32 %v7301_v41, 0.0 }
 0x7c6   :  { %v7266_v0 = vand.u32 2147483647, %v7234_v42  ;;  %v12807_v11 = vmax.f32 %v7290_v17, 0.0  ;;  %v7297_v60 = vsub.f32 1.0, %v7265_v47  ;;  %v7241_v2 = vsub.f32 %v12310_v24, %v7188_v10 }
 0x7c7   :  { %v7299_v16 = vsub.f32 1.0, %v7267_v20  ;;  %v7278_v18 = vand.u32 2147483647, %v7246_v52  ;;  %v12824_v13 = vmax.f32 %v7304_v59, 0.0  ;;  %v7279_v35 = vand.u32 2147483647, %v7247_v40 }
 0x7c8   :  { %v7298_v3 = vsub.f32 1.0, %v7266_v0  ;;  %v12826_v62 = vmax.f32 %v7297_v60, 0.0  ;;  %v7273_v57 = vand.u32 2147483647, %v7241_v2  ;;  %v7243_v24 = vsub.f32 %v12312_v8, %v7188_v10 }
 0x7c9   :  { %v7309_v43 = vsub.f32 1.0, %v7277_v4  ;;  %v7274_v17 = vand.u32 2147483647, %v7242_v6  ;;  %v7310_v46 = vsub.f32 1.0, %v7278_v18  ;;  %v12836_v47 = vmax.f32 %v7299_v16, 0.0 }
 0x7ca   :  { %v12833_v45 = vmax.f32 %v7298_v3, 0.0  ;;  %v12838_v10 = vmax.f32 %v7300_v33, 0.0  ;;  %v7311_v21 = vsub.f32 1.0, %v7279_v35  ;;  %v7312_v25 = vsub.f32 1.0, %v7280_v38 }
 0x7cb   :  { %v7305_v51 = vsub.f32 1.0, %v7273_v57  ;;  %v7275_v20 = vand.u32 2147483647, %v7243_v24  ;;  %v12840_v59 = vmax.f32 %v7309_v43, 0.0  ;;  %v7306_v22 = vsub.f32 1.0, %v7274_v17 }
 0x7cc   :  { %v7276_v40 = vand.u32 2147483647, %v7244_v44  ;;  %v12844_v4 = vmax.f32 %v7310_v46, 0.0  ;;  %v12848_v16 = vmax.f32 %v7311_v21, 0.0  ;;  %v12850_v33 = vmax.f32 %v7312_v25, 0.0 }
 0x7cd   :  { %v7307_v35 = vsub.f32 1.0, %v7275_v20  ;;  %v12852_v24 = vmax.f32 %v7305_v51, 0.0 }
 0x7ce   :  { %13365 = vst [vmem:[#allocation23_spill] sm:$0xff] %v12844_v4  ;;  %13366 = vst [vmem:[#allocation24_spill] sm:$0xff] %v12848_v16 }
 0x7cf   :  { %13367 = vst [vmem:[#allocation25_spill] sm:$0xff] %v12850_v33  ;;  %13368 = vst [vmem:[#allocation26_spill] sm:$0xff] %v12852_v24  ;;  %v12860_v20 = vmax.f32 %v7307_v35, 0.0 }
 0x7d1   :  { %13370 = vst [vmem:[#allocation28_spill] sm:$0xff] %v12860_v20 }
 0x810   :  { %v7500_v31 = vpop.f32.mrb[20].mxu1 }
 0x811   :  { %v8506_v7 = vmul.f32 %v7500_v31, %v12749_v50  ;;  %v7502_v32 = vpop.f32.mrb[21].mxu1 }
 0x812   :  { %v8507_v19 = vmul.f32 %v7502_v32, %v12752_v23  ;;  %v7637_v36 = vpop.f32.mrb[18].mxu0 }
 0x813   :  { %v8522_v39 = vmul.f32 %v7637_v36, %v12760_v53  ;;  %v7639_v48 = vpop.f32.mrb[19].mxu0 }
 0x814   :  { %v7506_v42 = vpop.f32.mrb[22].mxu1  ;;  %v8523_v12 = vmul.f32 %v7639_v48, %v12762_v54  ;;  %v7308_v48 = vsub.f32 1.0, %v7276_v40 }
 0x815   :  { %v8508_v9 = vmul.f32 %v7506_v42, %v12755_v14  ;;  %v7508_v61 = vpop.f32.mrb[23].mxu1 }
 0x816   :  { %v8509_v41 = vmul.f32 %v7508_v61, %v12764_v55  ;;  %v7643_v27 = vpop.f32.mrb[20].mxu0  ;;  %v12855_v61 = vmax.f32 %v7306_v22, 0.0 }
 0x817   :  { %v8634_v0 = vadd.f32 %v8508_v9, %v8506_v7  ;;  %v8524_v1 = vmul.f32 %v7643_v27, %v12769_v26  ;;  %v7645_v2 = vpop.f32.mrb[21].mxu0 }
 0x818   :  { %v8641_v8 = vadd.f32 %v8509_v41, %v8507_v19  ;;  %v7512_v52 = vpop.f32.mrb[24].mxu1  ;;  %v8525_v7 = vmul.f32 %v7645_v2, %v12780_v28  ;;  %13369 = vst [vmem:[#allocation27_spill] sm:$0xff] %v12855_v61 }
 0x819   :  { %v8635_v60 = vrot.slane %v8634_v0, 4  ;;  %v8510_v31 = vmul.f32 %v7512_v52, %v12749_v50  ;;  %v7514_v3 = vpop.f32.mrb[25].mxu1  ;;  %v8690_v19 = vadd.f32 %v8524_v1, %v8522_v39 }
 0x81a   :  { %v8642_v6 = vrot.slane %v8641_v8, 4  ;;  %v8511_v32 = vmul.f32 %v7514_v3, %v12752_v23  ;;  %v8697_v38 = vadd.f32 %v8525_v7, %v8523_v12  ;;  %v7649_v57 = vpop.f32.mrb[22].mxu0 }
 0x81b   :  { %v8636_v18 = vadd.f32 %v8635_v60, %v8634_v0  ;;  %v8691_v43 = vrot.slane %v8690_v19, 4  ;;  %v8526_v17 = vmul.f32 %v7649_v57, %v12760_v53  ;;  %v7651_v44 = vpop.f32.mrb[23].mxu0  ;;  %v12862_v60 = vmax.f32 %v7308_v48, 0.0 }
 0x81c   :  { %v8643_v36 = vadd.f32 %v8642_v6, %v8641_v8  ;;  %v7518_v9 = vpop.f32.mrb[26].mxu1  ;;  %v8698_v41 = vrot.slane %v8697_v38, 4  ;;  %v8527_v39 = vmul.f32 %v7651_v44, %v12762_v54 }
 0x81d   :  { %v8637_v42 = vrot.slane %v8636_v18, 2  ;;  %v8512_v21 = vmul.f32 %v7518_v9, %v12755_v14  ;;  %v7520_v0 = vpop.f32.mrb[27].mxu1  ;;  %v8692_v25 = vadd.f32 %v8691_v43, %v8690_v19  ;;  %13371 = vst [vmem:[#allocation29_spill] sm:$0xff] %v12862_v60 }
 0x81e   :  { %v8644_v46 = vrot.slane %v8643_v36, 2  ;;  %v8513_v51 = vmul.f32 %v7520_v0, %v12764_v55  ;;  %v8699_v27 = vadd.f32 %v8698_v41, %v8697_v38  ;;  %v7655_v40 = vpop.f32.mrb[24].mxu0 }
 0x81f   :  { %v8638_v12 = vadd.f32 %v8637_v42, %v8636_v18  ;;  %v8648_v52 = vadd.f32 %v8512_v21, %v8510_v31  ;;  %v8693_v1 = vrot.slane %v8692_v25, 2  ;;  %v8528_v3 = vmul.f32 %v7655_v40, %v12769_v26  ;;  %v7657_v6 = vpop.f32.mrb[25].mxu0 }
 0x820   :  { %v8645_v8 = vadd.f32 %v8644_v46, %v8643_v36  ;;  %v8655_v2 = vadd.f32 %v8513_v51, %v8511_v32  ;;  %v7524_v7 = vpop.f32.mrb[28].mxu1  ;;  %v8700_v18 = vrot.slane %v8699_v27, 2  ;;  %v8529_v42 = vmul.f32 %v7657_v6, %v12780_v28 }
 0x821   :  { %v8639_v22 = vrot.slane %v8638_v12, 1  ;;  %v8649_v19 = vrot.slane %v8648_v52, 4  ;;  %v7526_v35 = vpop.f32.mrb[29].mxu1  ;;  %v8694_v36 = vadd.f32 %v8693_v1, %v8692_v25  ;;  %v8704_v38 = vadd.f32 %v8528_v3, %v8526_v17 }
 0x822   :  { %v8646_v57 = vrot.slane %v8645_v8, 1  ;;  %v8656_v31 = vrot.slane %v8655_v2, 4  ;;  %v8701_v44 = vadd.f32 %v8700_v18, %v8699_v27  ;;  %v8711_v32 = vadd.f32 %v8529_v42, %v8527_v39  ;;  %v7661_v46 = vpop.f32.mrb[26].mxu0 }
 0x823   :  { %v12866_v43 = vadd.f32 %v8639_v22, %v8638_v12  ;;  %v8650_v9 = vadd.f32 %v8649_v19, %v8648_v52  ;;  %v8695_v41 = vrot.slane %v8694_v36, 1  ;;  %v8705_v0 = vrot.slane %v8704_v38, 4  ;;  %v7663_v40 = vpop.f32.mrb[27].mxu0 }
 0x824   :  { %v12868_v48 = vadd.f32 %v8646_v57, %v8645_v8  ;;  %v8657_v21 = vadd.f32 %v8656_v31, %v8655_v2  ;;  %v8514_v51 = vmul.f32 %v7524_v7, %v12749_v50  ;;  %v7530_v60 = vpop.f32.mrb[30].mxu1  ;;  %v8702_v22 = vrot.slane %v8701_v44, 1 }
 0x825   :  { %v8651_v25 = vrot.slane %v8650_v9, 2  ;;  %v8712_v1 = vrot.slane %v8711_v32, 4  ;;  %v7532_v17 = vpop.f32.mrb[31].mxu1  ;;  %v12873_v8 = vadd.f32 %v8695_v41, %v8694_v36  ;;  %v8706_v52 = vadd.f32 %v8705_v0, %v8704_v38 }
 0x826   :  { %v8658_v27 = vrot.slane %v8657_v21, 2  ;;  %v8515_v39 = vmul.f32 %v7526_v35, %v12752_v23  ;;  %v12876_v3 = vadd.f32 %v8702_v22, %v8701_v44  ;;  %v8530_v7 = vmul.f32 %v7661_v46, %v12760_v53  ;;  %v7667_v57 = vpop.f32.mrb[28].mxu0 }
 0x827   :  { %v8652_v2 = vadd.f32 %v8651_v25, %v8650_v9  ;;  %v8713_v6 = vadd.f32 %v8712_v1, %v8711_v32  ;;  %v8707_v19 = vrot.slane %v8706_v52, 2  ;;  %v8531_v42 = vmul.f32 %v7663_v40, %v12762_v54  ;;  %v7669_v31 = vpop.f32.mrb[29].mxu0 }
 0x828   :  { %v8659_v18 = vadd.f32 %v8658_v27, %v8657_v21  ;;  %v8516_v36 = vmul.f32 %v7530_v60, %v12755_v14  ;;  %v7536_v41 = vpop.f32.mrb[32].mxu1  ;;  %v8517_v9 = vmul.f32 %v7532_v17, %v12764_v55  ;;  %v8532_v21 = vmul.f32 %v7667_v57, %v12769_v26 }
 0x829   :  { %v8653_v38 = vrot.slane %v8652_v2, 1  ;;  %v8714_v44 = vrot.slane %v8713_v6, 2  ;;  %v7538_v32 = vpop.f32.mrb[33].mxu1  ;;  %v8708_v46 = vadd.f32 %v8707_v19, %v8706_v52  ;;  %v8533_v60 = vmul.f32 %v7669_v31, %v12780_v28 }
 0x82a   :  { %v8660_v0 = vrot.slane %v8659_v18, 1  ;;  %v8662_v22 = vadd.f32 %v8516_v36, %v8514_v51  ;;  %v8669_v40 = vadd.f32 %v8517_v9, %v8515_v39  ;;  %v7911_v27 = vpop.f32.mrb[30].mxu0  ;;  %v8718_v35 = vadd.f32 %v8532_v21, %v8530_v7 }
 0x82b   :  { %v8654_v25 = vadd.f32 %v8653_v38, %v8652_v2  ;;  %v8715_v1 = vadd.f32 %v8714_v44, %v8713_v6  ;;  %v8709_v20 = vrot.slane %v8708_v46, 1  ;;  %v7913_v24 = vpop.f32.mrb[31].mxu0  ;;  %v8725_v4 = vadd.f32 %v8533_v60, %v8531_v42 }
 0x82c   :  { %v8661_v12 = vadd.f32 %v8660_v0, %v8659_v18  ;;  %v8663_v61 = vrot.slane %v8662_v22, 4  ;;  %v7542_v33 = vpop.f32.mrb[34].mxu1  ;;  %v8670_v17 = vrot.slane %v8669_v40, 4  ;;  %v8518_v52 = vmul.f32 %v7536_v41, %v12749_v50 }
 0x82d   :  { %v8716_v16 = vrot.slane %v8715_v1, 1  ;;  %v7544_v51 = vpop.f32.mrb[35].mxu1  ;;  %v8710_v57 = vadd.f32 %v8709_v20, %v8708_v46  ;;  %v8719_v6 = vrot.slane %v8718_v35, 4  ;;  %v8726_v31 = vrot.slane %v8725_v4, 4 }
 0x82e   :  { %v9147_v19 = vcombine.low %v8654_v25, %v8661_v12  ;;  %v8664_v2 = vadd.f32 %v8663_v61, %v8662_v22  ;;  %v8671_v36 = vadd.f32 %v8670_v17, %v8669_v40  ;;  %v8519_v18 = vmul.f32 %v7538_v32, %v12752_v23  ;;  %v7917_v38 = vpop.f32.mrb[32].mxu0 }
 0x82f   :  { %v8717_v39 = vadd.f32 %v8716_v16, %v8715_v1  ;;  %v8720_v9 = vadd.f32 %v8719_v6, %v8718_v35  ;;  %v8554_v0 = vmul.f32 %v7911_v27, %v12782_v30  ;;  %v7919_v21 = vpop.f32.mrb[33].mxu0  ;;  %v8727_v41 = vadd.f32 %v8726_v31, %v8725_v4 }
 0x830   :  { %v9178_v44 = vrot.slane %v9147_v19, 7  ;;  %v8665_v7 = vrot.slane %v8664_v2, 2  ;;  %v7673_v42 = vpop.f32.mrb[36].mxu1  ;;  %v8672_v50 = vrot.slane %v8671_v36, 2  ;;  %v8555_v20 = vmul.f32 %v7913_v24, %v12785_v34 }
 0x831   :  { %v9151_v60 = vcombine.low %v8710_v57, %v8717_v39  ;;  %v7675_v61 = vpop.f32.mrb[37].mxu1  ;;  %v13372_v16 = vcombine.low %v12866_v43, %v12868_v48  ;;  %v8721_v32 = vrot.slane %v8720_v9, 2  ;;  %v8520_v35 = vmul.f32 %v7542_v33, %v12755_v14 }
 0x832   :  { %v8666_v23 = vadd.f32 %v8665_v7, %v8664_v2  ;;  %v8673_v25 = vadd.f32 %v8672_v50, %v8671_v36  ;;  %v8728_v1 = vrot.slane %v8727_v41, 2  ;;  %v7923_v4 = vpop.f32.mrb[34].mxu0  ;;  %v8521_v17 = vmul.f32 %v7544_v51, %v12764_v55 }
 0x833   :  { %v9180_v12 = vsel %vm9179_vm4, %v9178_v44, %v13372_v16  ;;  %v9193_v22 = vrot.slane %v9151_v60, 7  ;;  %v8722_v24 = vadd.f32 %v8721_v32, %v8720_v9  ;;  %v8676_v27 = vadd.f32 %v8520_v35, %v8518_v52  ;;  %v7925_v43 = vpop.f32.mrb[35].mxu0 }
 0x834   :  { %v9182_v46 = vsel %vm9181_vm5, %v9178_v44, %v9180_v12  ;;  %v8667_v40 = vrot.slane %v8666_v23, 1  ;;  %v7679_v48 = vpop.f32.mrb[38].mxu1  ;;  %v13373_v19 = vcombine.low %v12873_v8, %v12876_v3  ;;  %v8674_v14 = vrot.slane %v8673_v25, 1 }
 0x835   :  { %v8729_v33 = vadd.f32 %v8728_v1, %v8727_v41  ;;  %v8556_v2 = vmul.f32 %v7917_v38, %v12788_v37  ;;  %v7681_v6 = vpop.f32.mrb[39].mxu1  ;;  %v8723_v31 = vrot.slane %v8722_v24, 1  ;;  %v8677_v44 = vrot.slane %v8676_v27, 4 }
 0x836   :  { %v9194_v57 = vsel %vm9179_vm4, %v9193_v22, %v13373_v19  ;;  %v8668_v36 = vadd.f32 %v8667_v40, %v8666_v23  ;;  %v8675_v52 = vadd.f32 %v8674_v14, %v8673_v25  ;;  %v8683_v55 = vadd.f32 %v8521_v17, %v8519_v18  ;;  %v7929_v9 = vpop.f32.mrb[36].mxu0 }
 0x837   :  { %v9195_v39 = vsel %vm9181_vm5, %v9193_v22, %v9194_v57  ;;  %v8730_v7 = vrot.slane %v8729_v33, 1  ;;  %v8802_v51 = vadd.f32 %v8556_v2, %v8554_v0  ;;  %v8724_v60 = vadd.f32 %v8723_v31, %v8722_v24  ;;  %v7931_v41 = vpop.f32.mrb[37].mxu0 }
 0x838   :  { %v8678_v50 = vadd.f32 %v8677_v44, %v8676_v27  ;;  %v8557_v8 = vmul.f32 %v7919_v21, %v12791_v63  ;;  %v8534_v3 = vmul.f32 %v7673_v42, %v12760_v53  ;;  %v7774_v16 = vpop.f32.mrb[40].mxu1  ;;  %v9148_v38 = vcombine.low %v8668_v36, %v8675_v52 }
 0x839   :  { %v8731_v12 = vadd.f32 %v8730_v7, %v8729_v33  ;;  %v8684_v32 = vrot.slane %v8683_v55, 4  ;;  %v8803_v35 = vrot.slane %v8802_v51, 4  ;;  %v7776_v23 = vpop.f32.mrb[41].mxu1  ;;  %v8535_v25 = vmul.f32 %v7675_v61, %v12762_v54 }
 0x83a   :  { %v8679_v22 = vrot.slane %v8678_v50, 2  ;;  %v8809_v1 = vadd.f32 %v8557_v8, %v8555_v20  ;;  %v8558_v18 = vmul.f32 %v7923_v4, %v12782_v30  ;;  %v9183_v0 = vrot.slane %v9148_v38, 6  ;;  %v7935_v21 = vpop.f32.mrb[38].mxu0 }
 0x83b   :  { %v9152_v40 = vcombine.low %v8724_v60, %v8731_v12  ;;  %v8685_v24 = vadd.f32 %v8684_v32, %v8683_v55  ;;  %v8804_v27 = vadd.f32 %v8803_v35, %v8802_v51  ;;  %v8559_v42 = vmul.f32 %v7925_v43, %v12785_v34  ;;  %v7937_v57 = vpop.f32.mrb[39].mxu0 }
 0x83c   :  { %v8680_v17 = vadd.f32 %v8679_v22, %v8678_v50  ;;  %v8810_v53 = vrot.slane %v8809_v1, 4  ;;  %v8536_v19 = vmul.f32 %v7679_v48, %v12769_v26  ;;  %v7780_v14 = vpop.f32.mrb[42].mxu1  ;;  %v9185_v33 = vsel %vm9184_vm6, %v9183_v0, %v9182_v46 }
 0x83d   :  { %v9196_v20 = vrot.slane %v9152_v40, 6  ;;  %v8686_v2 = vrot.slane %v8685_v24, 2  ;;  %v8805_v54 = vrot.slane %v8804_v27, 2  ;;  %v7782_v61 = vpop.f32.mrb[43].mxu1  ;;  %v9187_v4 = vsel %vm9186_vm7, %v9183_v0, %v9185_v33 }
 0x83e   :  { %v8681_v36 = vrot.slane %v8680_v17, 1  ;;  %v8811_v31 = vadd.f32 %v8810_v53, %v8809_v1  ;;  %v8732_v44 = vadd.f32 %v8536_v19, %v8534_v3  ;;  %v8537_v26 = vmul.f32 %v7681_v6, %v12780_v28  ;;  %v7941_v48 = vpop.f32.mrb[40].mxu0 }
 0x83f   :  { %v9197_v52 = vsel %vm9184_vm6, %v9196_v20, %v9195_v39  ;;  %v8687_v7 = vadd.f32 %v8686_v2, %v8685_v24  ;;  %v8806_v43 = vadd.f32 %v8805_v54, %v8804_v27  ;;  %v7943_v50 = vpop.f32.mrb[41].mxu0  ;;  %v8560_v3 = vmul.f32 %v7929_v9, %v12788_v37 }
 0x840   :  { %v12914_v46 = vsel %vm9186_vm7, %v9196_v20, %v9197_v52  ;;  %v8682_v55 = vadd.f32 %v8681_v36, %v8680_v17  ;;  %v8812_v51 = vrot.slane %v8811_v31, 2  ;;  %v8733_v60 = vrot.slane %v8732_v44, 4  ;;  %v7786_v8 = vpop.f32.mrb[44].mxu1 }
 0x841   :  { %v8688_v38 = vrot.slane %v8687_v7, 1  ;;  %v8807_v12 = vrot.slane %v8806_v43, 1  ;;  %v8739_v32 = vadd.f32 %v8537_v26, %v8535_v25  ;;  %v12917_v39 = vpop.f32.mrb[45].mxu1  ;;  %v8561_v28 = vmul.f32 %v7931_v41, %v12791_v63 }
 0x842   :  { %v8813_v35 = vadd.f32 %v8812_v51, %v8811_v31  ;;  %v8734_v22 = vadd.f32 %v8733_v60, %v8732_v44  ;;  %v8538_v6 = vmul.f32 %v7774_v16, %v12797_v56  ;;  %v8816_v24 = vadd.f32 %v8560_v3, %v8558_v18  ;;  %v12923_v27 = vpop.f32.mrb[42].mxu0 }
 0x843   :  { %v8689_v1 = vadd.f32 %v8688_v38, %v8687_v7  ;;  %v12921_v0 = vadd.f32 %v8807_v12, %v8806_v43  ;;  %v8740_v40 = vrot.slane %v8739_v32, 4  ;;  %v8823_v25 = vadd.f32 %v8561_v28, %v8559_v42  ;;  %v12926_v19 = vpop.f32.mrb[43].mxu0 }
 0x844   :  { %v8814_v17 = vrot.slane %v8813_v35, 1  ;;  %v8735_v53 = vrot.slane %v8734_v22, 2  ;;  %v8539_v9 = vmul.f32 %v7776_v23, %v12807_v11  ;;  %v12928_v33 = vpop.f32.mrb[46].mxu1  ;;  %v8817_v2 = vrot.slane %v8816_v24, 4 }
 0x845   :  { %v9149_v20 = vcombine.low %v8682_v55, %v8689_v1  ;;  %v8741_v41 = vadd.f32 %v8740_v40, %v8739_v32  ;;  %v8562_v16 = vmul.f32 %v7935_v21, %v12782_v30  ;;  %v12931_v54 = vpop.f32.mrb[47].mxu1  ;;  %v8824_v31 = vrot.slane %v8823_v25, 4 }
 0x846   :  { %v12933_v36 = vadd.f32 %v8814_v17, %v8813_v35  ;;  %v8736_v18 = vadd.f32 %v8735_v53, %v8734_v22  ;;  %v8563_v44 = vmul.f32 %v7937_v57, %v12785_v34  ;;  %v8818_v23 = vadd.f32 %v8817_v2, %v8816_v24  ;;  %v12937_v43 = vpop.f32.mrb[44].mxu0 }
 0x847   :  { %v9188_v42 = vrot.slane %v9149_v20, 5  ;;  %v8742_v52 = vrot.slane %v8741_v41, 2  ;;  %v8540_v7 = vmul.f32 %v7780_v14, %v12800_v49  ;;  %v8825_v21 = vadd.f32 %v8824_v31, %v8823_v25  ;;  %v12942_v60 = vpop.f32.mrb[45].mxu0 }
 0x848   :  { %v9158_v26 = vcombine.low %v12921_v0, %v12933_v36  ;;  %v8737_v55 = vrot.slane %v8736_v18, 1  ;;  %v8541_v51 = vmul.f32 %v7782_v61, %v12810_v58  ;;  %v12944_v38 = vpop.f32.mrb[48].mxu1  ;;  %v8819_v32 = vrot.slane %v8818_v23, 2 }
 0x849   :  { %v9190_v57 = vsel %vm9189_vm8, %v9188_v42, %v9187_v4  ;;  %v8743_v12 = vadd.f32 %v8742_v52, %v8741_v41  ;;  %v8746_v3 = vadd.f32 %v8540_v7, %v8538_v6  ;;  %v12947_v35 = vpop.f32.mrb[49].mxu1  ;;  %v8826_v28 = vrot.slane %v8825_v21, 2 }
 0x84a   :  { %v9192_v14 = vsel %vm9191_vm9, %v9188_v42, %v9190_v57  ;;  %v8738_v22 = vadd.f32 %v8737_v55, %v8736_v18  ;;  %v8753_v1 = vadd.f32 %v8541_v51, %v8539_v9  ;;  %v8820_v24 = vadd.f32 %v8819_v32, %v8818_v23  ;;  %v12951_v53 = vpop.f32.mrb[46].mxu0 }
 0x84b   :  { %9264 = vst [vmem:[#allocation16] sm:$0xff] %v9192_v14  ;;  %v8744_v40 = vrot.slane %v8743_v12, 1  ;;  %v8747_v61 = vrot.slane %v8746_v3, 4  ;;  %v8564_v17 = vmul.f32 %v7941_v48, %v12788_v37  ;;  %v8827_v25 = vadd.f32 %v8826_v28, %v8825_v21  ;;  %v12955_v41 = vpop.f32.mrb[47].mxu0 }
 0x84c   :  { %v8754_v4 = vrot.slane %v8753_v1, 4  ;;  %v8565_v20 = vmul.f32 %v7943_v50, %v12791_v63  ;;  %v8542_v6 = vmul.f32 %v7786_v8, %v12797_v56  ;;  %v12957_v2 = vpop.f32.mrb[50].mxu1  ;;  %v8821_v9 = vrot.slane %v8820_v24, 1 }
 0x84d   :  { %v8745_v18 = vadd.f32 %v8744_v40, %v8743_v12  ;;  %v8748_v31 = vadd.f32 %v8747_v61, %v8746_v3  ;;  %v8830_v42 = vadd.f32 %v8564_v17, %v8562_v16  ;;  %v12959_v52 = vpop.f32.mrb[51].mxu1  ;;  %v8828_v23 = vrot.slane %v8827_v25, 1 }
 0x84e   :  { %v8755_v48 = vadd.f32 %v8754_v4, %v8753_v1  ;;  %v8837_v7 = vadd.f32 %v8565_v20, %v8563_v44  ;;  %v8543_v55 = vmul.f32 %v12917_v39, %v12807_v11  ;;  %v8822_v50 = vadd.f32 %v8821_v9, %v8820_v24  ;;  %v12963_v57 = vpop.f32.mrb[48].mxu0 }
 0x84f   :  { %v9153_v21 = vcombine.low %v8738_v22, %v8745_v18  ;;  %v8749_v51 = vrot.slane %v8748_v31, 2  ;;  %v8831_v8 = vrot.slane %v8830_v42, 4  ;;  %v8829_v32 = vadd.f32 %v8828_v23, %v8827_v25  ;;  %v12967_v3 = vpop.f32.mrb[49].mxu0 }
 0x850   :  { %v8756_v14 = vrot.slane %v8755_v48, 2  ;;  %v8838_v12 = vrot.slane %v8837_v7, 4  ;;  %v8566_v16 = vmul.f32 %v12923_v27, %v12782_v30  ;;  %v12969_v28 = vpop.f32.mrb[52].mxu1  ;;  %v8567_v39 = vmul.f32 %v12926_v19, %v12785_v34 }
 0x851   :  { %v9199_v44 = vrot.slane %v9153_v21, 5  ;;  %v8750_v1 = vadd.f32 %v8749_v51, %v8748_v31  ;;  %v8832_v40 = vadd.f32 %v8831_v8, %v8830_v42  ;;  %v12973_v22 = vpop.f32.mrb[53].mxu1  ;;  %v9159_v24 = vcombine.low %v8822_v50, %v8829_v32 }
 0x852   :  { %v8757_v61 = vadd.f32 %v8756_v14, %v8755_v48  ;;  %v8839_v17 = vadd.f32 %v8838_v12, %v8837_v7  ;;  %v8544_v25 = vmul.f32 %v12928_v33, %v12800_v49  ;;  %v8545_v20 = vmul.f32 %v12931_v54, %v12810_v58  ;;  %v12981_v18 = vpop.f32.mrb[50].mxu0 }
 0x853   :  { %v9200_v30 = vsel %vm9189_vm8, %v9199_v44, %v12914_v46  ;;  %v8751_v27 = vrot.slane %v8750_v1, 1  ;;  %v8833_v4 = vrot.slane %v8832_v40, 2  ;;  %v9211_v19 = vrot.slane %v9159_v24, 7  ;;  %v12984_v42 = vpop.f32.mrb[51].mxu0 }
 0x854   :  { %v9201_v34 = vsel %vm9191_vm9, %v9199_v44, %v9200_v30  ;;  %v8758_v9 = vrot.slane %v8757_v61, 1  ;;  %v8840_v31 = vrot.slane %v8839_v17, 2  ;;  %v12986_v23 = vpop.f32.mrb[54].mxu1  ;;  %v8760_v48 = vadd.f32 %v8544_v25, %v8542_v6 }
 0x855   :  { %9265 = vst [vmem:[#allocation16 + $0x8] sm:$0xff] %v9201_v34  ;;  %v12988_v33 = vadd.f32 %v8751_v27, %v8750_v1  ;;  %v8834_v46 = vadd.f32 %v8833_v4, %v8832_v40  ;;  %v8767_v7 = vadd.f32 %v8545_v20, %v8543_v55  ;;  %v12990_v21 = vpop.f32.mrb[55].mxu1  ;;  %v9212_v54 = vsel %vm9179_vm4, %v9211_v19, %v9158_v26 }
 0x856   :  { %v12996_v50 = vadd.f32 %v8758_v9, %v8757_v61  ;;  %v8841_v51 = vadd.f32 %v8840_v31, %v8839_v17  ;;  %v8568_v8 = vmul.f32 %v12937_v43, %v12788_v37  ;;  %v9213_v32 = vsel %vm9181_vm5, %v9211_v19, %v9212_v54  ;;  %v13001_v6 = vpop.f32.mrb[52].mxu0 }
 0x857   :  { %v8835_v14 = vrot.slane %v8834_v46, 1  ;;  %v8761_v12 = vrot.slane %v8760_v48, 4  ;;  %v8768_v44 = vrot.slane %v8767_v7, 4  ;;  %v8569_v36 = vmul.f32 %v12942_v60, %v12791_v63  ;;  %v13007_v26 = vpop.f32.mrb[53].mxu0 }
 0x858   :  { %v9154_v55 = vcombine.low %v12988_v33, %v12996_v50  ;;  %v8842_v1 = vrot.slane %v8841_v51, 1  ;;  %v8844_v0 = vadd.f32 %v8568_v8, %v8566_v16  ;;  %v13009_v40 = vpop.f32.mrb[56].mxu1  ;;  %v8546_v61 = vmul.f32 %v12944_v38, %v12797_v56 }
 0x859   :  { %v8836_v37 = vadd.f32 %v8835_v14, %v8834_v46  ;;  %v8762_v43 = vadd.f32 %v8761_v12, %v8760_v48  ;;  %v8769_v24 = vadd.f32 %v8768_v44, %v8767_v7  ;;  %v13013_v17 = vpop.f32.mrb[57].mxu1  ;;  %v8851_v27 = vadd.f32 %v8569_v36, %v8567_v39 }
 0x85a   :  { %v8843_v25 = vadd.f32 %v8842_v1, %v8841_v51  ;;  %v8845_v30 = vrot.slane %v8844_v0, 4  ;;  %v8547_v16 = vmul.f32 %v12947_v35, %v12807_v11  ;;  %v8586_v60 = vmul.f32 %v12951_v53, %v12813_v29  ;;  %v13021_v34 = vpop.f32.mrb[54].mxu0 }
 0x85b   :  { %v8763_v4 = vrot.slane %v8762_v43, 2  ;;  %v8770_v63 = vrot.slane %v8769_v24, 2  ;;  %v8587_v20 = vmul.f32 %v12955_v41, %v12821_v15  ;;  %v8852_v9 = vrot.slane %v8851_v27, 4  ;;  %v13025_v39 = vpop.f32.mrb[55].mxu0 }
 0x85c   :  { %v9160_v19 = vcombine.low %v8836_v37, %v8843_v25  ;;  %v8846_v38 = vadd.f32 %v8845_v30, %v8844_v0  ;;  %v8548_v31 = vmul.f32 %v12957_v2, %v12800_v49  ;;  %v13027_v46 = vpop.f32.mrb[58].mxu1  ;;  %v8549_v53 = vmul.f32 %v12959_v52, %v12810_v58 }
 0x85d   :  { %v8764_v35 = vadd.f32 %v8763_v4, %v8762_v43  ;;  %v8771_v48 = vadd.f32 %v8770_v63, %v8769_v24  ;;  %v8588_v41 = vmul.f32 %v12963_v57, %v12817_v5  ;;  %v13033_v7 = vpop.f32.mrb[59].mxu1  ;;  %v8853_v8 = vadd.f32 %v8852_v9, %v8851_v27 }
 0x85e   :  { %v9214_v54 = vrot.slane %v9160_v19, 6  ;;  %v8847_v51 = vrot.slane %v8846_v38, 2  ;;  %v8774_v14 = vadd.f32 %v8548_v31, %v8546_v61  ;;  %v8781_v44 = vadd.f32 %v8549_v53, %v8547_v16  ;;  %v13035_v0 = vpop.f32.mrb[56].mxu0 }
 0x85f   :  { %v8765_v12 = vrot.slane %v8764_v35, 1  ;;  %v8772_v2 = vrot.slane %v8771_v48, 1  ;;  %v8914_v1 = vadd.f32 %v8588_v41, %v8586_v60  ;;  %v8854_v43 = vrot.slane %v8853_v8, 2  ;;  %v13038_v24 = vpop.f32.mrb[57].mxu0 }
 0x860   :  { %v9215_v36 = vsel %vm9184_vm6, %v9214_v54, %v9213_v32  ;;  %v8848_v37 = vadd.f32 %v8847_v51, %v8846_v38  ;;  %v8775_v52 = vrot.slane %v8774_v14, 4  ;;  %v13040_v57 = vpop.f32.mrb[60].mxu1  ;;  %v8782_v61 = vrot.slane %v8781_v44, 4 }
 0x861   :  { %v9216_v25 = vsel %vm9186_vm7, %v9214_v54, %v9215_v36  ;;  %v8766_v30 = vadd.f32 %v8765_v12, %v8764_v35  ;;  %v8773_v27 = vadd.f32 %v8772_v2, %v8771_v48  ;;  %v13043_v4 = vpop.f32.mrb[61].mxu1  ;;  %v8855_v63 = vadd.f32 %v8854_v43, %v8853_v8 }
 0x862   :  { %v8849_v16 = vrot.slane %v8848_v37, 1  ;;  %v8776_v60 = vadd.f32 %v8775_v52, %v8774_v14  ;;  %v8915_v19 = vrot.slane %v8914_v1, 4  ;;  %v8783_v32 = vadd.f32 %v8782_v61, %v8781_v44  ;;  %v13049_v53 = vpop.f32.mrb[58].mxu0 }
 0x863   :  { %v9155_v9 = vcombine.low %v8766_v30, %v8773_v27  ;;  %v8589_v38 = vmul.f32 %v12967_v3, %v12824_v13  ;;  %v8550_v31 = vmul.f32 %v12969_v28, %v12797_v56  ;;  %v8856_v35 = vrot.slane %v8855_v63, 1  ;;  %v13051_v51 = vpop.f32.mrb[59].mxu0 }
 0x864   :  { %v8850_v41 = vadd.f32 %v8849_v16, %v8848_v37  ;;  %v8777_v48 = vrot.slane %v8776_v60, 2  ;;  %v8916_v54 = vadd.f32 %v8915_v19, %v8914_v1  ;;  %v13053_v12 = vpop.f32.mrb[62].mxu1  ;;  %v8784_v14 = vrot.slane %v8783_v32, 2 }
 0x865   :  { %v9202_v8 = vrot.slane %v9155_v9, 7  ;;  %v8921_v2 = vadd.f32 %v8589_v38, %v8587_v20  ;;  %v8551_v44 = vmul.f32 %v12973_v22, %v12807_v11  ;;  %v13057_v3 = vpop.f32.mrb[63].mxu1  ;;  %v8857_v36 = vadd.f32 %v8856_v35, %v8855_v63 }
 0x866   :  { %v8778_v56 = vadd.f32 %v8777_v48, %v8776_v60  ;;  %v8917_v28 = vrot.slane %v8916_v54, 2  ;;  %v8590_v37 = vmul.f32 %v12981_v18, %v12813_v29  ;;  %v8785_v43 = vadd.f32 %v8784_v14, %v8783_v32  ;;  %v13067_v30 = vpop.f32.mrb[60].mxu0 }
 0x867   :  { %v9203_v1 = vsel %vm9179_vm4, %v9202_v8, %v9154_v55  ;;  %v8922_v52 = vrot.slane %v8921_v2, 4  ;;  %v8591_v20 = vmul.f32 %v12984_v42, %v12821_v15  ;;  %v9161_v22 = vcombine.low %v8850_v41, %v8857_v36  ;;  %v13070_v16 = vpop.f32.mrb[61].mxu0 }
 0x868   :  { %v9204_v11 = vsel %vm9181_vm5, %v9202_v8, %v9203_v1  ;;  %v8779_v27 = vrot.slane %v8778_v56, 1  ;;  %v8918_v61 = vadd.f32 %v8917_v28, %v8916_v54  ;;  %v13072_v18 = vpop.f32.mrb[64].mxu1  ;;  %v8786_v63 = vrot.slane %v8785_v43, 1 }
 0x869   :  { %v8923_v33 = vadd.f32 %v8922_v52, %v8921_v2  ;;  %v8552_v50 = vmul.f32 %v12986_v23, %v12800_v49  ;;  %v8553_v55 = vmul.f32 %v12990_v21, %v12810_v58  ;;  %v13078_v42 = vpop.f32.mrb[65].mxu1  ;;  %v9217_v60 = vrot.slane %v9161_v22, 5 }
 0x86a   :  { %v8780_v19 = vadd.f32 %v8779_v27, %v8778_v56  ;;  %v8919_v9 = vrot.slane %v8918_v61, 1  ;;  %v8592_v32 = vmul.f32 %v13001_v6, %v12817_v5  ;;  %v8787_v38 = vadd.f32 %v8786_v63, %v8785_v43  ;;  %v13082_v54 = vpop.f32.mrb[62].mxu0 }
 0x86b   :  { %v8924_v41 = vrot.slane %v8923_v33, 2  ;;  %v8788_v35 = vadd.f32 %v8552_v50, %v8550_v31  ;;  %v8795_v48 = vadd.f32 %v8553_v55, %v8551_v44  ;;  %v9218_v8 = vsel %vm9189_vm8, %v9217_v60, %v9216_v25  ;;  %v13089_v21 = vpop.f32.mrb[63].mxu0 }
 0x86c   :  { %v13085_v49 = vadd.f32 %v8919_v9, %v8918_v61  ;;  %v8928_v23 = vadd.f32 %v8592_v32, %v8590_v37  ;;  %v8593_v58 = vmul.f32 %v13007_v26, %v12824_v13  ;;  %v13091_v14 = vpop.f32.mrb[66].mxu1  ;;  %v9219_v6 = vsel %vm9191_vm9, %v9217_v60, %v9218_v8 }
 0x86d   :  { %v9156_v2 = vcombine.low %v8780_v19, %v8787_v38  ;;  %v8925_v36 = vadd.f32 %v8924_v41, %v8923_v33  ;;  %v8789_v31 = vrot.slane %v8788_v35, 4  ;;  %v13094_v44 = vpop.f32.mrb[67].mxu1  ;;  %9267 = vst [vmem:[#allocation16 + $0x18] sm:$0xff] %v9219_v6  ;;  %v8796_v56 = vrot.slane %v8795_v48, 4 }
 0x86e   :  { %v8929_v25 = vrot.slane %v8928_v23, 4  ;;  %v8935_v28 = vadd.f32 %v8593_v58, %v8591_v20  ;;  %v8570_v37 = vmul.f32 %v13009_v40, %v12826_v62  ;;  %v8571_v52 = vmul.f32 %v13013_v17, %v12833_v45  ;;  %v13100_v22 = vpop.f32.mrb[64].mxu0 }
 0x86f   :  { %v9205_v1 = vrot.slane %v9156_v2, 6  ;;  %v8926_v26 = vrot.slane %v8925_v36, 1  ;;  %v8790_v43 = vadd.f32 %v8789_v31, %v8788_v35  ;;  %v8797_v27 = vadd.f32 %v8796_v56, %v8795_v48  ;;  %v13104_v50 = vpop.f32.mrb[65].mxu0 }
 0x870   :  { %v8930_v61 = vadd.f32 %v8929_v25, %v8928_v23  ;;  %v8936_v63 = vrot.slane %v8935_v28, 4  ;;  %v8594_v33 = vmul.f32 %v13021_v34, %v12813_v29  ;;  %v13106_v20 = vpop.f32.mrb[68].mxu1  ;;  %v8595_v17 = vmul.f32 %v13025_v39, %v12821_v15 }
 0x871   :  { %v9206_v40 = vsel %vm9184_vm6, %v9205_v1, %v9204_v11  ;;  %v13109_v55 = vadd.f32 %v8926_v26, %v8925_v36  ;;  %v8791_v60 = vrot.slane %v8790_v43, 2  ;;  %v13113_v19 = vpop.f32.mrb[69].mxu1  ;;  %v8798_v32 = vrot.slane %v8797_v27, 2 }
 0x872   :  { %v9207_v9 = vsel %vm9186_vm7, %v9205_v1, %v9206_v40  ;;  %v8931_v38 = vrot.slane %v8930_v61, 2  ;;  %v8937_v41 = vadd.f32 %v8936_v63, %v8935_v28  ;;  %v8572_v11 = vmul.f32 %v13027_v46, %v12836_v47  ;;  %v13122_v8 = vpop.f32.mrb[66].mxu0 }
 0x873   :  { %v8792_v35 = vadd.f32 %v8791_v60, %v8790_v43  ;;  %v8573_v48 = vmul.f32 %v13033_v7, %v12838_v10  ;;  %v8799_v39 = vadd.f32 %v8798_v32, %v8797_v27  ;;  %v8596_v6 = vmul.f32 %v13035_v0, %v12817_v5  ;;  %v13126_v2 = vpop.f32.mrb[67].mxu0 }
 0x874   :  { %v8932_v23 = vadd.f32 %v8931_v38, %v8930_v61  ;;  %v8938_v58 = vrot.slane %v8937_v41, 2  ;;  %v13128_v36 = vpop.f32.mrb[70].mxu1  ;;  %v8858_v56 = vadd.f32 %v8572_v11, %v8570_v37  ;;  %v8597_v46 = vmul.f32 %v13038_v24, %v12824_v13 }
 0x875   :  { %v8793_v31 = vrot.slane %v8792_v35, 1  ;;  %v8865_v25 = vadd.f32 %v8573_v48, %v8571_v52  ;;  %v13132_v28 = vpop.f32.mrb[71].mxu1  ;;  %v8800_v7 = vrot.slane %v8799_v39, 1  ;;  %v8942_v43 = vadd.f32 %v8596_v6, %v8594_v33 }
 0x876   :  { %v8933_v1 = vrot.slane %v8932_v23, 1  ;;  %v8939_v26 = vadd.f32 %v8938_v58, %v8937_v41  ;;  %v8859_v61 = vrot.slane %v8858_v56, 4  ;;  %v8949_v0 = vadd.f32 %v8597_v46, %v8595_v17  ;;  %v13134_v40 = vpop.f32.mrb[68].mxu0 }
 0x877   :  { %v8794_v27 = vadd.f32 %v8793_v31, %v8792_v35  ;;  %v8866_v63 = vrot.slane %v8865_v25, 4  ;;  %v8801_v60 = vadd.f32 %v8800_v7, %v8799_v39  ;;  %v8943_v37 = vrot.slane %v8942_v43, 4  ;;  %v13136_v52 = vpop.f32.mrb[69].mxu0 }
 0x878   :  { %v8934_v32 = vadd.f32 %v8933_v1, %v8932_v23  ;;  %v8940_v38 = vrot.slane %v8939_v26, 1  ;;  %v13138_v11 = vpop.f32.mrb[72].mxu1  ;;  %v8860_v24 = vadd.f32 %v8859_v61, %v8858_v56  ;;  %v8950_v34 = vrot.slane %v8949_v0, 4 }
 0x879   :  { %v8867_v48 = vadd.f32 %v8866_v63, %v8865_v25  ;;  %v8574_v33 = vmul.f32 %v13040_v57, %v12826_v62  ;;  %v13142_v41 = vpop.f32.mrb[73].mxu1  ;;  %v9157_v35 = vcombine.low %v8794_v27, %v8801_v60  ;;  %v8944_v58 = vadd.f32 %v8943_v37, %v8942_v43 }
 0x87a   :  { %v8941_v17 = vadd.f32 %v8940_v38, %v8939_v26  ;;  %v8575_v39 = vmul.f32 %v13043_v4, %v12833_v45  ;;  %v8861_v23 = vrot.slane %v8860_v24, 2  ;;  %v8951_v31 = vadd.f32 %v8950_v34, %v8949_v0  ;;  %v13148_v56 = vpop.f32.mrb[70].mxu0 }
 0x87b   :  { %v8868_v6 = vrot.slane %v8867_v48, 2  ;;  %v8598_v46 = vmul.f32 %v13049_v53, %v12813_v29  ;;  %v9208_v25 = vrot.slane %v9157_v35, 5  ;;  %v8945_v1 = vrot.slane %v8944_v58, 2  ;;  %v13152_v27 = vpop.f32.mrb[71].mxu0 }
 0x87c   :  { %v9167_v7 = vcombine.low %v8934_v32, %v8941_v17  ;;  %v8599_v57 = vmul.f32 %v13051_v51, %v12821_v15  ;;  %v13154_v26 = vpop.f32.mrb[74].mxu1  ;;  %v8862_v43 = vadd.f32 %v8861_v23, %v8860_v24  ;;  %v8952_v61 = vrot.slane %v8951_v31, 2 }
 0x87d   :  { %v8869_v4 = vadd.f32 %v8868_v6, %v8867_v48  ;;  %v8576_v34 = vmul.f32 %v13053_v12, %v12836_v47  ;;  %v13158_v63 = vpop.f32.mrb[75].mxu1  ;;  %v9209_v29 = vsel %vm9189_vm8, %v9208_v25, %v9207_v9  ;;  %v8946_v0 = vadd.f32 %v8945_v1, %v8944_v58 }
 0x87e   :  { %v9229_v53 = vrot.slane %v9167_v7, 7  ;;  %v8577_v60 = vmul.f32 %v13057_v3, %v12838_v10  ;;  %v9210_v15 = vsel %vm9191_vm9, %v9208_v25, %v9209_v29  ;;  %v8863_v51 = vrot.slane %v8862_v43, 1  ;;  %v13164_v37 = vpop.f32.mrb[72].mxu0 }
 0x87f   :  { %v8870_v32 = vrot.slane %v8869_v4, 1  ;;  %v8953_v38 = vadd.f32 %v8952_v61, %v8951_v31  ;;  %9266 = vst [vmem:[#allocation16 + $0x10] sm:$0xff] %v9210_v15  ;;  %v13374_v12 = vcombine.low %v13085_v49, %v13109_v55  ;;  %v8947_v48 = vrot.slane %v8946_v0, 1  ;;  %v13170_v17 = vpop.f32.mrb[73].mxu0 }
 0x880   :  { %v8872_v9 = vadd.f32 %v8576_v34, %v8574_v33  ;;  %v8879_v35 = vadd.f32 %v8577_v60, %v8575_v39  ;;  %v13172_v58 = vpop.f32.mrb[76].mxu1  ;;  %v13175_v23 = vadd.f32 %v8863_v51, %v8862_v43  ;;  %v8600_v33 = vmul.f32 %v13067_v30, %v12817_v5 }
 0x881   :  { %v9230_v24 = vsel %vm9179_vm4, %v9229_v53, %v13374_v12  ;;  %v13177_v6 = vadd.f32 %v8870_v32, %v8869_v4  ;;  %v8954_v31 = vrot.slane %v8953_v38, 1  ;;  %v13179_v25 = vpop.f32.mrb[77].mxu1  ;;  %v8948_v7 = vadd.f32 %v8947_v48, %v8946_v0 }
 0x882   :  { %v9231_v3 = vsel %vm9181_vm5, %v9229_v53, %v9230_v24  ;;  %v8873_v49 = vrot.slane %v8872_v9, 4  ;;  %v8880_v55 = vrot.slane %v8879_v35, 4  ;;  %v8601_v61 = vmul.f32 %v13070_v16, %v12824_v13  ;;  %v13189_v4 = vpop.f32.mrb[74].mxu0  ;;  %v13375_v16 = vld [vmem:[#allocation23_spill] sm:$0xff] }
 0x883   :  { %v8955_v1 = vadd.f32 %v8954_v31, %v8953_v38  ;;  %v8578_v43 = vmul.f32 %v13072_v18, %v12826_v62  ;;  %v8956_v53 = vadd.f32 %v8600_v33, %v8598_v46  ;;  %v8579_v0 = vmul.f32 %v13078_v42, %v12833_v45  ;;  %v13193_v60 = vpop.f32.mrb[75].mxu0 }
 0x884   :  { %v8874_v34 = vadd.f32 %v8873_v49, %v8872_v9  ;;  %v8881_v29 = vadd.f32 %v8880_v55, %v8879_v35  ;;  %v13195_v5 = vpop.f32.mrb[78].mxu1  ;;  %v8963_v15 = vadd.f32 %v8601_v61, %v8599_v57  ;;  %v8618_v13 = vmul.f32 %v13082_v54, %v12840_v59  ;;  %v13376_v57 = vld [vmem:[#allocation24_spill] sm:$0xff] }
 0x885   :  { %v9168_v30 = vcombine.low %v8948_v7, %v8955_v1  ;;  %v8619_v18 = vmul.f32 %v13089_v21, %v13375_v16  ;;  %v13201_v51 = vpop.f32.mrb[79].mxu1  ;;  %v8957_v46 = vrot.slane %v8956_v53, 4  ;;  %v8580_v42 = vmul.f32 %v13091_v14, %v12836_v47 }
 0x886   :  { %v8875_v32 = vrot.slane %v8874_v34, 2  ;;  %v8882_v38 = vrot.slane %v8881_v29, 2  ;;  %v8964_v24 = vrot.slane %v8963_v15, 4  ;;  %v8581_v48 = vmul.f32 %v13094_v44, %v12838_v10  ;;  %v13209_v54 = vpop.f32.mrb[76].mxu0 }
 0x887   :  { %v9232_v12 = vrot.slane %v9168_v30, 6  ;;  %v8620_v9 = vmul.f32 %v13100_v22, %v13376_v57  ;;  %13377 = vst [vmem:[#allocation23_spill] sm:$0xff] %v13209_v54  ;;  %v8958_v31 = vadd.f32 %v8957_v46, %v8956_v53  ;;  %v8886_v7 = vadd.f32 %v8580_v42, %v8578_v43  ;;  %v13211_v49 = vpop.f32.mrb[77].mxu0  ;;  %v13380_v42 = vld [vmem:[#allocation25_spill] sm:$0xff] }
 0x888   :  { %v8876_v35 = vadd.f32 %v8875_v32, %v8874_v34  ;;  %v8883_v21 = vadd.f32 %v8882_v38, %v8881_v29  ;;  %v13213_v55 = vpop.f32.mrb[80].mxu1  ;;  %v8965_v33 = vadd.f32 %v8964_v24, %v8963_v15  ;;  %v8893_v1 = vadd.f32 %v8581_v48, %v8579_v0 }
 0x889   :  { %13378 = vst [vmem:[#allocation24_spill] sm:$0xff] %v13213_v55  ;;  %v9233_v14 = vsel %vm9184_vm6, %v9232_v12, %v9231_v3  ;;  %v9026_v61 = vadd.f32 %v8620_v9, %v8618_v13  ;;  %v13216_v30 = vpop.f32.mrb[81].mxu1  ;;  %v8959_v54 = vrot.slane %v8958_v31, 2  ;;  %v8887_v29 = vrot.slane %v8886_v7, 4 }
 0x88a   :  { %13379 = vst [vmem:[#allocation30_spill] sm:$0xff] %v13216_v30  ;;  %v9234_v44 = vsel %vm9186_vm7, %v9232_v12, %v9233_v14  ;;  %v8877_v22 = vrot.slane %v8876_v35, 1  ;;  %v8884_v39 = vrot.slane %v8883_v21, 1  ;;  %v8966_v34 = vrot.slane %v8965_v33, 2 }
 0x88b   :  { %v8894_v53 = vrot.slane %v8893_v1, 4  ;;  %v9027_v43 = vrot.slane %v9026_v61, 4  ;;  %v8960_v46 = vadd.f32 %v8959_v54, %v8958_v31  ;;  %v8621_v3 = vmul.f32 %v13104_v50, %v13380_v42 }
 0x88c   :  { %v8878_v32 = vadd.f32 %v8877_v22, %v8876_v35  ;;  %v8885_v38 = vadd.f32 %v8884_v39, %v8883_v21  ;;  %v13221_v15 = vpop.f32.mrb[82].mxu1  ;;  %v8967_v0 = vadd.f32 %v8966_v34, %v8965_v33  ;;  %v8888_v13 = vadd.f32 %v8887_v29, %v8886_v7 }
 0x88d   :  { %v8895_v24 = vadd.f32 %v8894_v53, %v8893_v1  ;;  %v9028_v48 = vadd.f32 %v9027_v43, %v9026_v61  ;;  %v13223_v12 = vpop.f32.mrb[83].mxu1  ;;  %v8961_v14 = vrot.slane %v8960_v46, 1  ;;  %v9033_v30 = vadd.f32 %v8621_v3, %v8619_v18 }
 0x88e   :  { %v9163_v9 = vcombine.low %v8878_v32, %v8885_v38  ;;  %v8582_v55 = vmul.f32 %v13106_v20, %v12826_v62  ;;  %v8968_v35 = vrot.slane %v8967_v0, 1  ;;  %v8889_v39 = vrot.slane %v8888_v13, 2 }
 0x88f   :  { %v8896_v54 = vrot.slane %v8895_v24, 2  ;;  %v9029_v21 = vrot.slane %v9028_v48, 2  ;;  %v8962_v50 = vadd.f32 %v8961_v14, %v8960_v46  ;;  %v9034_v22 = vrot.slane %v9033_v30, 4 }
 0x890   :  { %v9220_v31 = vrot.slane %v9163_v9, 7  ;;  %v8583_v7 = vmul.f32 %v13113_v19, %v12833_v45  ;;  %v13229_v33 = vpop.f32.mrb[84].mxu1  ;;  %v8969_v1 = vadd.f32 %v8968_v35, %v8967_v0  ;;  %v8890_v61 = vadd.f32 %v8889_v39, %v8888_v13 }
 0x891   :  { %v8897_v34 = vadd.f32 %v8896_v54, %v8895_v24  ;;  %v9030_v29 = vadd.f32 %v9029_v21, %v9028_v48  ;;  %v13231_v18 = vpop.f32.mrb[85].mxu1  ;;  %v13381_v62 = vcombine.low %v13175_v23, %v13177_v6  ;;  %v9035_v53 = vadd.f32 %v9034_v22, %v9033_v30 }
 0x892   :  { %v8622_v43 = vmul.f32 %v13122_v8, %v12840_v59  ;;  %v8623_v45 = vmul.f32 %v13126_v2, %v13375_v16  ;;  %v9169_v32 = vcombine.low %v8962_v50, %v8969_v1  ;;  %v8891_v38 = vrot.slane %v8890_v61, 1 }
 0x893   :  { %v9221_v20 = vsel %vm9179_vm4, %v9220_v31, %v13381_v62  ;;  %v8898_v46 = vrot.slane %v8897_v34, 1  ;;  %v9031_v3 = vrot.slane %v9030_v29, 1  ;;  %v9036_v0 = vrot.slane %v9035_v53, 2 }
 0x894   :  { %v9222_v19 = vsel %vm9181_vm5, %v9220_v31, %v9221_v20  ;;  %v8584_v13 = vmul.f32 %v13128_v36, %v12836_v47  ;;  %v8585_v23 = vmul.f32 %v13132_v28, %v12838_v10  ;;  %v13246_v6 = vpop.f32.mrb[86].mxu1  ;;  %v9235_v30 = vrot.slane %v9169_v32, 5 }
 0x895   :  { %v8892_v8 = vadd.f32 %v8891_v38, %v8890_v61  ;;  %v8899_v24 = vadd.f32 %v8898_v46, %v8897_v34  ;;  %v8624_v2 = vmul.f32 %v13134_v40, %v13376_v57  ;;  %v13250_v48 = vpop.f32.mrb[87].mxu1  ;;  %v13252_v9 = vadd.f32 %v9031_v3, %v9030_v29  ;;  %v13382_v61 = vld [vmem:[#allocation26_spill] sm:$0xff]  ;;  %v13383_v29 = vld [vmem:[#allocation27_spill] sm:$0xff] }
 0x896   :  { %v9037_v14 = vadd.f32 %v9036_v0, %v9035_v53  ;;  %v8900_v35 = vadd.f32 %v8584_v13, %v8582_v55  ;;  %v8907_v39 = vadd.f32 %v8585_v23, %v8583_v7  ;;  %v9236_v47 = vsel %vm9189_vm8, %v9235_v30, %v9234_v44 }
 0x897   :  { %v9164_v36 = vcombine.low %v8892_v8, %v8899_v24  ;;  %v9040_v54 = vadd.f32 %v8624_v2, %v8622_v43  ;;  %v8625_v10 = vmul.f32 %v13136_v52, %v13380_v42  ;;  %v9237_v28 = vsel %vm9191_vm9, %v9235_v30, %v9236_v47  ;;  %v13385_v30 = vld [vmem:[#allocation29_spill] sm:$0xff] }
 0x898   :  { %v9038_v21 = vrot.slane %v9037_v14, 1  ;;  %v8901_v31 = vrot.slane %v8900_v35, 4  ;;  %v8908_v50 = vrot.slane %v8907_v39, 4  ;;  %9269 = vst [vmem:[#allocation16 + $0x28] sm:$0xff] %v9237_v28  ;;  %v8602_v55 = vmul.f32 %v13138_v11, %v13382_v61 }
 0x899   :  { %v9223_v40 = vrot.slane %v9164_v36, 6  ;;  %v9041_v22 = vrot.slane %v9040_v54, 4  ;;  %v9047_v1 = vadd.f32 %v8625_v10, %v8623_v45  ;;  %v8603_v62 = vmul.f32 %v13142_v41, %v13383_v29  ;;  %v13384_v41 = vld [vmem:[#allocation28_spill] sm:$0xff] }
 0x89a   :  { %v13260_v7 = vadd.f32 %v9038_v21, %v9037_v14  ;;  %v8902_v44 = vadd.f32 %v8901_v31, %v8900_v35  ;;  %v8909_v34 = vadd.f32 %v8908_v50, %v8907_v39  ;;  %v8626_v43 = vmul.f32 %v13148_v56, %v12840_v59 }
 0x89b   :  { %v9224_v52 = vsel %vm9184_vm6, %v9223_v40, %v9222_v19  ;;  %v9042_v20 = vadd.f32 %v9041_v22, %v9040_v54  ;;  %v9048_v53 = vrot.slane %v9047_v1, 4  ;;  %v8627_v0 = vmul.f32 %v13152_v27, %v13375_v16 }
 0x89c   :  { %v9225_v32 = vsel %vm9186_vm7, %v9223_v40, %v9224_v52  ;;  %v9174_v45 = vcombine.low %v13252_v9, %v13260_v7  ;;  %v8903_v11 = vrot.slane %v8902_v44, 2  ;;  %v8910_v38 = vrot.slane %v8909_v34, 2 }
 0x89d   :  { %v9043_v46 = vrot.slane %v9042_v20, 2  ;;  %v9049_v3 = vadd.f32 %v9048_v53, %v9047_v1  ;;  %v8604_v19 = vmul.f32 %v13154_v26, %v13384_v41  ;;  %v8605_v56 = vmul.f32 %v13158_v63, %v13385_v30 }
 0x89e   :  { %v8904_v13 = vadd.f32 %v8903_v11, %v8902_v44  ;;  %v8911_v23 = vadd.f32 %v8910_v38, %v8909_v34  ;;  %v8628_v8 = vmul.f32 %v13164_v37, %v13376_v57  ;;  %v8629_v14 = vmul.f32 %v13170_v17, %v13380_v42 }
 0x89f   :  { %v9044_v24 = vadd.f32 %v9043_v46, %v9042_v20  ;;  %v9050_v2 = vrot.slane %v9049_v3, 2  ;;  %v8970_v9 = vadd.f32 %v8604_v19, %v8602_v55  ;;  %v8977_v27 = vadd.f32 %v8605_v56, %v8603_v62 }
 0x8a0   :  { %v8905_v35 = vrot.slane %v8904_v13, 1  ;;  %v8912_v39 = vrot.slane %v8911_v23, 1  ;;  %v9054_v47 = vadd.f32 %v8628_v8, %v8626_v43  ;;  %v9061_v10 = vadd.f32 %v8629_v14, %v8627_v0  ;;  %v13386_v14 = vld [vmem:[#allocation23_spill] sm:$0xff] }
 0x8a1   :  { %v9045_v36 = vrot.slane %v9044_v24, 1  ;;  %v9051_v26 = vadd.f32 %v9050_v2, %v9049_v3  ;;  %v8971_v54 = vrot.slane %v8970_v9, 4  ;;  %v8978_v63 = vrot.slane %v8977_v27, 4 }
 0x8a2   :  { %v8906_v28 = vadd.f32 %v8905_v35, %v8904_v13  ;;  %v8913_v21 = vadd.f32 %v8912_v39, %v8911_v23  ;;  %v9055_v31 = vrot.slane %v9054_v47, 4  ;;  %v9062_v22 = vrot.slane %v9061_v10, 4 }
 0x8a3   :  { %v9046_v50 = vadd.f32 %v9045_v36, %v9044_v24  ;;  %v9052_v37 = vrot.slane %v9051_v26, 1  ;;  %v8972_v40 = vadd.f32 %v8971_v54, %v8970_v9  ;;  %v8979_v55 = vadd.f32 %v8978_v63, %v8977_v27 }
 0x8a4   :  { %v9165_v1 = vcombine.low %v8906_v28, %v8913_v21  ;;  %v9056_v7 = vadd.f32 %v9055_v31, %v9054_v47  ;;  %v8606_v17 = vmul.f32 %v13172_v58, %v13382_v61  ;;  %v9063_v62 = vadd.f32 %v9062_v22, %v9061_v10  ;;  %v13387_v28 = vld [vmem:[#allocation24_spill] sm:$0xff] }
 0x8a5   :  { %v9053_v44 = vadd.f32 %v9052_v37, %v9051_v26  ;;  %v8973_v34 = vrot.slane %v8972_v40, 2  ;;  %v8607_v52 = vmul.f32 %v13179_v25, %v13383_v29  ;;  %v8980_v53 = vrot.slane %v8979_v55, 2 }
 0x8a6   :  { %v9226_v20 = vrot.slane %v9165_v1, 5  ;;  %v9057_v43 = vrot.slane %v9056_v7, 2  ;;  %v8630_v11 = vmul.f32 %v13189_v4, %v12840_v59  ;;  %v9064_v3 = vrot.slane %v9063_v62, 2 }
 0x8a7   :  { %v9175_v38 = vcombine.low %v9046_v50, %v9053_v44  ;;  %v8974_v46 = vadd.f32 %v8973_v34, %v8972_v40  ;;  %v8631_v0 = vmul.f32 %v13193_v60, %v13375_v16  ;;  %v8981_v19 = vadd.f32 %v8980_v53, %v8979_v55 }
 0x8a8   :  { %v9227_v58 = vsel %vm9189_vm8, %v9226_v20, %v9225_v32  ;;  %v9058_v13 = vadd.f32 %v9057_v43, %v9056_v7  ;;  %v8608_v23 = vmul.f32 %v13195_v5, %v13384_v41  ;;  %v9065_v24 = vadd.f32 %v9064_v3, %v9063_v62 }
 0x8a9   :  { %v9228_v25 = vsel %vm9191_vm9, %v9226_v20, %v9227_v58  ;;  %v9247_v56 = vrot.slane %v9175_v38, 7  ;;  %v8975_v8 = vrot.slane %v8974_v46, 1  ;;  %v8982_v59 = vrot.slane %v8981_v19, 1 }
 0x8aa   :  { %9268 = vst [vmem:[#allocation16 + $0x20] sm:$0xff] %v9228_v25  ;;  %v9059_v4 = vrot.slane %v9058_v13, 1  ;;  %v8984_v2 = vadd.f32 %v8608_v23, %v8606_v17  ;;  %v8609_v9 = vmul.f32 %v13201_v51, %v13385_v30  ;;  %v9066_v32 = vrot.slane %v9065_v24, 1 }
 0x8ab   :  { %v9248_v60 = vsel %vm9179_vm4, %v9247_v56, %v9174_v45  ;;  %v13295_v16 = vadd.f32 %v8975_v8, %v8974_v46  ;;  %v8632_v5 = vmul.f32 %v13386_v14, %v13376_v57  ;;  %v13300_v39 = vadd.f32 %v8982_v59, %v8981_v19  ;;  %v13388_v57 = vld [vmem:[#allocation30_spill] sm:$0xff] }
 0x8ac   :  { %v9249_v35 = vsel %vm9181_vm5, %v9247_v56, %v9248_v60  ;;  %v9060_v27 = vadd.f32 %v9059_v4, %v9058_v13  ;;  %v8985_v47 = vrot.slane %v8984_v2, 4  ;;  %v9067_v36 = vadd.f32 %v9066_v32, %v9065_v24 }
 0x8ad   :  { %v8991_v26 = vadd.f32 %v8609_v9, %v8607_v52  ;;  %v9068_v54 = vadd.f32 %v8632_v5, %v8630_v11  ;;  %v8633_v51 = vmul.f32 %v13211_v49, %v13380_v42  ;;  %v9170_v45 = vcombine.low %v13295_v16, %v13300_v39 }
 0x8ae   :  { %v8986_v10 = vadd.f32 %v8985_v47, %v8984_v2  ;;  %v8610_v21 = vmul.f32 %v13387_v28, %v13382_v61  ;;  %v8611_v63 = vmul.f32 %v13388_v57, %v13383_v29  ;;  %v9176_v31 = vcombine.low %v9060_v27, %v9067_v36 }
 0x8af   :  { %v8992_v50 = vrot.slane %v8991_v26, 4  ;;  %v9069_v37 = vrot.slane %v9068_v54, 4  ;;  %v9075_v40 = vadd.f32 %v8633_v51, %v8631_v0  ;;  %v8612_v1 = vmul.f32 %v13221_v15, %v13384_v41 }
 0x8b0   :  { %v8987_v22 = vrot.slane %v8986_v10, 2  ;;  %v8613_v49 = vmul.f32 %v13223_v12, %v13385_v30  ;;  %v8614_v42 = vmul.f32 %v13229_v33, %v13382_v61  ;;  %v9250_v55 = vrot.slane %v9176_v31, 6 }
 0x8b1   :  { %v8993_v7 = vadd.f32 %v8992_v50, %v8991_v26  ;;  %v9070_v17 = vadd.f32 %v9069_v37, %v9068_v54  ;;  %v9076_v44 = vrot.slane %v9075_v40, 4  ;;  %v8998_v62 = vadd.f32 %v8612_v1, %v8610_v21 }
 0x8b2   :  { %v8988_v34 = vadd.f32 %v8987_v22, %v8986_v10  ;;  %v9005_v52 = vadd.f32 %v8613_v49, %v8611_v63  ;;  %v8615_v20 = vmul.f32 %v13231_v18, %v13383_v29  ;;  %v9251_v53 = vsel %vm9184_vm6, %v9250_v55, %v9249_v35 }
 0x8b3   :  { %v8994_v43 = vrot.slane %v8993_v7, 2  ;;  %v9071_v15 = vrot.slane %v9070_v17, 2  ;;  %v9077_v11 = vadd.f32 %v9076_v44, %v9075_v40  ;;  %v9252_v12 = vsel %vm9186_vm7, %v9250_v55, %v9251_v53 }
 0x8b4   :  { %v8989_v38 = vrot.slane %v8988_v34, 1  ;;  %v8999_v46 = vrot.slane %v8998_v62, 4  ;;  %v9006_v33 = vrot.slane %v9005_v52, 4  ;;  %v8616_v58 = vmul.f32 %v13246_v6, %v13384_v41 }
 0x8b5   :  { %v8995_v61 = vadd.f32 %v8994_v43, %v8993_v7  ;;  %v9072_v3 = vadd.f32 %v9071_v15, %v9070_v17  ;;  %v9078_v0 = vrot.slane %v9077_v11, 2  ;;  %v8617_v18 = vmul.f32 %v13250_v48, %v13385_v30 }
 0x8b6   :  { %v8990_v19 = vadd.f32 %v8989_v38, %v8988_v34  ;;  %v9000_v13 = vadd.f32 %v8999_v46, %v8998_v62  ;;  %v9007_v23 = vadd.f32 %v9006_v33, %v9005_v52  ;;  %v9012_v8 = vadd.f32 %v8616_v58, %v8614_v42 }
 0x8b7   :  { %v8996_v29 = vrot.slane %v8995_v61, 1  ;;  %v9073_v25 = vrot.slane %v9072_v3, 1  ;;  %v9079_v56 = vadd.f32 %v9078_v0, %v9077_v11  ;;  %v9019_v4 = vadd.f32 %v8617_v18, %v8615_v20 }
 0x8b8   :  { %v9001_v24 = vrot.slane %v9000_v13, 2  ;;  %v9008_v59 = vrot.slane %v9007_v23, 2  ;;  %v9013_v32 = vrot.slane %v9012_v8, 4 }
 0x8b9   :  { %v8997_v2 = vadd.f32 %v8996_v29, %v8995_v61  ;;  %v9074_v9 = vadd.f32 %v9073_v25, %v9072_v3  ;;  %v9080_v60 = vrot.slane %v9079_v56, 1  ;;  %v9020_v6 = vrot.slane %v9019_v4, 4 }
 0x8ba   :  { %v9002_v14 = vadd.f32 %v9001_v24, %v9000_v13  ;;  %v9009_v5 = vadd.f32 %v9008_v59, %v9007_v23  ;;  %v9014_v27 = vadd.f32 %v9013_v32, %v9012_v8 }
 0x8bb   :  { %v9171_v41 = vcombine.low %v8990_v19, %v8997_v2  ;;  %v9081_v35 = vadd.f32 %v9080_v60, %v9079_v56  ;;  %v9021_v48 = vadd.f32 %v9020_v6, %v9019_v4 }
 0x8bc   :  { %v9003_v47 = vrot.slane %v9002_v14, 1  ;;  %v9010_v36 = vrot.slane %v9009_v5, 1  ;;  %v9015_v54 = vrot.slane %v9014_v27, 2 }
 0x8bd   :  { %v9238_v30 = vrot.slane %v9171_v41, 7  ;;  %v9177_v26 = vcombine.low %v9074_v9, %v9081_v35  ;;  %v9022_v28 = vrot.slane %v9021_v48, 2 }
 0x8be   :  { %v9004_v51 = vadd.f32 %v9003_v47, %v9002_v14  ;;  %v9011_v10 = vadd.f32 %v9010_v36, %v9009_v5  ;;  %v9016_v63 = vadd.f32 %v9015_v54, %v9014_v27 }
 0x8bf   :  { %v9239_v21 = vsel %vm9179_vm4, %v9238_v30, %v9170_v45  ;;  %v9253_v57 = vrot.slane %v9177_v26, 5  ;;  %v9023_v37 = vadd.f32 %v9022_v28, %v9021_v48 }
 0x8c0   :  { %v9240_v31 = vsel %vm9181_vm5, %v9238_v30, %v9239_v21  ;;  %v9172_v50 = vcombine.low %v9004_v51, %v9011_v10  ;;  %v9017_v22 = vrot.slane %v9016_v63, 1 }
 0x8c1   :  { %v9254_v40 = vsel %vm9189_vm8, %v9253_v57, %v9252_v12  ;;  %v9024_v42 = vrot.slane %v9023_v37, 1 }
 0x8c2   :  { %v9255_v1 = vsel %vm9191_vm9, %v9253_v57, %v9254_v40  ;;  %v9241_v49 = vrot.slane %v9172_v50, 6  ;;  %v9018_v55 = vadd.f32 %v9017_v22, %v9016_v63 }
 0x8c3   :  { %9271 = vst [vmem:[#allocation16 + $0x38] sm:$0xff] %v9255_v1  ;;  %v9025_v16 = vadd.f32 %v9024_v42, %v9023_v37 }
 0x8c4   :  { %v9242_v7 = vsel %vm9184_vm6, %v9241_v49, %v9240_v31 }
 0x8c5   :  { %v9243_v39 = vsel %vm9186_vm7, %v9241_v49, %v9242_v7  ;;  %v9173_v45 = vcombine.low %v9018_v55, %v9025_v16 }
 0x8c7   :  { %v9244_v17 = vrot.slane %v9173_v45, 5 }
 0x8c9   :  { %v9245_v44 = vsel %vm9189_vm8, %v9244_v17, %v9243_v39 }
 0x8ca   :  { %v9246_v34 = vsel %vm9191_vm9, %v9244_v17, %v9245_v44 }
 0x8cb   :  { %9270 = vst [vmem:[#allocation16 + $0x30] sm:$0xff] %v9246_v34 }
 0x8cc   :  { %11926 = shalt.err (!%p11923_p12)
}
 0x8cd   :  { %s11927_s16 = scalar_lea.hbm %s13357_s10, 1024 }
 0x8ce   :  { %p11928_p13 = scmp.ne.s32.totalorder %s13357_s10, %s11927_s16  ;;  %p11931_p0 = scmp.lt.u32.totalorder %s11927_s16, %s13357_s10 }
 0x8d0   :  { %p11933_p1 = pnand %p11931_p0, %p11928_p13 }
 0x8d2   :  { %11936 = shalt.err (!%p11933_p1)
}
 0x8d3   :  { %s11967_s19 = smov 128   ;;  %s11968_s20 = smov 8  }
 0x8d4   :  { %9283 = dma.vmem_to_hbm [thread:$0]  %s9278_s5, 1024, %s13357_s10, [#allocation4], %s11967_s19, %s11967_s19, %s11968_s20  }
 0x8d5   :  { %11947 = dma.done.wait [#allocation4], 1024  }
 0x8d6   :  { %11948 = vsyncadd [#allocation4], 4294966272 }
 0x8d7   :  { %9287 = vsyncpa [#allocation3], 1 }
 0x8d8   :  { %9288 = vsyncpa [#allocation6], 1 }
 0x8d9   :  { %9289 = vsyncpa [#allocation9], 1 }
 0x8da   :  { %9290 = vsyncpa [#allocation12], 1 }
 0x8db   :  { %9291 = vsyncpa [#allocation15], 1 }
 0x8dc   :  { %9292 = vsyncpa [#allocation4], 1 }

</bundles_post_ra>
